<compile_context>
chip_gen: v5e
topology: v5e:2x2
jax: 0.10.0
libtpu: 0.0.40
codegen_flags: <defaults>
</compile_context>

<pallas_src>
import functools

import jax
import jax.numpy as jnp
from jax import lax
from jax.experimental import pallas as pl
from jax.experimental.pallas import tpu as pltpu

# ----------------------------- problem sizes -----------------------------
B = 64       # batch (>= 2 grid blocks so v7x can use both TCs)
S = 32       # state dim (condition)
A = 16       # action dim
H = 32       # hidden dim of the velocity MLP
N_STEPS = 32 # Euler steps over t in [0, 1]
TB = 32      # batch tile -> grid = (2,)
# TODO(synk): the real guided_model default t_span / solver (e.g. dpm / ODE with
# 1000 steps) is config-dependent; a fixed-step Euler integrator is used here.
# TODO(synk): lane occupancy is <=25% at H=32/A=16; packing K candidate actions
# along the feature axis (up to 128 lanes) would need the real sampler's K.


# ----------------------------- Pallas kernel -----------------------------
def gpg_sample_kernel(x0_ref, s_ref, wx_ref, ws_ref, wt_ref, b1_ref,
                      w2_ref, b2_ref, out_ref, *, n_steps, use_bf16_mxu):
    dt = jnp.float32(1.0 / n_steps)

    # ---- loop-invariant preamble (hoisted out of the serial Euler chain) ----
    state = s_ref[...]                                             # (TB, S)
    cond = jnp.dot(state, ws_ref[...],
                   preferred_element_type=jnp.float32)             # (TB, H)
    bias = cond + b1_ref[...]                                      # fold b1 once
    wt_dt = wt_ref[...] * dt                                       # (1, H), t*wt == i*wt_dt
    wx = wx_ref[...]                                               # (A, H)
    w2_dt = w2_ref[...] * dt                                       # fold dt into W2
    b2_dt = b2_ref[...] * dt                                       # fold dt into b2

    if use_bf16_mxu:
        # MXU operands only; accumulation and VPU/EUP work stay f32.
        wx_mm = wx.astype(jnp.bfloat16)
        w2_mm = w2_dt.astype(jnp.bfloat16)
    else:
        wx_mm = wx
        w2_mm = w2_dt

    def euler_step(i, x):
        i_f = i.astype(jnp.float32)                                # step index as float
        x_mm = x.astype(wx_mm.dtype)
        pre = jnp.dot(x_mm, wx_mm,
                      preferred_element_type=jnp.float32)          # (TB, H)
        # i_f * wt_dt == t * wt; single vector multiply, independent of carry.
        h = jnp.tanh(pre + bias + i_f * wt_dt)                     # (TB, H)  (EUP tanh)
        h_mm = h.astype(w2_mm.dtype)
        dx = jnp.dot(h_mm, w2_mm,
                     preferred_element_type=jnp.float32) + b2_dt   # (TB, A), dt folded
        return x + dx

    # N_STEPS is static -> fully unroll for cross-step scheduling visibility.
    x_final = lax.fori_loop(0, n_steps, euler_step,
                            x0_ref[...].astype(jnp.float32), unroll=True)
    out_ref[...] = x_final.astype(out_ref.dtype)


# ----------------------------- wrapper -----------------------------
@functools.partial(jax.jit, static_argnames=("tb", "n_steps", "use_bf16_mxu"))
def gpg_policy_forward(x0, state, wx, ws, wt, b1, w2, b2, *,
                       tb=TB, n_steps=N_STEPS, use_bf16_mxu=False):
    """GPGPolicy.forward: sample action conditioned on state via guided flow model."""
    b, a = x0.shape
    _, s = state.shape
    h = wx.shape[1]

    # Guard non-divisible batches: zero-pad, run, slice (padded rows discarded).
    b_pad = pl.cdiv(b, tb) * tb
    if b_pad != b:
        x0 = jnp.pad(x0, ((0, b_pad - b), (0, 0)))
        state = jnp.pad(state, ((0, b_pad - b), (0, 0)))
    grid = (b_pad // tb,)

    batch_spec_a = pl.BlockSpec((tb, a), lambda i: (i, 0))
    batch_spec_s = pl.BlockSpec((tb, s), lambda i: (i, 0))
    rep = lambda shape: pl.BlockSpec(shape, lambda i: (0, 0))      # replicated weights

    kernel = functools.partial(gpg_sample_kernel, n_steps=n_steps,
                               use_bf16_mxu=use_bf16_mxu)

    out = pl.pallas_call(
        kernel,
        out_shape=jax.ShapeDtypeStruct((b_pad, a), jnp.float32),
        grid=grid,
        in_specs=[
            batch_spec_a,          # x0
            batch_spec_s,          # state
            rep((a, h)),           # wx
            rep((s, h)),           # ws
            rep((1, h)),           # wt
            rep((1, h)),           # b1
            rep((h, a)),           # w2
            rep((1, a)),           # b2
        ],
        out_specs=batch_spec_a,
        compiler_params=pltpu.CompilerParams(
            dimension_semantics=("parallel",)),
    )(x0, state, wx, ws, wt, b1, w2, b2)
    return out[:b]


# ----------------------------- reference (pure JAX) -----------------------------
def gpg_policy_forward_ref(x0, state, wx, ws, wt, b1, w2, b2):
    cond = state @ ws
    dt = 1.0 / N_STEPS
    x = x0
    for i in range(N_STEPS):
        t = i * dt
        h = jnp.tanh(x @ wx + cond + t * wt + b1)
        v = h @ w2 + b2
        x = x + dt * v
    return x


# ----------------------------- main -----------------------------
if __name__ == "__main__":
    key = jax.random.PRNGKey(0)
    k_x0, k_s, k_wx, k_ws, k_wt, k_b1, k_w2, k_b2 = jax.random.split(key, 8)

    # Deterministic synthetic parameters for the guided flow model's velocity MLP.
    x0 = jax.random.normal(k_x0, (B, A), dtype=jnp.float32)        # gaussian_generator
    state = jax.random.normal(k_s, (B, S), dtype=jnp.float32)
    wx = 0.1 * jax.random.normal(k_wx, (A, H), dtype=jnp.float32)
    ws = 0.1 * jax.random.normal(k_ws, (S, H), dtype=jnp.float32)
    wt = 0.1 * jax.random.normal(k_wt, (1, H), dtype=jnp.float32)
    b1 = 0.01 * jax.random.normal(k_b1, (1, H), dtype=jnp.float32)
    w2 = 0.1 * jax.random.normal(k_w2, (H, A), dtype=jnp.float32)
    b2 = 0.01 * jax.random.normal(k_b2, (1, A), dtype=jnp.float32)

    action = gpg_policy_forward(x0, state, wx, ws, wt, b1, w2, b2)
    action = jax.block_until_ready(action)

    ref = gpg_policy_forward_ref(x0, state, wx, ws, wt, b1, w2, b2)
    assert action.shape == (B, A)
    assert jnp.allclose(action, ref, atol=1e-4, rtol=1e-4), "mismatch vs reference"

    print("KERNEL_OK")
</pallas_src>

<mosaic_0001>
module attributes {stable_mosaic.version = 11 : i64} {
  func.func @gpg_sample_kernel(%arg0: i32, %arg1: memref<32x16xf32, #tpu.memory_space<vmem>>, %arg2: memref<32x32xf32, #tpu.memory_space<vmem>>, %arg3: memref<16x32xf32, #tpu.memory_space<vmem>>, %arg4: memref<32x32xf32, #tpu.memory_space<vmem>>, %arg5: memref<1x32xf32, #tpu.memory_space<vmem>>, %arg6: memref<1x32xf32, #tpu.memory_space<vmem>>, %arg7: memref<32x16xf32, #tpu.memory_space<vmem>>, %arg8: memref<1x16xf32, #tpu.memory_space<vmem>>, %arg9: memref<32x16xf32, #tpu.memory_space<vmem>>) attributes {dimension_semantics = [#tpu.dimension_semantics<parallel>], iteration_bounds = array<i64: 2>, scalar_prefetch = 0 : i64, scratch_operands = 0 : i64, tpu.core_type = #tpu.core_type<tc>, window_params = [{transform_indices = @transform_0, window_bounds = array<i64: 32, 16>}, {transform_indices = @transform_1, window_bounds = array<i64: 32, 32>}, {pipeline_mode = #tpu.pipeline_mode<synchronous>, transform_indices = @transform_2, window_bounds = array<i64: 16, 32>}, {pipeline_mode = #tpu.pipeline_mode<synchronous>, transform_indices = @transform_3, window_bounds = array<i64: 32, 32>}, {pipeline_mode = #tpu.pipeline_mode<synchronous>, transform_indices = @transform_4, window_bounds = array<i64: 1, 32>}, {pipeline_mode = #tpu.pipeline_mode<synchronous>, transform_indices = @transform_5, window_bounds = array<i64: 1, 32>}, {pipeline_mode = #tpu.pipeline_mode<synchronous>, transform_indices = @transform_6, window_bounds = array<i64: 32, 16>}, {pipeline_mode = #tpu.pipeline_mode<synchronous>, transform_indices = @transform_7, window_bounds = array<i64: 1, 16>}, {transform_indices = @transform_8, window_bounds = array<i64: 32, 16>}]} {
    %c0 = arith.constant 0 : index
    %c0_0 = arith.constant 0 : index
    %0 = vector.load %arg2[%c0, %c0_0] : memref<32x32xf32, #tpu.memory_space<vmem>>, vector<32x32xf32>
    %c0_1 = arith.constant 0 : index
    %c0_2 = arith.constant 0 : index
    %1 = vector.load %arg4[%c0_1, %c0_2] : memref<32x32xf32, #tpu.memory_space<vmem>>, vector<32x32xf32>
    %cst = arith.constant dense<0.000000e+00> : vector<32x32xf32>
    %2 = tpu.matmul %0, %1, %cst {dimension_numbers = #tpu.dot_dimension_numbers<[1], [0], [0], [1], [0, 0, 1, 1], [], []>} : vector<32x32xf32>, vector<32x32xf32>, vector<32x32xf32> -> vector<32x32xf32>
    %c0_3 = arith.constant 0 : index
    %c0_4 = arith.constant 0 : index
    %3 = vector.load %arg6[%c0_3, %c0_4] : memref<1x32xf32, #tpu.memory_space<vmem>>, vector<1x32xf32>
    %4 = vector.broadcast %3 : vector<1x32xf32> to vector<32x32xf32>
    %5 = arith.addf %2, %4 : vector<32x32xf32>
    %c0_5 = arith.constant 0 : index
    %c0_6 = arith.constant 0 : index
    %6 = vector.load %arg5[%c0_5, %c0_6] : memref<1x32xf32, #tpu.memory_space<vmem>>, vector<1x32xf32>
    %cst_7 = arith.constant 3.125000e-02 : f32
    %7 = vector.broadcast %cst_7 : f32 to vector<1x32xf32>
    %8 = arith.mulf %6, %7 : vector<1x32xf32>
    %c0_8 = arith.constant 0 : index
    %c0_9 = arith.constant 0 : index
    %9 = vector.load %arg3[%c0_8, %c0_9] : memref<16x32xf32, #tpu.memory_space<vmem>>, vector<16x32xf32>
    %c0_10 = arith.constant 0 : index
    %c0_11 = arith.constant 0 : index
    %10 = vector.load %arg7[%c0_10, %c0_11] : memref<32x16xf32, #tpu.memory_space<vmem>>, vector<32x16xf32>
    %cst_12 = arith.constant 3.125000e-02 : f32
    %11 = vector.broadcast %cst_12 : f32 to vector<32x16xf32>
    %12 = arith.mulf %10, %11 : vector<32x16xf32>
    %c0_13 = arith.constant 0 : index
    %c0_14 = arith.constant 0 : index
    %13 = vector.load %arg8[%c0_13, %c0_14] : memref<1x16xf32, #tpu.memory_space<vmem>>, vector<1x16xf32>
    %cst_15 = arith.constant 3.125000e-02 : f32
    %14 = vector.broadcast %cst_15 : f32 to vector<1x16xf32>
    %15 = arith.mulf %13, %14 : vector<1x16xf32>
    %c0_16 = arith.constant 0 : index
    %c0_17 = arith.constant 0 : index
    %16 = vector.load %arg1[%c0_16, %c0_17] : memref<32x16xf32, #tpu.memory_space<vmem>>, vector<32x16xf32>
    %c0_i32 = arith.constant 0 : i32
    %17 = arith.sitofp %c0_i32 : i32 to f32
    %cst_18 = arith.constant dense<0.000000e+00> : vector<32x32xf32>
    %18 = tpu.matmul %16, %9, %cst_18 {dimension_numbers = #tpu.dot_dimension_numbers<[1], [0], [0], [1], [0, 0, 1, 1], [], []>} : vector<32x16xf32>, vector<16x32xf32>, vector<32x32xf32> -> vector<32x32xf32>
    %19 = arith.addf %18, %5 : vector<32x32xf32>
    %20 = vector.broadcast %17 : f32 to vector<1x32xf32>
    %21 = arith.mulf %20, %8 : vector<1x32xf32>
    %22 = vector.broadcast %21 : vector<1x32xf32> to vector<32x32xf32>
    %23 = arith.addf %19, %22 : vector<32x32xf32>
    %24 = math.tanh %23 : vector<32x32xf32>
    %cst_19 = arith.constant dense<0.000000e+00> : vector<32x16xf32>
    %25 = tpu.matmul %24, %12, %cst_19 {dimension_numbers = #tpu.dot_dimension_numbers<[1], [0], [0], [1], [0, 0, 1, 1], [], []>} : vector<32x32xf32>, vector<32x16xf32>, vector<32x16xf32> -> vector<32x16xf32>
    %26 = vector.broadcast %15 : vector<1x16xf32> to vector<32x16xf32>
    %27 = arith.addf %25, %26 : vector<32x16xf32>
    %28 = arith.addf %16, %27 : vector<32x16xf32>
    %c1_i32 = arith.constant 1 : i32
    %29 = arith.sitofp %c1_i32 : i32 to f32
    %cst_20 = arith.constant dense<0.000000e+00> : vector<32x32xf32>
    %30 = tpu.matmul %28, %9, %cst_20 {dimension_numbers = #tpu.dot_dimension_numbers<[1], [0], [0], [1], [0, 0, 1, 1], [], []>} : vector<32x16xf32>, vector<16x32xf32>, vector<32x32xf32> -> vector<32x32xf32>
    %31 = arith.addf %30, %5 : vector<32x32xf32>
    %32 = vector.broadcast %29 : f32 to vector<1x32xf32>
    %33 = arith.mulf %32, %8 : vector<1x32xf32>
    %34 = vector.broadcast %33 : vector<1x32xf32> to vector<32x32xf32>
    %35 = arith.addf %31, %34 : vector<32x32xf32>
    %36 = math.tanh %35 : vector<32x32xf32>
    %cst_21 = arith.constant dense<0.000000e+00> : vector<32x16xf32>
    %37 = tpu.matmul %36, %12, %cst_21 {dimension_numbers = #tpu.dot_dimension_numbers<[1], [0], [0], [1], [0, 0, 1, 1], [], []>} : vector<32x32xf32>, vector<32x16xf32>, vector<32x16xf32> -> vector<32x16xf32>
    %38 = vector.broadcast %15 : vector<1x16xf32> to vector<32x16xf32>
    %39 = arith.addf %37, %38 : vector<32x16xf32>
    %40 = arith.addf %28, %39 : vector<32x16xf32>
    %c2_i32 = arith.constant 2 : i32
    %41 = arith.sitofp %c2_i32 : i32 to f32
    %cst_22 = arith.constant dense<0.000000e+00> : vector<32x32xf32>
    %42 = tpu.matmul %40, %9, %cst_22 {dimension_numbers = #tpu.dot_dimension_numbers<[1], [0], [0], [1], [0, 0, 1, 1], [], []>} : vector<32x16xf32>, vector<16x32xf32>, vector<32x32xf32> -> vector<32x32xf32>
    %43 = arith.addf %42, %5 : vector<32x32xf32>
    %44 = vector.broadcast %41 : f32 to vector<1x32xf32>
    %45 = arith.mulf %44, %8 : vector<1x32xf32>
    %46 = vector.broadcast %45 : vector<1x32xf32> to vector<32x32xf32>
    %47 = arith.addf %43, %46 : vector<32x32xf32>
    %48 = math.tanh %47 : vector<32x32xf32>
    %cst_23 = arith.constant dense<0.000000e+00> : vector<32x16xf32>
    %49 = tpu.matmul %48, %12, %cst_23 {dimension_numbers = #tpu.dot_dimension_numbers<[1], [0], [0], [1], [0, 0, 1, 1], [], []>} : vector<32x32xf32>, vector<32x16xf32>, vector<32x16xf32> -> vector<32x16xf32>
    %50 = vector.broadcast %15 : vector<1x16xf32> to vector<32x16xf32>
    %51 = arith.addf %49, %50 : vector<32x16xf32>
    %52 = arith.addf %40, %51 : vector<32x16xf32>
    %c3_i32 = arith.constant 3 : i32
    %53 = arith.sitofp %c3_i32 : i32 to f32
    %cst_24 = arith.constant dense<0.000000e+00> : vector<32x32xf32>
    %54 = tpu.matmul %52, %9, %cst_24 {dimension_numbers = #tpu.dot_dimension_numbers<[1], [0], [0], [1], [0, 0, 1, 1], [], []>} : vector<32x16xf32>, vector<16x32xf32>, vector<32x32xf32> -> vector<32x32xf32>
    %55 = arith.addf %54, %5 : vector<32x32xf32>
    %56 = vector.broadcast %53 : f32 to vector<1x32xf32>
    %57 = arith.mulf %56, %8 : vector<1x32xf32>
    %58 = vector.broadcast %57 : vector<1x32xf32> to vector<32x32xf32>
    %59 = arith.addf %55, %58 : vector<32x32xf32>
    %60 = math.tanh %59 : vector<32x32xf32>
    %cst_25 = arith.constant dense<0.000000e+00> : vector<32x16xf32>
    %61 = tpu.matmul %60, %12, %cst_25 {dimension_numbers = #tpu.dot_dimension_numbers<[1], [0], [0], [1], [0, 0, 1, 1], [], []>} : vector<32x32xf32>, vector<32x16xf32>, vector<32x16xf32> -> vector<32x16xf32>
    %62 = vector.broadcast %15 : vector<1x16xf32> to vector<32x16xf32>
    %63 = arith.addf %61, %62 : vector<32x16xf32>
    %64 = arith.addf %52, %63 : vector<32x16xf32>
    %c4_i32 = arith.constant 4 : i32
    %65 = arith.sitofp %c4_i32 : i32 to f32
    %cst_26 = arith.constant dense<0.000000e+00> : vector<32x32xf32>
    %66 = tpu.matmul %64, %9, %cst_26 {dimension_numbers = #tpu.dot_dimension_numbers<[1], [0], [0], [1], [0, 0, 1, 1], [], []>} : vector<32x16xf32>, vector<16x32xf32>, vector<32x32xf32> -> vector<32x32xf32>
    %67 = arith.addf %66, %5 : vector<32x32xf32>
    %68 = vector.broadcast %65 : f32 to vector<1x32xf32>
    %69 = arith.mulf %68, %8 : vector<1x32xf32>
    %70 = vector.broadcast %69 : vector<1x32xf32> to vector<32x32xf32>
    %71 = arith.addf %67, %70 : vector<32x32xf32>
    %72 = math.tanh %71 : vector<32x32xf32>
    %cst_27 = arith.constant dense<0.000000e+00> : vector<32x16xf32>
    %73 = tpu.matmul %72, %12, %cst_27 {dimension_numbers = #tpu.dot_dimension_numbers<[1], [0], [0], [1], [0, 0, 1, 1], [], []>} : vector<32x32xf32>, vector<32x16xf32>, vector<32x16xf32> -> vector<32x16xf32>
    %74 = vector.broadcast %15 : vector<1x16xf32> to vector<32x16xf32>
    %75 = arith.addf %73, %74 : vector<32x16xf32>
    %76 = arith.addf %64, %75 : vector<32x16xf32>
    %c5_i32 = arith.constant 5 : i32
    %77 = arith.sitofp %c5_i32 : i32 to f32
    %cst_28 = arith.constant dense<0.000000e+00> : vector<32x32xf32>
    %78 = tpu.matmul %76, %9, %cst_28 {dimension_numbers = #tpu.dot_dimension_numbers<[1], [0], [0], [1], [0, 0, 1, 1], [], []>} : vector<32x16xf32>, vector<16x32xf32>, vector<32x32xf32> -> vector<32x32xf32>
    %79 = arith.addf %78, %5 : vector<32x32xf32>
    %80 = vector.broadcast %77 : f32 to vector<1x32xf32>
    %81 = arith.mulf %80, %8 : vector<1x32xf32>
    %82 = vector.broadcast %81 : vector<1x32xf32> to vector<32x32xf32>
    %83 = arith.addf %79, %82 : vector<32x32xf32>
    %84 = math.tanh %83 : vector<32x32xf32>
    %cst_29 = arith.constant dense<0.000000e+00> : vector<32x16xf32>
    %85 = tpu.matmul %84, %12, %cst_29 {dimension_numbers = #tpu.dot_dimension_numbers<[1], [0], [0], [1], [0, 0, 1, 1], [], []>} : vector<32x32xf32>, vector<32x16xf32>, vector<32x16xf32> -> vector<32x16xf32>
    %86 = vector.broadcast %15 : vector<1x16xf32> to vector<32x16xf32>
    %87 = arith.addf %85, %86 : vector<32x16xf32>
    %88 = arith.addf %76, %87 : vector<32x16xf32>
    %c6_i32 = arith.constant 6 : i32
    %89 = arith.sitofp %c6_i32 : i32 to f32
    %cst_30 = arith.constant dense<0.000000e+00> : vector<32x32xf32>
    %90 = tpu.matmul %88, %9, %cst_30 {dimension_numbers = #tpu.dot_dimension_numbers<[1], [0], [0], [1], [0, 0, 1, 1], [], []>} : vector<32x16xf32>, vector<16x32xf32>, vector<32x32xf32> -> vector<32x32xf32>
    %91 = arith.addf %90, %5 : vector<32x32xf32>
    %92 = vector.broadcast %89 : f32 to vector<1x32xf32>
    %93 = arith.mulf %92, %8 : vector<1x32xf32>
    %94 = vector.broadcast %93 : vector<1x32xf32> to vector<32x32xf32>
    %95 = arith.addf %91, %94 : vector<32x32xf32>
    %96 = math.tanh %95 : vector<32x32xf32>
    %cst_31 = arith.constant dense<0.000000e+00> : vector<32x16xf32>
    %97 = tpu.matmul %96, %12, %cst_31 {dimension_numbers = #tpu.dot_dimension_numbers<[1], [0], [0], [1], [0, 0, 1, 1], [], []>} : vector<32x32xf32>, vector<32x16xf32>, vector<32x16xf32> -> vector<32x16xf32>
    %98 = vector.broadcast %15 : vector<1x16xf32> to vector<32x16xf32>
    %99 = arith.addf %97, %98 : vector<32x16xf32>
    %100 = arith.addf %88, %99 : vector<32x16xf32>
    %c7_i32 = arith.constant 7 : i32
    %101 = arith.sitofp %c7_i32 : i32 to f32
    %cst_32 = arith.constant dense<0.000000e+00> : vector<32x32xf32>
    %102 = tpu.matmul %100, %9, %cst_32 {dimension_numbers = #tpu.dot_dimension_numbers<[1], [0], [0], [1], [0, 0, 1, 1], [], []>} : vector<32x16xf32>, vector<16x32xf32>, vector<32x32xf32> -> vector<32x32xf32>
    %103 = arith.addf %102, %5 : vector<32x32xf32>
    %104 = vector.broadcast %101 : f32 to vector<1x32xf32>
    %105 = arith.mulf %104, %8 : vector<1x32xf32>
    %106 = vector.broadcast %105 : vector<1x32xf32> to vector<32x32xf32>
    %107 = arith.addf %103, %106 : vector<32x32xf32>
    %108 = math.tanh %107 : vector<32x32xf32>
    %cst_33 = arith.constant dense<0.000000e+00> : vector<32x16xf32>
    %109 = tpu.matmul %108, %12, %cst_33 {dimension_numbers = #tpu.dot_dimension_numbers<[1], [0], [0], [1], [0, 0, 1, 1], [], []>} : vector<32x32xf32>, vector<32x16xf32>, vector<32x16xf32> -> vector<32x16xf32>
    %110 = vector.broadcast %15 : vector<1x16xf32> to vector<32x16xf32>
    %111 = arith.addf %109, %110 : vector<32x16xf32>
    %112 = arith.addf %100, %111 : vector<32x16xf32>
    %c8_i32 = arith.constant 8 : i32
    %113 = arith.sitofp %c8_i32 : i32 to f32
    %cst_34 = arith.constant dense<0.000000e+00> : vector<32x32xf32>
    %114 = tpu.matmul %112, %9, %cst_34 {dimension_numbers = #tpu.dot_dimension_numbers<[1], [0], [0], [1], [0, 0, 1, 1], [], []>} : vector<32x16xf32>, vector<16x32xf32>, vector<32x32xf32> -> vector<32x32xf32>
    %115 = arith.addf %114, %5 : vector<32x32xf32>
    %116 = vector.broadcast %113 : f32 to vector<1x32xf32>
    %117 = arith.mulf %116, %8 : vector<1x32xf32>
    %118 = vector.broadcast %117 : vector<1x32xf32> to vector<32x32xf32>
    %119 = arith.addf %115, %118 : vector<32x32xf32>
    %120 = math.tanh %119 : vector<32x32xf32>
    %cst_35 = arith.constant dense<0.000000e+00> : vector<32x16xf32>
    %121 = tpu.matmul %120, %12, %cst_35 {dimension_numbers = #tpu.dot_dimension_numbers<[1], [0], [0], [1], [0, 0, 1, 1], [], []>} : vector<32x32xf32>, vector<32x16xf32>, vector<32x16xf32> -> vector<32x16xf32>
    %122 = vector.broadcast %15 : vector<1x16xf32> to vector<32x16xf32>
    %123 = arith.addf %121, %122 : vector<32x16xf32>
    %124 = arith.addf %112, %123 : vector<32x16xf32>
    %c9_i32 = arith.constant 9 : i32
    %125 = arith.sitofp %c9_i32 : i32 to f32
    %cst_36 = arith.constant dense<0.000000e+00> : vector<32x32xf32>
    %126 = tpu.matmul %124, %9, %cst_36 {dimension_numbers = #tpu.dot_dimension_numbers<[1], [0], [0], [1], [0, 0, 1, 1], [], []>} : vector<32x16xf32>, vector<16x32xf32>, vector<32x32xf32> -> vector<32x32xf32>
    %127 = arith.addf %126, %5 : vector<32x32xf32>
    %128 = vector.broadcast %125 : f32 to vector<1x32xf32>
    %129 = arith.mulf %128, %8 : vector<1x32xf32>
    %130 = vector.broadcast %129 : vector<1x32xf32> to vector<32x32xf32>
    %131 = arith.addf %127, %130 : vector<32x32xf32>
    %132 = math.tanh %131 : vector<32x32xf32>
    %cst_37 = arith.constant dense<0.000000e+00> : vector<32x16xf32>
    %133 = tpu.matmul %132, %12, %cst_37 {dimension_numbers = #tpu.dot_dimension_numbers<[1], [0], [0], [1], [0, 0, 1, 1], [], []>} : vector<32x32xf32>, vector<32x16xf32>, vector<32x16xf32> -> vector<32x16xf32>
    %134 = vector.broadcast %15 : vector<1x16xf32> to vector<32x16xf32>
    %135 = arith.addf %133, %134 : vector<32x16xf32>
    %136 = arith.addf %124, %135 : vector<32x16xf32>
    %c10_i32 = arith.constant 10 : i32
    %137 = arith.sitofp %c10_i32 : i32 to f32
    %cst_38 = arith.constant dense<0.000000e+00> : vector<32x32xf32>
    %138 = tpu.matmul %136, %9, %cst_38 {dimension_numbers = #tpu.dot_dimension_numbers<[1], [0], [0], [1], [0, 0, 1, 1], [], []>} : vector<32x16xf32>, vector<16x32xf32>, vector<32x32xf32> -> vector<32x32xf32>
    %139 = arith.addf %138, %5 : vector<32x32xf32>
    %140 = vector.broadcast %137 : f32 to vector<1x32xf32>
    %141 = arith.mulf %140, %8 : vector<1x32xf32>
    %142 = vector.broadcast %141 : vector<1x32xf32> to vector<32x32xf32>
    %143 = arith.addf %139, %142 : vector<32x32xf32>
    %144 = math.tanh %143 : vector<32x32xf32>
    %cst_39 = arith.constant dense<0.000000e+00> : vector<32x16xf32>
    %145 = tpu.matmul %144, %12, %cst_39 {dimension_numbers = #tpu.dot_dimension_numbers<[1], [0], [0], [1], [0, 0, 1, 1], [], []>} : vector<32x32xf32>, vector<32x16xf32>, vector<32x16xf32> -> vector<32x16xf32>
    %146 = vector.broadcast %15 : vector<1x16xf32> to vector<32x16xf32>
    %147 = arith.addf %145, %146 : vector<32x16xf32>
    %148 = arith.addf %136, %147 : vector<32x16xf32>
    %c11_i32 = arith.constant 11 : i32
    %149 = arith.sitofp %c11_i32 : i32 to f32
    %cst_40 = arith.constant dense<0.000000e+00> : vector<32x32xf32>
    %150 = tpu.matmul %148, %9, %cst_40 {dimension_numbers = #tpu.dot_dimension_numbers<[1], [0], [0], [1], [0, 0, 1, 1], [], []>} : vector<32x16xf32>, vector<16x32xf32>, vector<32x32xf32> -> vector<32x32xf32>
    %151 = arith.addf %150, %5 : vector<32x32xf32>
    %152 = vector.broadcast %149 : f32 to vector<1x32xf32>
    %153 = arith.mulf %152, %8 : vector<1x32xf32>
    %154 = vector.broadcast %153 : vector<1x32xf32> to vector<32x32xf32>
    %155 = arith.addf %151, %154 : vector<32x32xf32>
    %156 = math.tanh %155 : vector<32x32xf32>
    %cst_41 = arith.constant dense<0.000000e+00> : vector<32x16xf32>
    %157 = tpu.matmul %156, %12, %cst_41 {dimension_numbers = #tpu.dot_dimension_numbers<[1], [0], [0], [1], [0, 0, 1, 1], [], []>} : vector<32x32xf32>, vector<32x16xf32>, vector<32x16xf32> -> vector<32x16xf32>
    %158 = vector.broadcast %15 : vector<1x16xf32> to vector<32x16xf32>
    %159 = arith.addf %157, %158 : vector<32x16xf32>
    %160 = arith.addf %148, %159 : vector<32x16xf32>
    %c12_i32 = arith.constant 12 : i32
    %161 = arith.sitofp %c12_i32 : i32 to f32
    %cst_42 = arith.constant dense<0.000000e+00> : vector<32x32xf32>
    %162 = tpu.matmul %160, %9, %cst_42 {dimension_numbers = #tpu.dot_dimension_numbers<[1], [0], [0], [1], [0, 0, 1, 1], [], []>} : vector<32x16xf32>, vector<16x32xf32>, vector<32x32xf32> -> vector<32x32xf32>
    %163 = arith.addf %162, %5 : vector<32x32xf32>
    %164 = vector.broadcast %161 : f32 to vector<1x32xf32>
    %165 = arith.mulf %164, %8 : vector<1x32xf32>
    %166 = vector.broadcast %165 : vector<1x32xf32> to vector<32x32xf32>
    %167 = arith.addf %163, %166 : vector<32x32xf32>
    %168 = math.tanh %167 : vector<32x32xf32>
    %cst_43 = arith.constant dense<0.000000e+00> : vector<32x16xf32>
    %169 = tpu.matmul %168, %12, %cst_43 {dimension_numbers = #tpu.dot_dimension_numbers<[1], [0], [0], [1], [0, 0, 1, 1], [], []>} : vector<32x32xf32>, vector<32x16xf32>, vector<32x16xf32> -> vector<32x16xf32>
    %170 = vector.broadcast %15 : vector<1x16xf32> to vector<32x16xf32>
    %171 = arith.addf %169, %170 : vector<32x16xf32>
    %172 = arith.addf %160, %171 : vector<32x16xf32>
    %c13_i32 = arith.constant 13 : i32
    %173 = arith.sitofp %c13_i32 : i32 to f32
    %cst_44 = arith.constant dense<0.000000e+00> : vector<32x32xf32>
    %174 = tpu.matmul %172, %9, %cst_44 {dimension_numbers = #tpu.dot_dimension_numbers<[1], [0], [0], [1], [0, 0, 1, 1], [], []>} : vector<32x16xf32>, vector<16x32xf32>, vector<32x32xf32> -> vector<32x32xf32>
    %175 = arith.addf %174, %5 : vector<32x32xf32>
    %176 = vector.broadcast %173 : f32 to vector<1x32xf32>
    %177 = arith.mulf %176, %8 : vector<1x32xf32>
    %178 = vector.broadcast %177 : vector<1x32xf32> to vector<32x32xf32>
    %179 = arith.addf %175, %178 : vector<32x32xf32>
    %180 = math.tanh %179 : vector<32x32xf32>
    %cst_45 = arith.constant dense<0.000000e+00> : vector<32x16xf32>
    %181 = tpu.matmul %180, %12, %cst_45 {dimension_numbers = #tpu.dot_dimension_numbers<[1], [0], [0], [1], [0, 0, 1, 1], [], []>} : vector<32x32xf32>, vector<32x16xf32>, vector<32x16xf32> -> vector<32x16xf32>
    %182 = vector.broadcast %15 : vector<1x16xf32> to vector<32x16xf32>
    %183 = arith.addf %181, %182 : vector<32x16xf32>
    %184 = arith.addf %172, %183 : vector<32x16xf32>
    %c14_i32 = arith.constant 14 : i32
    %185 = arith.sitofp %c14_i32 : i32 to f32
    %cst_46 = arith.constant dense<0.000000e+00> : vector<32x32xf32>
    %186 = tpu.matmul %184, %9, %cst_46 {dimension_numbers = #tpu.dot_dimension_numbers<[1], [0], [0], [1], [0, 0, 1, 1], [], []>} : vector<32x16xf32>, vector<16x32xf32>, vector<32x32xf32> -> vector<32x32xf32>
    %187 = arith.addf %186, %5 : vector<32x32xf32>
    %188 = vector.broadcast %185 : f32 to vector<1x32xf32>
    %189 = arith.mulf %188, %8 : vector<1x32xf32>
    %190 = vector.broadcast %189 : vector<1x32xf32> to vector<32x32xf32>
    %191 = arith.addf %187, %190 : vector<32x32xf32>
    %192 = math.tanh %191 : vector<32x32xf32>
    %cst_47 = arith.constant dense<0.000000e+00> : vector<32x16xf32>
    %193 = tpu.matmul %192, %12, %cst_47 {dimension_numbers = #tpu.dot_dimension_numbers<[1], [0], [0], [1], [0, 0, 1, 1], [], []>} : vector<32x32xf32>, vector<32x16xf32>, vector<32x16xf32> -> vector<32x16xf32>
    %194 = vector.broadcast %15 : vector<1x16xf32> to vector<32x16xf32>
    %195 = arith.addf %193, %194 : vector<32x16xf32>
    %196 = arith.addf %184, %195 : vector<32x16xf32>
    %c15_i32 = arith.constant 15 : i32
    %197 = arith.sitofp %c15_i32 : i32 to f32
    %cst_48 = arith.constant dense<0.000000e+00> : vector<32x32xf32>
    %198 = tpu.matmul %196, %9, %cst_48 {dimension_numbers = #tpu.dot_dimension_numbers<[1], [0], [0], [1], [0, 0, 1, 1], [], []>} : vector<32x16xf32>, vector<16x32xf32>, vector<32x32xf32> -> vector<32x32xf32>
    %199 = arith.addf %198, %5 : vector<32x32xf32>
    %200 = vector.broadcast %197 : f32 to vector<1x32xf32>
    %201 = arith.mulf %200, %8 : vector<1x32xf32>
    %202 = vector.broadcast %201 : vector<1x32xf32> to vector<32x32xf32>
    %203 = arith.addf %199, %202 : vector<32x32xf32>
    %204 = math.tanh %203 : vector<32x32xf32>
    %cst_49 = arith.constant dense<0.000000e+00> : vector<32x16xf32>
    %205 = tpu.matmul %204, %12, %cst_49 {dimension_numbers = #tpu.dot_dimension_numbers<[1], [0], [0], [1], [0, 0, 1, 1], [], []>} : vector<32x32xf32>, vector<32x16xf32>, vector<32x16xf32> -> vector<32x16xf32>
    %206 = vector.broadcast %15 : vector<1x16xf32> to vector<32x16xf32>
    %207 = arith.addf %205, %206 : vector<32x16xf32>
    %208 = arith.addf %196, %207 : vector<32x16xf32>
    %c16_i32 = arith.constant 16 : i32
    %209 = arith.sitofp %c16_i32 : i32 to f32
    %cst_50 = arith.constant dense<0.000000e+00> : vector<32x32xf32>
    %210 = tpu.matmul %208, %9, %cst_50 {dimension_numbers = #tpu.dot_dimension_numbers<[1], [0], [0], [1], [0, 0, 1, 1], [], []>} : vector<32x16xf32>, vector<16x32xf32>, vector<32x32xf32> -> vector<32x32xf32>
    %211 = arith.addf %210, %5 : vector<32x32xf32>
    %212 = vector.broadcast %209 : f32 to vector<1x32xf32>
    %213 = arith.mulf %212, %8 : vector<1x32xf32>
    %214 = vector.broadcast %213 : vector<1x32xf32> to vector<32x32xf32>
    %215 = arith.addf %211, %214 : vector<32x32xf32>
    %216 = math.tanh %215 : vector<32x32xf32>
    %cst_51 = arith.constant dense<0.000000e+00> : vector<32x16xf32>
    %217 = tpu.matmul %216, %12, %cst_51 {dimension_numbers = #tpu.dot_dimension_numbers<[1], [0], [0], [1], [0, 0, 1, 1], [], []>} : vector<32x32xf32>, vector<32x16xf32>, vector<32x16xf32> -> vector<32x16xf32>
    %218 = vector.broadcast %15 : vector<1x16xf32> to vector<32x16xf32>
    %219 = arith.addf %217, %218 : vector<32x16xf32>
    %220 = arith.addf %208, %219 : vector<32x16xf32>
    %c17_i32 = arith.constant 17 : i32
    %221 = arith.sitofp %c17_i32 : i32 to f32
    %cst_52 = arith.constant dense<0.000000e+00> : vector<32x32xf32>
    %222 = tpu.matmul %220, %9, %cst_52 {dimension_numbers = #tpu.dot_dimension_numbers<[1], [0], [0], [1], [0, 0, 1, 1], [], []>} : vector<32x16xf32>, vector<16x32xf32>, vector<32x32xf32> -> vector<32x32xf32>
    %223 = arith.addf %222, %5 : vector<32x32xf32>
    %224 = vector.broadcast %221 : f32 to vector<1x32xf32>
    %225 = arith.mulf %224, %8 : vector<1x32xf32>
    %226 = vector.broadcast %225 : vector<1x32xf32> to vector<32x32xf32>
    %227 = arith.addf %223, %226 : vector<32x32xf32>
    %228 = math.tanh %227 : vector<32x32xf32>
    %cst_53 = arith.constant dense<0.000000e+00> : vector<32x16xf32>
    %229 = tpu.matmul %228, %12, %cst_53 {dimension_numbers = #tpu.dot_dimension_numbers<[1], [0], [0], [1], [0, 0, 1, 1], [], []>} : vector<32x32xf32>, vector<32x16xf32>, vector<32x16xf32> -> vector<32x16xf32>
    %230 = vector.broadcast %15 : vector<1x16xf32> to vector<32x16xf32>
    %231 = arith.addf %229, %230 : vector<32x16xf32>
    %232 = arith.addf %220, %231 : vector<32x16xf32>
    %c18_i32 = arith.constant 18 : i32
    %233 = arith.sitofp %c18_i32 : i32 to f32
    %cst_54 = arith.constant dense<0.000000e+00> : vector<32x32xf32>
    %234 = tpu.matmul %232, %9, %cst_54 {dimension_numbers = #tpu.dot_dimension_numbers<[1], [0], [0], [1], [0, 0, 1, 1], [], []>} : vector<32x16xf32>, vector<16x32xf32>, vector<32x32xf32> -> vector<32x32xf32>
    %235 = arith.addf %234, %5 : vector<32x32xf32>
    %236 = vector.broadcast %233 : f32 to vector<1x32xf32>
    %237 = arith.mulf %236, %8 : vector<1x32xf32>
    %238 = vector.broadcast %237 : vector<1x32xf32> to vector<32x32xf32>
    %239 = arith.addf %235, %238 : vector<32x32xf32>
    %240 = math.tanh %239 : vector<32x32xf32>
    %cst_55 = arith.constant dense<0.000000e+00> : vector<32x16xf32>
    %241 = tpu.matmul %240, %12, %cst_55 {dimension_numbers = #tpu.dot_dimension_numbers<[1], [0], [0], [1], [0, 0, 1, 1], [], []>} : vector<32x32xf32>, vector<32x16xf32>, vector<32x16xf32> -> vector<32x16xf32>
    %242 = vector.broadcast %15 : vector<1x16xf32> to vector<32x16xf32>
    %243 = arith.addf %241, %242 : vector<32x16xf32>
    %244 = arith.addf %232, %243 : vector<32x16xf32>
    %c19_i32 = arith.constant 19 : i32
    %245 = arith.sitofp %c19_i32 : i32 to f32
    %cst_56 = arith.constant dense<0.000000e+00> : vector<32x32xf32>
    %246 = tpu.matmul %244, %9, %cst_56 {dimension_numbers = #tpu.dot_dimension_numbers<[1], [0], [0], [1], [0, 0, 1, 1], [], []>} : vector<32x16xf32>, vector<16x32xf32>, vector<32x32xf32> -> vector<32x32xf32>
    %247 = arith.addf %246, %5 : vector<32x32xf32>
    %248 = vector.broadcast %245 : f32 to vector<1x32xf32>
    %249 = arith.mulf %248, %8 : vector<1x32xf32>
    %250 = vector.broadcast %249 : vector<1x32xf32> to vector<32x32xf32>
    %251 = arith.addf %247, %250 : vector<32x32xf32>
    %252 = math.tanh %251 : vector<32x32xf32>
    %cst_57 = arith.constant dense<0.000000e+00> : vector<32x16xf32>
    %253 = tpu.matmul %252, %12, %cst_57 {dimension_numbers = #tpu.dot_dimension_numbers<[1], [0], [0], [1], [0, 0, 1, 1], [], []>} : vector<32x32xf32>, vector<32x16xf32>, vector<32x16xf32> -> vector<32x16xf32>
    %254 = vector.broadcast %15 : vector<1x16xf32> to vector<32x16xf32>
    %255 = arith.addf %253, %254 : vector<32x16xf32>
    %256 = arith.addf %244, %255 : vector<32x16xf32>
    %c20_i32 = arith.constant 20 : i32
    %257 = arith.sitofp %c20_i32 : i32 to f32
    %cst_58 = arith.constant dense<0.000000e+00> : vector<32x32xf32>
    %258 = tpu.matmul %256, %9, %cst_58 {dimension_numbers = #tpu.dot_dimension_numbers<[1], [0], [0], [1], [0, 0, 1, 1], [], []>} : vector<32x16xf32>, vector<16x32xf32>, vector<32x32xf32> -> vector<32x32xf32>
    %259 = arith.addf %258, %5 : vector<32x32xf32>
    %260 = vector.broadcast %257 : f32 to vector<1x32xf32>
    %261 = arith.mulf %260, %8 : vector<1x32xf32>
    %262 = vector.broadcast %261 : vector<1x32xf32> to vector<32x32xf32>
    %263 = arith.addf %259, %262 : vector<32x32xf32>
    %264 = math.tanh %263 : vector<32x32xf32>
    %cst_59 = arith.constant dense<0.000000e+00> : vector<32x16xf32>
    %265 = tpu.matmul %264, %12, %cst_59 {dimension_numbers = #tpu.dot_dimension_numbers<[1], [0], [0], [1], [0, 0, 1, 1], [], []>} : vector<32x32xf32>, vector<32x16xf32>, vector<32x16xf32> -> vector<32x16xf32>
    %266 = vector.broadcast %15 : vector<1x16xf32> to vector<32x16xf32>
    %267 = arith.addf %265, %266 : vector<32x16xf32>
    %268 = arith.addf %256, %267 : vector<32x16xf32>
    %c21_i32 = arith.constant 21 : i32
    %269 = arith.sitofp %c21_i32 : i32 to f32
    %cst_60 = arith.constant dense<0.000000e+00> : vector<32x32xf32>
    %270 = tpu.matmul %268, %9, %cst_60 {dimension_numbers = #tpu.dot_dimension_numbers<[1], [0], [0], [1], [0, 0, 1, 1], [], []>} : vector<32x16xf32>, vector<16x32xf32>, vector<32x32xf32> -> vector<32x32xf32>
    %271 = arith.addf %270, %5 : vector<32x32xf32>
    %272 = vector.broadcast %269 : f32 to vector<1x32xf32>
    %273 = arith.mulf %272, %8 : vector<1x32xf32>
    %274 = vector.broadcast %273 : vector<1x32xf32> to vector<32x32xf32>
    %275 = arith.addf %271, %274 : vector<32x32xf32>
    %276 = math.tanh %275 : vector<32x32xf32>
    %cst_61 = arith.constant dense<0.000000e+00> : vector<32x16xf32>
    %277 = tpu.matmul %276, %12, %cst_61 {dimension_numbers = #tpu.dot_dimension_numbers<[1], [0], [0], [1], [0, 0, 1, 1], [], []>} : vector<32x32xf32>, vector<32x16xf32>, vector<32x16xf32> -> vector<32x16xf32>
    %278 = vector.broadcast %15 : vector<1x16xf32> to vector<32x16xf32>
    %279 = arith.addf %277, %278 : vector<32x16xf32>
    %280 = arith.addf %268, %279 : vector<32x16xf32>
    %c22_i32 = arith.constant 22 : i32
    %281 = arith.sitofp %c22_i32 : i32 to f32
    %cst_62 = arith.constant dense<0.000000e+00> : vector<32x32xf32>
    %282 = tpu.matmul %280, %9, %cst_62 {dimension_numbers = #tpu.dot_dimension_numbers<[1], [0], [0], [1], [0, 0, 1, 1], [], []>} : vector<32x16xf32>, vector<16x32xf32>, vector<32x32xf32> -> vector<32x32xf32>
    %283 = arith.addf %282, %5 : vector<32x32xf32>
    %284 = vector.broadcast %281 : f32 to vector<1x32xf32>
    %285 = arith.mulf %284, %8 : vector<1x32xf32>
    %286 = vector.broadcast %285 : vector<1x32xf32> to vector<32x32xf32>
    %287 = arith.addf %283, %286 : vector<32x32xf32>
    %288 = math.tanh %287 : vector<32x32xf32>
    %cst_63 = arith.constant dense<0.000000e+00> : vector<32x16xf32>
    %289 = tpu.matmul %288, %12, %cst_63 {dimension_numbers = #tpu.dot_dimension_numbers<[1], [0], [0], [1], [0, 0, 1, 1], [], []>} : vector<32x32xf32>, vector<32x16xf32>, vector<32x16xf32> -> vector<32x16xf32>
    %290 = vector.broadcast %15 : vector<1x16xf32> to vector<32x16xf32>
    %291 = arith.addf %289, %290 : vector<32x16xf32>
    %292 = arith.addf %280, %291 : vector<32x16xf32>
    %c23_i32 = arith.constant 23 : i32
    %293 = arith.sitofp %c23_i32 : i32 to f32
    %cst_64 = arith.constant dense<0.000000e+00> : vector<32x32xf32>
    %294 = tpu.matmul %292, %9, %cst_64 {dimension_numbers = #tpu.dot_dimension_numbers<[1], [0], [0], [1], [0, 0, 1, 1], [], []>} : vector<32x16xf32>, vector<16x32xf32>, vector<32x32xf32> -> vector<32x32xf32>
    %295 = arith.addf %294, %5 : vector<32x32xf32>
    %296 = vector.broadcast %293 : f32 to vector<1x32xf32>
    %297 = arith.mulf %296, %8 : vector<1x32xf32>
    %298 = vector.broadcast %297 : vector<1x32xf32> to vector<32x32xf32>
    %299 = arith.addf %295, %298 : vector<32x32xf32>
    %300 = math.tanh %299 : vector<32x32xf32>
    %cst_65 = arith.constant dense<0.000000e+00> : vector<32x16xf32>
    %301 = tpu.matmul %300, %12, %cst_65 {dimension_numbers = #tpu.dot_dimension_numbers<[1], [0], [0], [1], [0, 0, 1, 1], [], []>} : vector<32x32xf32>, vector<32x16xf32>, vector<32x16xf32> -> vector<32x16xf32>
    %302 = vector.broadcast %15 : vector<1x16xf32> to vector<32x16xf32>
    %303 = arith.addf %301, %302 : vector<32x16xf32>
    %304 = arith.addf %292, %303 : vector<32x16xf32>
    %c24_i32 = arith.constant 24 : i32
    %305 = arith.sitofp %c24_i32 : i32 to f32
    %cst_66 = arith.constant dense<0.000000e+00> : vector<32x32xf32>
    %306 = tpu.matmul %304, %9, %cst_66 {dimension_numbers = #tpu.dot_dimension_numbers<[1], [0], [0], [1], [0, 0, 1, 1], [], []>} : vector<32x16xf32>, vector<16x32xf32>, vector<32x32xf32> -> vector<32x32xf32>
    %307 = arith.addf %306, %5 : vector<32x32xf32>
    %308 = vector.broadcast %305 : f32 to vector<1x32xf32>
    %309 = arith.mulf %308, %8 : vector<1x32xf32>
    %310 = vector.broadcast %309 : vector<1x32xf32> to vector<32x32xf32>
    %311 = arith.addf %307, %310 : vector<32x32xf32>
    %312 = math.tanh %311 : vector<32x32xf32>
    %cst_67 = arith.constant dense<0.000000e+00> : vector<32x16xf32>
    %313 = tpu.matmul %312, %12, %cst_67 {dimension_numbers = #tpu.dot_dimension_numbers<[1], [0], [0], [1], [0, 0, 1, 1], [], []>} : vector<32x32xf32>, vector<32x16xf32>, vector<32x16xf32> -> vector<32x16xf32>
    %314 = vector.broadcast %15 : vector<1x16xf32> to vector<32x16xf32>
    %315 = arith.addf %313, %314 : vector<32x16xf32>
    %316 = arith.addf %304, %315 : vector<32x16xf32>
    %c25_i32 = arith.constant 25 : i32
    %317 = arith.sitofp %c25_i32 : i32 to f32
    %cst_68 = arith.constant dense<0.000000e+00> : vector<32x32xf32>
    %318 = tpu.matmul %316, %9, %cst_68 {dimension_numbers = #tpu.dot_dimension_numbers<[1], [0], [0], [1], [0, 0, 1, 1], [], []>} : vector<32x16xf32>, vector<16x32xf32>, vector<32x32xf32> -> vector<32x32xf32>
    %319 = arith.addf %318, %5 : vector<32x32xf32>
    %320 = vector.broadcast %317 : f32 to vector<1x32xf32>
    %321 = arith.mulf %320, %8 : vector<1x32xf32>
    %322 = vector.broadcast %321 : vector<1x32xf32> to vector<32x32xf32>
    %323 = arith.addf %319, %322 : vector<32x32xf32>
    %324 = math.tanh %323 : vector<32x32xf32>
    %cst_69 = arith.constant dense<0.000000e+00> : vector<32x16xf32>
    %325 = tpu.matmul %324, %12, %cst_69 {dimension_numbers = #tpu.dot_dimension_numbers<[1], [0], [0], [1], [0, 0, 1, 1], [], []>} : vector<32x32xf32>, vector<32x16xf32>, vector<32x16xf32> -> vector<32x16xf32>
    %326 = vector.broadcast %15 : vector<1x16xf32> to vector<32x16xf32>
    %327 = arith.addf %325, %326 : vector<32x16xf32>
    %328 = arith.addf %316, %327 : vector<32x16xf32>
    %c26_i32 = arith.constant 26 : i32
    %329 = arith.sitofp %c26_i32 : i32 to f32
    %cst_70 = arith.constant dense<0.000000e+00> : vector<32x32xf32>
    %330 = tpu.matmul %328, %9, %cst_70 {dimension_numbers = #tpu.dot_dimension_numbers<[1], [0], [0], [1], [0, 0, 1, 1], [], []>} : vector<32x16xf32>, vector<16x32xf32>, vector<32x32xf32> -> vector<32x32xf32>
    %331 = arith.addf %330, %5 : vector<32x32xf32>
    %332 = vector.broadcast %329 : f32 to vector<1x32xf32>
    %333 = arith.mulf %332, %8 : vector<1x32xf32>
    %334 = vector.broadcast %333 : vector<1x32xf32> to vector<32x32xf32>
    %335 = arith.addf %331, %334 : vector<32x32xf32>
    %336 = math.tanh %335 : vector<32x32xf32>
    %cst_71 = arith.constant dense<0.000000e+00> : vector<32x16xf32>
    %337 = tpu.matmul %336, %12, %cst_71 {dimension_numbers = #tpu.dot_dimension_numbers<[1], [0], [0], [1], [0, 0, 1, 1], [], []>} : vector<32x32xf32>, vector<32x16xf32>, vector<32x16xf32> -> vector<32x16xf32>
    %338 = vector.broadcast %15 : vector<1x16xf32> to vector<32x16xf32>
    %339 = arith.addf %337, %338 : vector<32x16xf32>
    %340 = arith.addf %328, %339 : vector<32x16xf32>
    %c27_i32 = arith.constant 27 : i32
    %341 = arith.sitofp %c27_i32 : i32 to f32
    %cst_72 = arith.constant dense<0.000000e+00> : vector<32x32xf32>
    %342 = tpu.matmul %340, %9, %cst_72 {dimension_numbers = #tpu.dot_dimension_numbers<[1], [0], [0], [1], [0, 0, 1, 1], [], []>} : vector<32x16xf32>, vector<16x32xf32>, vector<32x32xf32> -> vector<32x32xf32>
    %343 = arith.addf %342, %5 : vector<32x32xf32>
    %344 = vector.broadcast %341 : f32 to vector<1x32xf32>
    %345 = arith.mulf %344, %8 : vector<1x32xf32>
    %346 = vector.broadcast %345 : vector<1x32xf32> to vector<32x32xf32>
    %347 = arith.addf %343, %346 : vector<32x32xf32>
    %348 = math.tanh %347 : vector<32x32xf32>
    %cst_73 = arith.constant dense<0.000000e+00> : vector<32x16xf32>
    %349 = tpu.matmul %348, %12, %cst_73 {dimension_numbers = #tpu.dot_dimension_numbers<[1], [0], [0], [1], [0, 0, 1, 1], [], []>} : vector<32x32xf32>, vector<32x16xf32>, vector<32x16xf32> -> vector<32x16xf32>
    %350 = vector.broadcast %15 : vector<1x16xf32> to vector<32x16xf32>
    %351 = arith.addf %349, %350 : vector<32x16xf32>
    %352 = arith.addf %340, %351 : vector<32x16xf32>
    %c28_i32 = arith.constant 28 : i32
    %353 = arith.sitofp %c28_i32 : i32 to f32
    %cst_74 = arith.constant dense<0.000000e+00> : vector<32x32xf32>
    %354 = tpu.matmul %352, %9, %cst_74 {dimension_numbers = #tpu.dot_dimension_numbers<[1], [0], [0], [1], [0, 0, 1, 1], [], []>} : vector<32x16xf32>, vector<16x32xf32>, vector<32x32xf32> -> vector<32x32xf32>
    %355 = arith.addf %354, %5 : vector<32x32xf32>
    %356 = vector.broadcast %353 : f32 to vector<1x32xf32>
    %357 = arith.mulf %356, %8 : vector<1x32xf32>
    %358 = vector.broadcast %357 : vector<1x32xf32> to vector<32x32xf32>
    %359 = arith.addf %355, %358 : vector<32x32xf32>
    %360 = math.tanh %359 : vector<32x32xf32>
    %cst_75 = arith.constant dense<0.000000e+00> : vector<32x16xf32>
    %361 = tpu.matmul %360, %12, %cst_75 {dimension_numbers = #tpu.dot_dimension_numbers<[1], [0], [0], [1], [0, 0, 1, 1], [], []>} : vector<32x32xf32>, vector<32x16xf32>, vector<32x16xf32> -> vector<32x16xf32>
    %362 = vector.broadcast %15 : vector<1x16xf32> to vector<32x16xf32>
    %363 = arith.addf %361, %362 : vector<32x16xf32>
    %364 = arith.addf %352, %363 : vector<32x16xf32>
    %c29_i32 = arith.constant 29 : i32
    %365 = arith.sitofp %c29_i32 : i32 to f32
    %cst_76 = arith.constant dense<0.000000e+00> : vector<32x32xf32>
    %366 = tpu.matmul %364, %9, %cst_76 {dimension_numbers = #tpu.dot_dimension_numbers<[1], [0], [0], [1], [0, 0, 1, 1], [], []>} : vector<32x16xf32>, vector<16x32xf32>, vector<32x32xf32> -> vector<32x32xf32>
    %367 = arith.addf %366, %5 : vector<32x32xf32>
    %368 = vector.broadcast %365 : f32 to vector<1x32xf32>
    %369 = arith.mulf %368, %8 : vector<1x32xf32>
    %370 = vector.broadcast %369 : vector<1x32xf32> to vector<32x32xf32>
    %371 = arith.addf %367, %370 : vector<32x32xf32>
    %372 = math.tanh %371 : vector<32x32xf32>
    %cst_77 = arith.constant dense<0.000000e+00> : vector<32x16xf32>
    %373 = tpu.matmul %372, %12, %cst_77 {dimension_numbers = #tpu.dot_dimension_numbers<[1], [0], [0], [1], [0, 0, 1, 1], [], []>} : vector<32x32xf32>, vector<32x16xf32>, vector<32x16xf32> -> vector<32x16xf32>
    %374 = vector.broadcast %15 : vector<1x16xf32> to vector<32x16xf32>
    %375 = arith.addf %373, %374 : vector<32x16xf32>
    %376 = arith.addf %364, %375 : vector<32x16xf32>
    %c30_i32 = arith.constant 30 : i32
    %377 = arith.sitofp %c30_i32 : i32 to f32
    %cst_78 = arith.constant dense<0.000000e+00> : vector<32x32xf32>
    %378 = tpu.matmul %376, %9, %cst_78 {dimension_numbers = #tpu.dot_dimension_numbers<[1], [0], [0], [1], [0, 0, 1, 1], [], []>} : vector<32x16xf32>, vector<16x32xf32>, vector<32x32xf32> -> vector<32x32xf32>
    %379 = arith.addf %378, %5 : vector<32x32xf32>
    %380 = vector.broadcast %377 : f32 to vector<1x32xf32>
    %381 = arith.mulf %380, %8 : vector<1x32xf32>
    %382 = vector.broadcast %381 : vector<1x32xf32> to vector<32x32xf32>
    %383 = arith.addf %379, %382 : vector<32x32xf32>
    %384 = math.tanh %383 : vector<32x32xf32>
    %cst_79 = arith.constant dense<0.000000e+00> : vector<32x16xf32>
    %385 = tpu.matmul %384, %12, %cst_79 {dimension_numbers = #tpu.dot_dimension_numbers<[1], [0], [0], [1], [0, 0, 1, 1], [], []>} : vector<32x32xf32>, vector<32x16xf32>, vector<32x16xf32> -> vector<32x16xf32>
    %386 = vector.broadcast %15 : vector<1x16xf32> to vector<32x16xf32>
    %387 = arith.addf %385, %386 : vector<32x16xf32>
    %388 = arith.addf %376, %387 : vector<32x16xf32>
    %c31_i32 = arith.constant 31 : i32
    %389 = arith.sitofp %c31_i32 : i32 to f32
    %cst_80 = arith.constant dense<0.000000e+00> : vector<32x32xf32>
    %390 = tpu.matmul %388, %9, %cst_80 {dimension_numbers = #tpu.dot_dimension_numbers<[1], [0], [0], [1], [0, 0, 1, 1], [], []>} : vector<32x16xf32>, vector<16x32xf32>, vector<32x32xf32> -> vector<32x32xf32>
    %391 = arith.addf %390, %5 : vector<32x32xf32>
    %392 = vector.broadcast %389 : f32 to vector<1x32xf32>
    %393 = arith.mulf %392, %8 : vector<1x32xf32>
    %394 = vector.broadcast %393 : vector<1x32xf32> to vector<32x32xf32>
    %395 = arith.addf %391, %394 : vector<32x32xf32>
    %396 = math.tanh %395 : vector<32x32xf32>
    %cst_81 = arith.constant dense<0.000000e+00> : vector<32x16xf32>
    %397 = tpu.matmul %396, %12, %cst_81 {dimension_numbers = #tpu.dot_dimension_numbers<[1], [0], [0], [1], [0, 0, 1, 1], [], []>} : vector<32x32xf32>, vector<32x16xf32>, vector<32x16xf32> -> vector<32x16xf32>
    %398 = vector.broadcast %15 : vector<1x16xf32> to vector<32x16xf32>
    %399 = arith.addf %397, %398 : vector<32x16xf32>
    %400 = arith.addf %388, %399 : vector<32x16xf32>
    %c32_i32 = arith.constant 32 : i32
    %c0_82 = arith.constant 0 : index
    %c0_83 = arith.constant 0 : index
    %401 = vector.load %arg9[%c0_82, %c0_83] : memref<32x16xf32, #tpu.memory_space<vmem>>, vector<32x16xf32>
    tpu.vector_store %arg9[%c0_82, %c0_83], %400 {strides = array<i32>} : memref<32x16xf32, #tpu.memory_space<vmem>>, vector<32x16xf32>,
    return
  }
  func.func @transform_0(%arg0: i32) -> (i32, i32) {
    %c0_i32 = arith.constant 0 : i32
    %c0_i32_0 = arith.constant 0 : i32
    return %arg0, %c0_i32 : i32, i32
  }
  func.func @transform_1(%arg0: i32) -> (i32, i32) {
    %c0_i32 = arith.constant 0 : i32
    %c0_i32_0 = arith.constant 0 : i32
    return %arg0, %c0_i32 : i32, i32
  }
  func.func @transform_2(%arg0: i32) -> (i32, i32) {
    %c0_i32 = arith.constant 0 : i32
    %c0_i32_0 = arith.constant 0 : i32
    %c0_i32_1 = arith.constant 0 : i32
    return %c0_i32, %c0_i32_0 : i32, i32
  }
  func.func @transform_3(%arg0: i32) -> (i32, i32) {
    %c0_i32 = arith.constant 0 : i32
    %c0_i32_0 = arith.constant 0 : i32
    %c0_i32_1 = arith.constant 0 : i32
    return %c0_i32, %c0_i32_0 : i32, i32
  }
  func.func @transform_4(%arg0: i32) -> (i32, i32) {
    %c0_i32 = arith.constant 0 : i32
    %c0_i32_0 = arith.constant 0 : i32
    %c0_i32_1 = arith.constant 0 : i32
    return %c0_i32, %c0_i32_0 : i32, i32
  }
  func.func @transform_5(%arg0: i32) -> (i32, i32) {
    %c0_i32 = arith.constant 0 : i32
    %c0_i32_0 = arith.constant 0 : i32
    %c0_i32_1 = arith.constant 0 : i32
    return %c0_i32, %c0_i32_0 : i32, i32
  }
  func.func @transform_6(%arg0: i32) -> (i32, i32) {
    %c0_i32 = arith.constant 0 : i32
    %c0_i32_0 = arith.constant 0 : i32
    %c0_i32_1 = arith.constant 0 : i32
    return %c0_i32, %c0_i32_0 : i32, i32
  }
  func.func @transform_7(%arg0: i32) -> (i32, i32) {
    %c0_i32 = arith.constant 0 : i32
    %c0_i32_0 = arith.constant 0 : i32
    %c0_i32_1 = arith.constant 0 : i32
    return %c0_i32, %c0_i32_0 : i32, i32
  }
  func.func @transform_8(%arg0: i32) -> (i32, i32) {
    %c0_i32 = arith.constant 0 : i32
    %c0_i32_0 = arith.constant 0 : i32
    return %arg0, %c0_i32 : i32, i32
  }
}

</mosaic_0001>

<bundles_post_ra>
// kernel: gpg_policy_forward.1
= control target key start
LH: loop header
LB: loop body
LE: loop exit
PB: predicated region body
PF: predicated region fallthrough
CT: control target
= control target key end

     0   :  { %s4215_s27 = smov 0   ;;  %s5089_s0 = inlined_call_operand.vmem [shape: f32[64,16], index: 0, kind: input, shape index: {}]   ;;  %s5090_s1 = inlined_call_operand.vmem [shape: f32[64,32], index: 1, kind: input, shape index: {}]   ;;  %s5091_s2 = inlined_call_operand.vmem [shape: f32[16,32], index: 2, kind: input, shape index: {}]   ;;  %s5092_s3 = inlined_call_operand.vmem [shape: f32[32,32], index: 3, kind: input, shape index: {}]   ;;  %s5093_s4 = inlined_call_operand.vmem [shape: f32[1,32], index: 4, kind: input, shape index: {}]   ;;  %s5094_s5 = inlined_call_operand.vmem [shape: f32[1,32], index: 5, kind: input, shape index: {}]   ;;  %s5095_s6 = inlined_call_operand.vmem [shape: f32[32,16], index: 6, kind: input, shape index: {}]   ;;  %s5096_s7 = inlined_call_operand.vmem [shape: f32[1,16], index: 7, kind: input, shape index: {}]   ;;  %s5097_s8 = inlined_call_operand.vmem [shape: f32[64,16], index: 8, kind: output, shape index: {}]  }
   0x1 LB: > { %s3614_s28 = sadd.s32 4294967295, %s4168_s27   ;;  %p3618_p0 = scmp.ge.s32.totalorder %s4168_s27, 1  ;;  %s4168_s27 = sphi %s4215_s27, %s18_s27  }
   0x2   : > { %p274_p1 = scmp.lt.s32.totalorder %s4168_s27, 3 }
   0x4   : > { %p275_p2 = pnand %p3618_p0, %p274_p1 }
   0x5   : > { %s3619_s11 = sshll.u32 (!%p275_p2), %s3614_s28, 2 }
   0x6   : > { %278 = sbr.rel (%p275_p2) target bundleno = 8812 (0x226c), region = 52  ;;  %p314_p3 = scmp.lt.s32.totalorder (!%p275_p2), %s3619_s11, 7 }
   0xb   : > { %v338_v0 = vld [vmem:[%s5092_s3 + $0x18] sm:$0xff]  ;;  %v337_v1 = vld [vmem:[%s5092_s3 + $0x10] sm:$0xff]  ;;  %v4232_v2 = vld [vmem:[%s5091_s2 + $0x8] sm:$0xff]  ;;  %s5099_s11 = smov (!%p314_p3, %s3619_s11), 7  ;;  %vm343_vm0 = vcmask 261120   ;;  %vm403_vm1 = vcmask 130048  }
   0xc   : > { %368 = vmatpush.msra.mxu0 %v338_v0  ;;  %v4237_v3 = vld [vmem:[%s5091_s2] sm:$0xff]  ;;  %v336_v4 = vld [vmem:[%s5092_s3 + $0x8] sm:$0xff]  ;;  %3887 = vmatpush.msra.mxu1 %v4232_v2  ;;  %s4250_s20 = sshll.u32 %s5099_s11, 3  ;;  %v392_v15 = vld [vmem:[%s5095_s6 + $0x18] sm:$0xff] }
   0xd   : > { %3888 = vmatpush.msra.mxu2 %v4232_v2  ;;  %3889 = vmatpush.msra.mxu3 %v4232_v2  ;;  %v335_v5 = vld [vmem:[%s5092_s3] sm:$0xff]  ;;  %s323_s23 = scalar_lea.vmem %s5090_s1, %s4250_s20  ;;  %s317_s26 = scalar_lea.vmem %s5089_s0, %s4250_s20  ;;  %v4290_v16 = vmul.f32 0.03125, %v392_v15  ;;  %v391_v17 = vld [vmem:[%s5095_s6 + $0x10] sm:$0xff]  ;;  %v390_v19 = vld [vmem:[%s5095_s6 + $0x8] sm:$0xff] }
   0xe   : > { %369 = vmatpush.msra.mxu0 %v337_v1  ;;  %3890 = vmatpush.msra.mxu1 %v4237_v3  ;;  %v331_v6 = vld [vmem:[%s323_s23] sm:$0xff]  ;;  %v4263_v7 = vld [vmem:[%s317_s26 + $0x8] sm:$0xff]  ;;  %v4265_v8 = vld [vmem:[%s317_s26 + $0x10] sm:$0xff]  ;;  %v4296_v18 = vmul.f32 0.03125, %v391_v17  ;;  %v4305_v21 = vmul.f32 0.03125, %v390_v19  ;;  %s329_s10 = scalar_lea.vmem %s5097_s8, %s4250_s20 }
   0xf   : > { %3891 = vmatpush.msra.mxu2 %v4237_v3  ;;  %3892 = vmatpush.msra.mxu3 %v4237_v3  ;;  %v4267_v9 = vld [vmem:[%s317_s26 + $0x18] sm:$0xff]  ;;  %v332_v10 = vld [vmem:[%s323_s23 + $0x8] sm:$0xff]  ;;  %v333_v11 = vld [vmem:[%s323_s23 + $0x10] sm:$0xff] }
  0x10   : > { %370 = vmatpush.msra.mxu0 %v336_v4  ;;  %3630 = vmatmul.msk.f32.vlgmr.msra.gmra.mxu1 %vm403_vm1, %v4263_v7  ;;  %v334_v12 = vld [vmem:[%s323_s23 + $0x18] sm:$0xff]  ;;  %v4283_v13 = vld [vmem:[%s317_s26] sm:$0xff] }
  0x11   : > { %531 = vmatpush.msrb.mxu3 %v4232_v2  ;;  %3631 = vmatmul.msk.f32.vlgmr.msra.gmra.mxu2 %vm403_vm1, %v4265_v8  ;;  %v389_v20 = vld [vmem:[%s5095_s6] sm:$0xff] }
  0x12   : > { %371 = vmatpush.msra.mxu0 %v335_v5  ;;  %3632 = vmatmul.msk.f32.vlgmr.msra.gmra.mxu3 %vm403_vm1, %v4267_v9  ;;  %v4309_v22 = vmul.f32 0.03125, %v389_v20  ;;  %v385_v25 = vld [vmem:[%s5093_s4] sm:$0x1] }
  0x13   : > { %3625 = vmatmul.msk.f32.vlgmr.msra.gmra.mxu0 %vm343_vm0, %v331_v6  ;;  %532 = vmatpush.msrb.mxu3 %v4237_v3  ;;  %v4332_v27 = vmul.f32 0.03125, %v385_v25  ;;  %v3901_v28 = vld [vmem:[%s5094_s5] ss:$0 sm:$0xff] }
  0x14   : > { %430 = vmatpush.msrb.mxu0 %v4232_v2  ;;  %484 = vmatpush.msrb.mxu2 %v4290_v16  ;;  %v397_v51 = vld [vmem:[%s5096_s7] sm:$0x1] }
  0x15   : > { %628 = vmatpush.msra.mxu3 %v4232_v2  ;;  %581 = vmatpush.msrb.mxu1 %v4290_v16  ;;  %v445_v29 = vmul.f32 0.0, %v4332_v27  ;;  %v398_v52 = vmul.f32 0.03125, %v397_v51  ;;  %v547_v4 = vperm.slane %v4332_v27, 0 }
  0x16   : > { %431 = vmatpush.msrb.mxu0 %v4237_v3  ;;  %485 = vmatpush.msrb.mxu2 %v4296_v18 }
  0x17   : > { %629 = vmatpush.msra.mxu3 %v4237_v3  ;;  %582 = vmatpush.msrb.mxu1 %v4296_v18  ;;  %v447_v33 = vperm.slane %v445_v29, 0  ;;  %v4359_v53 = vperm.slane %v398_v52, 0 }
  0x18   : > { %679 = vmatpush.msra.mxu0 %v4290_v16  ;;  %486 = vmatpush.msrb.mxu2 %v4305_v21 }
  0x19   : > { %583 = vmatpush.msrb.mxu1 %v4305_v21 }
  0x1a   : > { %680 = vmatpush.msra.mxu0 %v4296_v18  ;;  %487 = vmatpush.msrb.mxu2 %v4309_v22 }
  0x1b   : > { %3626 = vmatmul.msk.f32.gmra.mxu0 %vm343_vm0, %v332_v10  ;;  %584 = vmatpush.msrb.mxu1 %v4309_v22 }
  0x1c   : > { %681 = vmatpush.msra.mxu0 %v4305_v21  ;;  %726 = vmatpush.msra.mxu2 %v4232_v2 }
  0x1d   : > { %777 = vmatpush.msra.mxu1 %v4290_v16 }
  0x1e   : > { %682 = vmatpush.msra.mxu0 %v4309_v22  ;;  %727 = vmatpush.msra.mxu2 %v4237_v3 }
  0x1f   : > { %778 = vmatpush.msra.mxu1 %v4296_v18 }
  0x21   : > { %779 = vmatpush.msra.mxu1 %v4305_v21 }
  0x23   : > { %3627 = vmatmul.msk.f32.gmra.mxu0 %vm343_vm0, %v333_v11  ;;  %780 = vmatpush.msra.mxu1 %v4309_v22 }
  0x2b   : > { %3628 = vmatmul.msk.f32.gmra.mxu0 %vm343_vm0, %v334_v12 }
  0x33   : > { %3629 = vmatmul.msk.f32.vlgmr.msrb.gmra.mxu0 %vm403_vm1, %v4283_v13 }
  0x34   : > { %875 = vmatpush.msrb.mxu0 %v4290_v16 }
  0x36   : > { %876 = vmatpush.msrb.mxu0 %v4296_v18 }
  0x38   : > { %877 = vmatpush.msrb.mxu0 %v4305_v21 }
  0x3a   : > { %878 = vmatpush.msrb.mxu0 %v4309_v22 }
  0x8d   : > { %v436_v35 = vpop.f32.mrf.mxu1 }
  0x90   : > { %v373_v14 = vpop.f32.mrf.mxu0 }
  0x91   : > { %v4338_v30 = vadd.f32 %v3901_v28, %v373_v14 }
  0x94   : > { %v439_v40 = vpop.f32.mrf.mxu2 }
  0x95   : > { %v442_v45 = vpop.f32.mrf.mxu3 }
  0x98   : > { %v376_v23 = vpop.f32.mrf.mxu0 }
  0x99   : > { %v4340_v32 = vadd.f32 %v3901_v28, %v376_v23 }
  0x9b   : > { %v437_v37 = vadd.f32 %v436_v35, %v4340_v32 }
  0x9d   : > { %v450_v38 = vadd.f32 %v447_v33, %v437_v37 }
  0xa0   : > { %v379_v24 = vpop.f32.mrf.mxu0 }
  0xa1   : > { %v4344_v39 = vadd.f32 %v3901_v28, %v379_v24 }
  0xa3   : > { %v440_v42 = vadd.f32 %v439_v40, %v4344_v39 }
  0xa5   : > { %v451_v43 = vadd.f32 %v447_v33, %v440_v42 }
  0xa8   : > { %v382_v26 = vpop.f32.mrf.mxu0 }
  0xa9   : > { %v4350_v44 = vadd.f32 %v3901_v28, %v382_v26 }
  0xab   : > { %v443_v47 = vadd.f32 %v442_v45, %v4350_v44 }
  0xad   : > { %v452_v48 = vadd.f32 %v447_v33, %v443_v47 }
  0xb0   : > { %v433_v31 = vpop.f32.mrf.mxu0 }
  0xb1   : > { %v434_v34 = vadd.f32 %v433_v31, %v4338_v30 }
  0xb3   : > { %v449_v36 = vadd.f32 %v447_v33, %v434_v34 }
  0xb5   : > { %3902 = vtanh.f32 %v449_v36 }
  0xb6   : > { %3904 = vtanh.f32 %v450_v38 }
  0xb7   : > { %3906 = vtanh.f32 %v451_v43 }
  0xb8   : > { %3908 = vtanh.f32 %v452_v48 }
  0xbb   : > { %v3903_v41 = vpop.eup %3902 }
  0xbc   : > { %3633 = vmatmul.msk.f32.vlgmr.msrb.gmra.mxu2 %vm343_vm0, %v3903_v41  ;;  %v3905_v46 = vpop.eup %3904  ;;  %v643_v41 = vmul.f32 2.0, %v4332_v27 }
  0xbd   : > { %922 = vmatpush.msrb.mxu2 %v4232_v2  ;;  %v3907_v49 = vpop.eup %3906 }
  0xbe   : > { %v3909_v50 = vpop.eup %3908  ;;  %v645_v42 = vperm.slane %v643_v41, 0 }
  0xbf   : > { %923 = vmatpush.msrb.mxu2 %v4237_v3 }
  0xc4   : > { %3634 = vmatmul.msk.f32.gmra.mxu2 %vm343_vm0, %v3905_v46 }
  0xcc   : > { %3635 = vmatmul.msk.f32.gmra.mxu2 %vm343_vm0, %v3907_v49 }
  0xd4   : > { %3636 = vmatmul.msk.f32.gmra.mxu2 %vm343_vm0, %v3909_v50 }
 0x13f   : > { %v489_v54 = vpop.f32.mrf.mxu2 }
 0x140   : > { %v490_v55 = vadd.f32 %v489_v54, %v4359_v53 }
 0x142   : > { %v501_v56 = vadd.f32 %v490_v55, %v4283_v13 }
 0x144   : > { %3637 = vmatmul.msk.f32.vlgmr.msrb.gmra.mxu3 %vm403_vm1, %v501_v56 }
 0x145   : > { %824 = vmatpush.msrb.mxu3 %v4232_v2 }
 0x147   : > { %v492_v57 = vpop.f32.mrf.mxu2  ;;  %825 = vmatpush.msrb.mxu3 %v4237_v3 }
 0x148   : > { %v493_v58 = vadd.f32 %v492_v57, %v4359_v53 }
 0x14a   : > { %v502_v59 = vadd.f32 %v493_v58, %v4263_v7 }
 0x14c   : > { %3638 = vmatmul.msk.f32.gmra.mxu3 %vm403_vm1, %v502_v59 }
 0x14f   : > { %v495_v60 = vpop.f32.mrf.mxu2 }
 0x150   : > { %v496_v61 = vadd.f32 %v495_v60, %v4359_v53 }
 0x152   : > { %v503_v62 = vadd.f32 %v496_v61, %v4265_v8 }
 0x154   : > { %3639 = vmatmul.msk.f32.gmra.mxu3 %vm403_vm1, %v503_v62 }
 0x157   : > { %v498_v63 = vpop.f32.mrf.mxu2 }
 0x158   : > { %v499_v0 = vadd.f32 %v498_v63, %v4359_v53 }
 0x15a   : > { %v504_v1 = vadd.f32 %v499_v0, %v4267_v9 }
 0x15c   : > { %3640 = vmatmul.msk.f32.gmra.mxu3 %vm403_vm1, %v504_v1 }
 0x1c7   : > { %v534_v5 = vpop.f32.mrf.mxu3 }
 0x1c8   : > { %v535_v6 = vadd.f32 %v534_v5, %v4338_v30 }
 0x1ca   : > { %v549_v7 = vadd.f32 %v547_v4, %v535_v6 }
 0x1cc   : > { %3910 = vtanh.f32 %v549_v7 }
 0x1cf   : > { %v537_v10 = vpop.f32.mrf.mxu3 }
 0x1d0   : > { %v538_v11 = vadd.f32 %v537_v10, %v4340_v32 }
 0x1d2   : > { %v3911_v8 = vpop.eup %3910  ;;  %v550_v12 = vadd.f32 %v547_v4, %v538_v11 }
 0x1d3   : > { %3641 = vmatmul.msk.f32.vlgmr.msrb.gmra.mxu1 %vm343_vm0, %v3911_v8 }
 0x1d4   : > { %3912 = vtanh.f32 %v550_v12  ;;  %973 = vmatpush.msrb.mxu1 %v4290_v16  ;;  %v741_v12 = vmul.f32 3.0, %v4332_v27 }
 0x1d6   : > { %974 = vmatpush.msrb.mxu1 %v4296_v18 }
 0x1d7   : > { %v540_v9 = vpop.f32.mrf.mxu3 }
 0x1d8   : > { %v541_v13 = vadd.f32 %v540_v9, %v4344_v39  ;;  %975 = vmatpush.msrb.mxu1 %v4305_v21  ;;  %v743_v9 = vperm.slane %v741_v12, 0 }
 0x1da   : > { %v3913_v14 = vpop.eup %3912  ;;  %v551_v15 = vadd.f32 %v547_v4, %v541_v13  ;;  %976 = vmatpush.msrb.mxu1 %v4309_v22 }
 0x1db   : > { %3642 = vmatmul.msk.f32.gmra.mxu1 %vm343_vm0, %v3913_v14 }
 0x1dc   : > { %3914 = vtanh.f32 %v551_v15 }
 0x1df   : > { %v543_v17 = vpop.f32.mrf.mxu3 }
 0x1e0   : > { %v544_v19 = vadd.f32 %v543_v17, %v4350_v44 }
 0x1e2   : > { %v3915_v20 = vpop.eup %3914  ;;  %v552_v23 = vadd.f32 %v547_v4, %v544_v19 }
 0x1e3   : > { %3643 = vmatmul.msk.f32.gmra.mxu1 %vm343_vm0, %v3915_v20 }
 0x1e4   : > { %3916 = vtanh.f32 %v552_v23 }
 0x1ea   : > { %v3917_v24 = vpop.eup %3916 }
 0x1eb   : > { %3644 = vmatmul.msk.f32.gmra.mxu1 %vm343_vm0, %v3917_v24 }
 0x250   : > { %v586_v25 = vpop.f32.mrf.mxu1 }
 0x251   : > { %v587_v26 = vadd.f32 %v586_v25, %v4359_v53 }
 0x253   : > { %v598_v28 = vadd.f32 %v587_v26, %v501_v56 }
 0x255   : > { %3645 = vmatmul.msk.f32.vlgmr.msra.gmra.mxu3 %vm403_vm1, %v598_v28 }
 0x256   : > { %1020 = vmatpush.msra.mxu3 %v4232_v2 }
 0x258   : > { %v589_v29 = vpop.f32.mrf.mxu1  ;;  %1021 = vmatpush.msra.mxu3 %v4237_v3 }
 0x259   : > { %v590_v31 = vadd.f32 %v589_v29, %v4359_v53 }
 0x25b   : > { %v599_v33 = vadd.f32 %v590_v31, %v502_v59 }
 0x25d   : > { %3646 = vmatmul.msk.f32.gmra.mxu3 %vm403_vm1, %v599_v33 }
 0x260   : > { %v592_v34 = vpop.f32.mrf.mxu1 }
 0x261   : > { %v593_v35 = vadd.f32 %v592_v34, %v4359_v53 }
 0x263   : > { %v600_v36 = vadd.f32 %v593_v35, %v503_v62 }
 0x265   : > { %3647 = vmatmul.msk.f32.gmra.mxu3 %vm403_vm1, %v600_v36 }
 0x268   : > { %v595_v37 = vpop.f32.mrf.mxu1 }
 0x269   : > { %v596_v38 = vadd.f32 %v595_v37, %v4359_v53 }
 0x26b   : > { %v601_v40 = vadd.f32 %v596_v38, %v504_v1 }
 0x26d   : > { %3648 = vmatmul.msk.f32.gmra.mxu3 %vm403_vm1, %v601_v40 }
 0x2d8   : > { %v631_v43 = vpop.f32.mrf.mxu3 }
 0x2d9   : > { %v632_v45 = vadd.f32 %v631_v43, %v4338_v30 }
 0x2db   : > { %v647_v46 = vadd.f32 %v645_v42, %v632_v45 }
 0x2dd   : > { %3918 = vtanh.f32 %v647_v46 }
 0x2e0   : > { %v634_v47 = vpop.f32.mrf.mxu3 }
 0x2e1   : > { %v635_v48 = vadd.f32 %v634_v47, %v4340_v32 }
 0x2e3   : > { %v3919_v49 = vpop.eup %3918  ;;  %v648_v50 = vadd.f32 %v645_v42, %v635_v48 }
 0x2e4   : > { %3649 = vmatmul.msk.f32.vlgmr.msra.gmra.mxu0 %vm343_vm0, %v3919_v49 }
 0x2e5   : > { %3920 = vtanh.f32 %v648_v50  ;;  %1071 = vmatpush.msra.mxu0 %v4290_v16  ;;  %v839_v50 = vmul.f32 4.0, %v4332_v27 }
 0x2e7   : > { %1072 = vmatpush.msra.mxu0 %v4296_v18 }
 0x2e8   : > { %v637_v51 = vpop.f32.mrf.mxu3 }
 0x2e9   : > { %v638_v52 = vadd.f32 %v637_v51, %v4344_v39  ;;  %1073 = vmatpush.msra.mxu0 %v4305_v21  ;;  %v841_v51 = vperm.slane %v839_v50, 0 }
 0x2eb   : > { %v3921_v54 = vpop.eup %3920  ;;  %v649_v55 = vadd.f32 %v645_v42, %v638_v52  ;;  %1074 = vmatpush.msra.mxu0 %v4309_v22 }
 0x2ec   : > { %3650 = vmatmul.msk.f32.gmra.mxu0 %vm343_vm0, %v3921_v54 }
 0x2ed   : > { %3922 = vtanh.f32 %v649_v55 }
 0x2f0   : > { %v640_v56 = vpop.f32.mrf.mxu3 }
 0x2f1   : > { %v641_v57 = vadd.f32 %v640_v56, %v4350_v44 }
 0x2f3   : > { %v3923_v58 = vpop.eup %3922  ;;  %v650_v59 = vadd.f32 %v645_v42, %v641_v57 }
 0x2f4   : > { %3651 = vmatmul.msk.f32.gmra.mxu0 %vm343_vm0, %v3923_v58 }
 0x2f5   : > { %3924 = vtanh.f32 %v650_v59 }
 0x2fb   : > { %v3925_v60 = vpop.eup %3924 }
 0x2fc   : > { %3652 = vmatmul.msk.f32.gmra.mxu0 %vm343_vm0, %v3925_v60 }
 0x361   : > { %v684_v61 = vpop.f32.mrf.mxu0 }
 0x362   : > { %v685_v62 = vadd.f32 %v684_v61, %v4359_v53 }
 0x364   : > { %v696_v63 = vadd.f32 %v685_v62, %v598_v28 }
 0x366   : > { %3653 = vmatmul.msk.f32.vlgmr.msra.gmra.mxu2 %vm403_vm1, %v696_v63 }
 0x367   : > { %1118 = vmatpush.msra.mxu2 %v4232_v2 }
 0x369   : > { %v687_v0 = vpop.f32.mrf.mxu0  ;;  %1119 = vmatpush.msra.mxu2 %v4237_v3 }
 0x36a   : > { %v688_v1 = vadd.f32 %v687_v0, %v4359_v53 }
 0x36c   : > { %v697_v4 = vadd.f32 %v688_v1, %v599_v33 }
 0x36e   : > { %3654 = vmatmul.msk.f32.gmra.mxu2 %vm403_vm1, %v697_v4 }
 0x371   : > { %v690_v5 = vpop.f32.mrf.mxu0 }
 0x372   : > { %v691_v6 = vadd.f32 %v690_v5, %v4359_v53 }
 0x374   : > { %v698_v7 = vadd.f32 %v691_v6, %v600_v36 }
 0x376   : > { %3655 = vmatmul.msk.f32.gmra.mxu2 %vm403_vm1, %v698_v7 }
 0x379   : > { %v693_v10 = vpop.f32.mrf.mxu0 }
 0x37a   : > { %v694_v11 = vadd.f32 %v693_v10, %v4359_v53 }
 0x37c   : > { %v699_v8 = vadd.f32 %v694_v11, %v601_v40 }
 0x37e   : > { %3656 = vmatmul.msk.f32.gmra.mxu2 %vm403_vm1, %v699_v8 }
 0x3e9   : > { %v729_v13 = vpop.f32.mrf.mxu2 }
 0x3ea   : > { %v730_v14 = vadd.f32 %v729_v13, %v4338_v30 }
 0x3ec   : > { %v745_v15 = vadd.f32 %v743_v9, %v730_v14 }
 0x3ee   : > { %3926 = vtanh.f32 %v745_v15 }
 0x3f1   : > { %v732_v17 = vpop.f32.mrf.mxu2 }
 0x3f2   : > { %v733_v19 = vadd.f32 %v732_v17, %v4340_v32 }
 0x3f4   : > { %v3927_v20 = vpop.eup %3926  ;;  %v746_v23 = vadd.f32 %v743_v9, %v733_v19 }
 0x3f5   : > { %3657 = vmatmul.msk.f32.vlgmr.msra.gmra.mxu1 %vm343_vm0, %v3927_v20 }
 0x3f6   : > { %3928 = vtanh.f32 %v746_v23  ;;  %1169 = vmatpush.msra.mxu1 %v4290_v16  ;;  %v937_v23 = vmul.f32 5.0, %v4332_v27 }
 0x3f8   : > { %1170 = vmatpush.msra.mxu1 %v4296_v18 }
 0x3f9   : > { %v735_v24 = vpop.f32.mrf.mxu2 }
 0x3fa   : > { %v736_v25 = vadd.f32 %v735_v24, %v4344_v39  ;;  %1171 = vmatpush.msra.mxu1 %v4305_v21  ;;  %v939_v24 = vperm.slane %v937_v23, 0 }
 0x3fc   : > { %v3929_v26 = vpop.eup %3928  ;;  %v747_v28 = vadd.f32 %v743_v9, %v736_v25  ;;  %1172 = vmatpush.msra.mxu1 %v4309_v22 }
 0x3fd   : > { %3658 = vmatmul.msk.f32.gmra.mxu1 %vm343_vm0, %v3929_v26 }
 0x3fe   : > { %3930 = vtanh.f32 %v747_v28 }
 0x401   : > { %v738_v29 = vpop.f32.mrf.mxu2 }
 0x402   : > { %v739_v31 = vadd.f32 %v738_v29, %v4350_v44 }
 0x404   : > { %v3931_v33 = vpop.eup %3930  ;;  %v748_v34 = vadd.f32 %v743_v9, %v739_v31 }
 0x405   : > { %3659 = vmatmul.msk.f32.gmra.mxu1 %vm343_vm0, %v3931_v33 }
 0x406   : > { %3932 = vtanh.f32 %v748_v34 }
 0x40c   : > { %v3933_v35 = vpop.eup %3932 }
 0x40d   : > { %3660 = vmatmul.msk.f32.gmra.mxu1 %vm343_vm0, %v3933_v35 }
 0x472   : > { %v782_v36 = vpop.f32.mrf.mxu1 }
 0x473   : > { %v783_v37 = vadd.f32 %v782_v36, %v4359_v53 }
 0x475   : > { %v794_v38 = vadd.f32 %v783_v37, %v696_v63 }
 0x477   : > { %3661 = vmatmul.msk.f32.vlgmr.msrb.gmra.mxu3 %vm403_vm1, %v794_v38 }
 0x478   : > { %1216 = vmatpush.msrb.mxu3 %v4232_v2 }
 0x47a   : > { %v785_v40 = vpop.f32.mrf.mxu1  ;;  %1217 = vmatpush.msrb.mxu3 %v4237_v3 }
 0x47b   : > { %v786_v41 = vadd.f32 %v785_v40, %v4359_v53 }
 0x47d   : > { %v795_v42 = vadd.f32 %v786_v41, %v697_v4 }
 0x47f   : > { %3662 = vmatmul.msk.f32.gmra.mxu3 %vm403_vm1, %v795_v42 }
 0x482   : > { %v788_v43 = vpop.f32.mrf.mxu1 }
 0x483   : > { %v789_v45 = vadd.f32 %v788_v43, %v4359_v53 }
 0x485   : > { %v796_v46 = vadd.f32 %v789_v45, %v698_v7 }
 0x487   : > { %3663 = vmatmul.msk.f32.gmra.mxu3 %vm403_vm1, %v796_v46 }
 0x48a   : > { %v791_v47 = vpop.f32.mrf.mxu1 }
 0x48b   : > { %v792_v48 = vadd.f32 %v791_v47, %v4359_v53 }
 0x48d   : > { %v797_v49 = vadd.f32 %v792_v48, %v699_v8 }
 0x48f   : > { %3664 = vmatmul.msk.f32.gmra.mxu3 %vm403_vm1, %v797_v49 }
 0x4fa   : > { %v827_v52 = vpop.f32.mrf.mxu3 }
 0x4fb   : > { %v828_v54 = vadd.f32 %v827_v52, %v4338_v30 }
 0x4fd   : > { %v843_v55 = vadd.f32 %v841_v51, %v828_v54 }
 0x4ff   : > { %3934 = vtanh.f32 %v843_v55 }
 0x502   : > { %v830_v56 = vpop.f32.mrf.mxu3 }
 0x503   : > { %v831_v57 = vadd.f32 %v830_v56, %v4340_v32 }
 0x505   : > { %v3935_v58 = vpop.eup %3934  ;;  %v844_v59 = vadd.f32 %v841_v51, %v831_v57 }
 0x506   : > { %3665 = vmatmul.msk.f32.vlgmr.msrb.gmra.mxu0 %vm343_vm0, %v3935_v58 }
 0x507   : > { %3936 = vtanh.f32 %v844_v59  ;;  %1267 = vmatpush.msrb.mxu0 %v4290_v16  ;;  %v1035_v59 = vmul.f32 6.0, %v4332_v27 }
 0x509   : > { %1268 = vmatpush.msrb.mxu0 %v4296_v18 }
 0x50a   : > { %v833_v60 = vpop.f32.mrf.mxu3 }
 0x50b   : > { %v834_v61 = vadd.f32 %v833_v60, %v4344_v39  ;;  %1269 = vmatpush.msrb.mxu0 %v4305_v21  ;;  %v1037_v60 = vperm.slane %v1035_v59, 0 }
 0x50d   : > { %v3937_v62 = vpop.eup %3936  ;;  %v845_v63 = vadd.f32 %v841_v51, %v834_v61  ;;  %1270 = vmatpush.msrb.mxu0 %v4309_v22 }
 0x50e   : > { %3666 = vmatmul.msk.f32.gmra.mxu0 %vm343_vm0, %v3937_v62 }
 0x50f   : > { %3938 = vtanh.f32 %v845_v63 }
 0x512   : > { %v836_v0 = vpop.f32.mrf.mxu3 }
 0x513   : > { %v837_v1 = vadd.f32 %v836_v0, %v4350_v44 }
 0x515   : > { %v3939_v4 = vpop.eup %3938  ;;  %v846_v5 = vadd.f32 %v841_v51, %v837_v1 }
 0x516   : > { %3667 = vmatmul.msk.f32.gmra.mxu0 %vm343_vm0, %v3939_v4 }
 0x517   : > { %3940 = vtanh.f32 %v846_v5 }
 0x51d   : > { %v3941_v6 = vpop.eup %3940 }
 0x51e   : > { %3668 = vmatmul.msk.f32.gmra.mxu0 %vm343_vm0, %v3941_v6 }
 0x583   : > { %v880_v7 = vpop.f32.mrf.mxu0 }
 0x584   : > { %v881_v10 = vadd.f32 %v880_v7, %v4359_v53 }
 0x586   : > { %v892_v11 = vadd.f32 %v881_v10, %v794_v38 }
 0x588   : > { %3669 = vmatmul.msk.f32.vlgmr.msrb.gmra.mxu2 %vm403_vm1, %v892_v11 }
 0x589   : > { %1314 = vmatpush.msrb.mxu2 %v4232_v2 }
 0x58b   : > { %v883_v8 = vpop.f32.mrf.mxu0  ;;  %1315 = vmatpush.msrb.mxu2 %v4237_v3 }
 0x58c   : > { %v884_v12 = vadd.f32 %v883_v8, %v4359_v53 }
 0x58e   : > { %v893_v9 = vadd.f32 %v884_v12, %v795_v42 }
 0x590   : > { %3670 = vmatmul.msk.f32.gmra.mxu2 %vm403_vm1, %v893_v9 }
 0x593   : > { %v886_v13 = vpop.f32.mrf.mxu0 }
 0x594   : > { %v887_v14 = vadd.f32 %v886_v13, %v4359_v53 }
 0x596   : > { %v894_v15 = vadd.f32 %v887_v14, %v796_v46 }
 0x598   : > { %3671 = vmatmul.msk.f32.gmra.mxu2 %vm403_vm1, %v894_v15 }
 0x59b   : > { %v889_v17 = vpop.f32.mrf.mxu0 }
 0x59c   : > { %v890_v19 = vadd.f32 %v889_v17, %v4359_v53 }
 0x59e   : > { %v895_v20 = vadd.f32 %v890_v19, %v797_v49 }
 0x5a0   : > { %3672 = vmatmul.msk.f32.gmra.mxu2 %vm403_vm1, %v895_v20 }
 0x60b   : > { %v925_v25 = vpop.f32.mrf.mxu2 }
 0x60c   : > { %v926_v26 = vadd.f32 %v925_v25, %v4338_v30 }
 0x60e   : > { %v941_v28 = vadd.f32 %v939_v24, %v926_v26 }
 0x610   : > { %3942 = vtanh.f32 %v941_v28 }
 0x613   : > { %v928_v29 = vpop.f32.mrf.mxu2 }
 0x614   : > { %v929_v31 = vadd.f32 %v928_v29, %v4340_v32 }
 0x616   : > { %v3943_v33 = vpop.eup %3942  ;;  %v942_v34 = vadd.f32 %v939_v24, %v929_v31 }
 0x617   : > { %3673 = vmatmul.msk.f32.vlgmr.msrb.gmra.mxu1 %vm343_vm0, %v3943_v33 }
 0x618   : > { %3944 = vtanh.f32 %v942_v34  ;;  %1365 = vmatpush.msrb.mxu1 %v4290_v16  ;;  %v1133_v34 = vmul.f32 7.0, %v4332_v27 }
 0x61a   : > { %1366 = vmatpush.msrb.mxu1 %v4296_v18 }
 0x61b   : > { %v931_v35 = vpop.f32.mrf.mxu2 }
 0x61c   : > { %v932_v36 = vadd.f32 %v931_v35, %v4344_v39  ;;  %1367 = vmatpush.msrb.mxu1 %v4305_v21  ;;  %v1135_v35 = vperm.slane %v1133_v34, 0 }
 0x61e   : > { %v3945_v37 = vpop.eup %3944  ;;  %v943_v38 = vadd.f32 %v939_v24, %v932_v36  ;;  %1368 = vmatpush.msrb.mxu1 %v4309_v22 }
 0x61f   : > { %3674 = vmatmul.msk.f32.gmra.mxu1 %vm343_vm0, %v3945_v37 }
 0x620   : > { %3946 = vtanh.f32 %v943_v38 }
 0x623   : > { %v934_v40 = vpop.f32.mrf.mxu2 }
 0x624   : > { %v935_v41 = vadd.f32 %v934_v40, %v4350_v44 }
 0x626   : > { %v3947_v42 = vpop.eup %3946  ;;  %v944_v43 = vadd.f32 %v939_v24, %v935_v41 }
 0x627   : > { %3675 = vmatmul.msk.f32.gmra.mxu1 %vm343_vm0, %v3947_v42 }
 0x628   : > { %3948 = vtanh.f32 %v944_v43 }
 0x62e   : > { %v3949_v45 = vpop.eup %3948 }
 0x62f   : > { %3676 = vmatmul.msk.f32.gmra.mxu1 %vm343_vm0, %v3949_v45 }
 0x694   : > { %v978_v46 = vpop.f32.mrf.mxu1 }
 0x695   : > { %v979_v47 = vadd.f32 %v978_v46, %v4359_v53 }
 0x697   : > { %v990_v48 = vadd.f32 %v979_v47, %v892_v11 }
 0x699   : > { %3677 = vmatmul.msk.f32.vlgmr.msra.gmra.mxu3 %vm403_vm1, %v990_v48 }
 0x69a   : > { %1412 = vmatpush.msra.mxu3 %v4232_v2 }
 0x69c   : > { %v981_v49 = vpop.f32.mrf.mxu1  ;;  %1413 = vmatpush.msra.mxu3 %v4237_v3 }
 0x69d   : > { %v982_v50 = vadd.f32 %v981_v49, %v4359_v53 }
 0x69f   : > { %v991_v51 = vadd.f32 %v982_v50, %v893_v9 }
 0x6a1   : > { %3678 = vmatmul.msk.f32.gmra.mxu3 %vm403_vm1, %v991_v51 }
 0x6a4   : > { %v984_v52 = vpop.f32.mrf.mxu1 }
 0x6a5   : > { %v985_v54 = vadd.f32 %v984_v52, %v4359_v53 }
 0x6a7   : > { %v992_v55 = vadd.f32 %v985_v54, %v894_v15 }
 0x6a9   : > { %3679 = vmatmul.msk.f32.gmra.mxu3 %vm403_vm1, %v992_v55 }
 0x6ac   : > { %v987_v56 = vpop.f32.mrf.mxu1 }
 0x6ad   : > { %v988_v57 = vadd.f32 %v987_v56, %v4359_v53 }
 0x6af   : > { %v993_v58 = vadd.f32 %v988_v57, %v895_v20 }
 0x6b1   : > { %3680 = vmatmul.msk.f32.gmra.mxu3 %vm403_vm1, %v993_v58 }
 0x71c   : > { %v1023_v61 = vpop.f32.mrf.mxu3 }
 0x71d   : > { %v1024_v62 = vadd.f32 %v1023_v61, %v4338_v30 }
 0x71f   : > { %v1039_v63 = vadd.f32 %v1037_v60, %v1024_v62 }
 0x721   : > { %3950 = vtanh.f32 %v1039_v63 }
 0x724   : > { %v1026_v0 = vpop.f32.mrf.mxu3 }
 0x725   : > { %v1027_v1 = vadd.f32 %v1026_v0, %v4340_v32 }
 0x727   : > { %v3951_v4 = vpop.eup %3950  ;;  %v1040_v5 = vadd.f32 %v1037_v60, %v1027_v1 }
 0x728   : > { %3681 = vmatmul.msk.f32.vlgmr.msra.gmra.mxu0 %vm343_vm0, %v3951_v4 }
 0x729   : > { %3952 = vtanh.f32 %v1040_v5  ;;  %1463 = vmatpush.msra.mxu0 %v4290_v16  ;;  %v1231_v5 = vmul.f32 8.0, %v4332_v27 }
 0x72b   : > { %1464 = vmatpush.msra.mxu0 %v4296_v18 }
 0x72c   : > { %v1029_v6 = vpop.f32.mrf.mxu3 }
 0x72d   : > { %v1030_v7 = vadd.f32 %v1029_v6, %v4344_v39  ;;  %1465 = vmatpush.msra.mxu0 %v4305_v21  ;;  %v1233_v6 = vperm.slane %v1231_v5, 0 }
 0x72f   : > { %v3953_v10 = vpop.eup %3952  ;;  %v1041_v11 = vadd.f32 %v1037_v60, %v1030_v7  ;;  %1466 = vmatpush.msra.mxu0 %v4309_v22 }
 0x730   : > { %3682 = vmatmul.msk.f32.gmra.mxu0 %vm343_vm0, %v3953_v10 }
 0x731   : > { %3954 = vtanh.f32 %v1041_v11 }
 0x734   : > { %v1032_v8 = vpop.f32.mrf.mxu3 }
 0x735   : > { %v1033_v12 = vadd.f32 %v1032_v8, %v4350_v44 }
 0x737   : > { %v3955_v9 = vpop.eup %3954  ;;  %v1042_v13 = vadd.f32 %v1037_v60, %v1033_v12 }
 0x738   : > { %3683 = vmatmul.msk.f32.gmra.mxu0 %vm343_vm0, %v3955_v9 }
 0x739   : > { %3956 = vtanh.f32 %v1042_v13 }
 0x73f   : > { %v3957_v14 = vpop.eup %3956 }
 0x740   : > { %3684 = vmatmul.msk.f32.gmra.mxu0 %vm343_vm0, %v3957_v14 }
 0x7a5   : > { %v1076_v15 = vpop.f32.mrf.mxu0 }
 0x7a6   : > { %v1077_v17 = vadd.f32 %v1076_v15, %v4359_v53 }
 0x7a8   : > { %v1088_v19 = vadd.f32 %v1077_v17, %v990_v48 }
 0x7aa   : > { %3685 = vmatmul.msk.f32.vlgmr.msra.gmra.mxu2 %vm403_vm1, %v1088_v19 }
 0x7ab   : > { %1510 = vmatpush.msra.mxu2 %v4232_v2 }
 0x7ad   : > { %v1079_v20 = vpop.f32.mrf.mxu0  ;;  %1511 = vmatpush.msra.mxu2 %v4237_v3 }
 0x7ae   : > { %v1080_v23 = vadd.f32 %v1079_v20, %v4359_v53 }
 0x7b0   : > { %v1089_v24 = vadd.f32 %v1080_v23, %v991_v51 }
 0x7b2   : > { %3686 = vmatmul.msk.f32.gmra.mxu2 %vm403_vm1, %v1089_v24 }
 0x7b5   : > { %v1082_v25 = vpop.f32.mrf.mxu0 }
 0x7b6   : > { %v1083_v26 = vadd.f32 %v1082_v25, %v4359_v53 }
 0x7b8   : > { %v1090_v28 = vadd.f32 %v1083_v26, %v992_v55 }
 0x7ba   : > { %3687 = vmatmul.msk.f32.gmra.mxu2 %vm403_vm1, %v1090_v28 }
 0x7bd   : > { %v1085_v29 = vpop.f32.mrf.mxu0 }
 0x7be   : > { %v1086_v31 = vadd.f32 %v1085_v29, %v4359_v53 }
 0x7c0   : > { %v1091_v33 = vadd.f32 %v1086_v31, %v993_v58 }
 0x7c2   : > { %3688 = vmatmul.msk.f32.gmra.mxu2 %vm403_vm1, %v1091_v33 }
 0x82d   : > { %v1121_v36 = vpop.f32.mrf.mxu2 }
 0x82e   : > { %v1122_v37 = vadd.f32 %v1121_v36, %v4338_v30 }
 0x830   : > { %v1137_v38 = vadd.f32 %v1135_v35, %v1122_v37 }
 0x832   : > { %3958 = vtanh.f32 %v1137_v38 }
 0x835   : > { %v1124_v40 = vpop.f32.mrf.mxu2 }
 0x836   : > { %v1125_v41 = vadd.f32 %v1124_v40, %v4340_v32 }
 0x838   : > { %v3959_v42 = vpop.eup %3958  ;;  %v1138_v43 = vadd.f32 %v1135_v35, %v1125_v41 }
 0x839   : > { %3689 = vmatmul.msk.f32.vlgmr.msra.gmra.mxu1 %vm343_vm0, %v3959_v42 }
 0x83a   : > { %3960 = vtanh.f32 %v1138_v43  ;;  %1561 = vmatpush.msra.mxu1 %v4290_v16 }
 0x83c   : > { %1562 = vmatpush.msra.mxu1 %v4296_v18 }
 0x83d   : > { %v1127_v45 = vpop.f32.mrf.mxu2 }
 0x83e   : > { %v1128_v46 = vadd.f32 %v1127_v45, %v4344_v39  ;;  %1563 = vmatpush.msra.mxu1 %v4305_v21 }
 0x840   : > { %v3961_v47 = vpop.eup %3960  ;;  %v1139_v48 = vadd.f32 %v1135_v35, %v1128_v46  ;;  %1564 = vmatpush.msra.mxu1 %v4309_v22 }
 0x841   : > { %3690 = vmatmul.msk.f32.gmra.mxu1 %vm343_vm0, %v3961_v47 }
 0x842   : > { %3962 = vtanh.f32 %v1139_v48 }
 0x845   : > { %v1130_v49 = vpop.f32.mrf.mxu2 }
 0x846   : > { %v1131_v50 = vadd.f32 %v1130_v49, %v4350_v44 }
 0x848   : > { %v3963_v51 = vpop.eup %3962  ;;  %v1140_v52 = vadd.f32 %v1135_v35, %v1131_v50 }
 0x849   : > { %3691 = vmatmul.msk.f32.gmra.mxu1 %vm343_vm0, %v3963_v51 }
 0x84a   : > { %3964 = vtanh.f32 %v1140_v52 }
 0x850   : > { %v3965_v54 = vpop.eup %3964 }
 0x851   : > { %3692 = vmatmul.msk.f32.gmra.mxu1 %vm343_vm0, %v3965_v54 }
 0x8b6   : > { %v1174_v55 = vpop.f32.mrf.mxu1 }
 0x8b7   : > { %v1175_v56 = vadd.f32 %v1174_v55, %v4359_v53 }
 0x8b9   : > { %v1186_v57 = vadd.f32 %v1175_v56, %v1088_v19 }
 0x8bb   : > { %3693 = vmatmul.msk.f32.vlgmr.msrb.gmra.mxu3 %vm403_vm1, %v1186_v57 }
 0x8bc   : > { %1608 = vmatpush.msrb.mxu3 %v4232_v2 }
 0x8be   : > { %v1177_v58 = vpop.f32.mrf.mxu1  ;;  %1609 = vmatpush.msrb.mxu3 %v4237_v3 }
 0x8bf   : > { %v1178_v59 = vadd.f32 %v1177_v58, %v4359_v53 }
 0x8c1   : > { %v1187_v60 = vadd.f32 %v1178_v59, %v1089_v24 }
 0x8c3   : > { %3694 = vmatmul.msk.f32.gmra.mxu3 %vm403_vm1, %v1187_v60 }
 0x8c6   : > { %v1180_v61 = vpop.f32.mrf.mxu1 }
 0x8c7   : > { %v1181_v62 = vadd.f32 %v1180_v61, %v4359_v53 }
 0x8c9   : > { %v1188_v63 = vadd.f32 %v1181_v62, %v1090_v28 }
 0x8cb   : > { %3695 = vmatmul.msk.f32.gmra.mxu3 %vm403_vm1, %v1188_v63 }
 0x8ce   : > { %v1183_v0 = vpop.f32.mrf.mxu1 }
 0x8cf   : > { %v1184_v1 = vadd.f32 %v1183_v0, %v4359_v53  ;;  %v4577_v0 = vld [vmem:[%s5091_s2 + $0x8] sm:$0xff] }
 0x8d1   : > { %v1189_v4 = vadd.f32 %v1184_v1, %v1091_v33 }
 0x8d3   : > { %3696 = vmatmul.msk.f32.gmra.mxu3 %vm403_vm1, %v1189_v4 }
 0x93e   : > { %v1219_v7 = vpop.f32.mrf.mxu3 }
 0x93f   : > { %v1220_v10 = vadd.f32 %v1219_v7, %v4338_v30 }
 0x941   : > { %v1235_v11 = vadd.f32 %v1233_v6, %v1220_v10 }
 0x943   : > { %3966 = vtanh.f32 %v1235_v11 }
 0x946   : > { %v1222_v8 = vpop.f32.mrf.mxu3 }
 0x947   : > { %v1223_v12 = vadd.f32 %v1222_v8, %v4340_v32 }
 0x949   : > { %v3967_v9 = vpop.eup %3966  ;;  %v1236_v13 = vadd.f32 %v1233_v6, %v1223_v12 }
 0x94a   : > { %3697 = vmatmul.msk.f32.vlgmr.msrb.gmra.mxu0 %vm343_vm0, %v3967_v9 }
 0x94b   : > { %3968 = vtanh.f32 %v1236_v13  ;;  %1659 = vmatpush.msrb.mxu0 %v4290_v16  ;;  %v1427_v13 = vmul.f32 10.0, %v4332_v27 }
 0x94d   : > { %1660 = vmatpush.msrb.mxu0 %v4296_v18 }
 0x94e   : > { %v1225_v14 = vpop.f32.mrf.mxu3 }
 0x94f   : > { %v1226_v15 = vadd.f32 %v1225_v14, %v4344_v39  ;;  %1661 = vmatpush.msrb.mxu0 %v4305_v21  ;;  %v1429_v14 = vperm.slane %v1427_v13, 0 }
 0x951   : > { %v3969_v17 = vpop.eup %3968  ;;  %v1237_v19 = vadd.f32 %v1233_v6, %v1226_v15  ;;  %1662 = vmatpush.msrb.mxu0 %v4309_v22 }
 0x952   : > { %3698 = vmatmul.msk.f32.gmra.mxu0 %vm343_vm0, %v3969_v17 }
 0x953   : > { %3970 = vtanh.f32 %v1237_v19 }
 0x956   : > { %v1228_v20 = vpop.f32.mrf.mxu3 }
 0x957   : > { %v1229_v23 = vadd.f32 %v1228_v20, %v4350_v44 }
 0x959   : > { %v3971_v24 = vpop.eup %3970  ;;  %v1238_v25 = vadd.f32 %v1233_v6, %v1229_v23 }
 0x95a   : > { %3699 = vmatmul.msk.f32.gmra.mxu0 %vm343_vm0, %v3971_v24 }
 0x95b   : > { %3972 = vtanh.f32 %v1238_v25 }
 0x961   : > { %v3973_v26 = vpop.eup %3972 }
 0x962   : > { %3700 = vmatmul.msk.f32.gmra.mxu0 %vm343_vm0, %v3973_v26 }
 0x9c7   : > { %v1272_v28 = vpop.f32.mrf.mxu0 }
 0x9c8   : > { %v1273_v29 = vadd.f32 %v1272_v28, %v4359_v53 }
 0x9ca   : > { %v1284_v31 = vadd.f32 %v1273_v29, %v1186_v57 }
 0x9cc   : > { %3701 = vmatmul.msk.f32.vlgmr.msrb.gmra.mxu2 %vm403_vm1, %v1284_v31 }
 0x9cd   : > { %1706 = vmatpush.msrb.mxu2 %v4232_v2  ;;  %v1329_v2 = vmul.f32 9.0, %v4332_v27 }
 0x9cf   : > { %v1275_v33 = vpop.f32.mrf.mxu0  ;;  %1707 = vmatpush.msrb.mxu2 %v4237_v3  ;;  %v1331_v3 = vperm.slane %v1329_v2, 0 }
 0x9d0   : > { %v1276_v34 = vadd.f32 %v1275_v33, %v4359_v53 }
 0x9d2   : > { %v1285_v35 = vadd.f32 %v1276_v34, %v1187_v60 }
 0x9d4   : > { %3702 = vmatmul.msk.f32.gmra.mxu2 %vm403_vm1, %v1285_v35 }
 0x9d7   : > { %v1278_v36 = vpop.f32.mrf.mxu0 }
 0x9d8   : > { %v1279_v37 = vadd.f32 %v1278_v36, %v4359_v53 }
 0x9da   : > { %v1286_v38 = vadd.f32 %v1279_v37, %v1188_v63 }
 0x9dc   : > { %3703 = vmatmul.msk.f32.gmra.mxu2 %vm403_vm1, %v1286_v38 }
 0x9df   : > { %v1281_v40 = vpop.f32.mrf.mxu0 }
 0x9e0   : > { %v1282_v41 = vadd.f32 %v1281_v40, %v4359_v53 }
 0x9e2   : > { %v1287_v42 = vadd.f32 %v1282_v41, %v1189_v4  ;;  %v4583_v4 = vld [vmem:[%s5091_s2] sm:$0xff] }
 0x9e4   : > { %3704 = vmatmul.msk.f32.gmra.mxu2 %vm403_vm1, %v1287_v42 }
 0xa4f   : > { %v1317_v43 = vpop.f32.mrf.mxu2 }
 0xa50   : > { %v1318_v45 = vadd.f32 %v1317_v43, %v4338_v30 }
 0xa52   : > { %v1333_v46 = vadd.f32 %v1331_v3, %v1318_v45 }
 0xa54   : > { %3974 = vtanh.f32 %v1333_v46 }
 0xa57   : > { %v1320_v47 = vpop.f32.mrf.mxu2 }
 0xa58   : > { %v1321_v48 = vadd.f32 %v1320_v47, %v4340_v32 }
 0xa5a   : > { %v3975_v49 = vpop.eup %3974  ;;  %v1334_v50 = vadd.f32 %v1331_v3, %v1321_v48 }
 0xa5b   : > { %3705 = vmatmul.msk.f32.vlgmr.msrb.gmra.mxu1 %vm343_vm0, %v3975_v49 }
 0xa5c   : > { %3976 = vtanh.f32 %v1334_v50  ;;  %1757 = vmatpush.msrb.mxu1 %v4290_v16  ;;  %v1525_v50 = vmul.f32 11.0, %v4332_v27 }
 0xa5e   : > { %1758 = vmatpush.msrb.mxu1 %v4296_v18 }
 0xa5f   : > { %v1323_v51 = vpop.f32.mrf.mxu2 }
 0xa60   : > { %v1324_v52 = vadd.f32 %v1323_v51, %v4344_v39  ;;  %1759 = vmatpush.msrb.mxu1 %v4305_v21  ;;  %v1527_v51 = vperm.slane %v1525_v50, 0 }
 0xa62   : > { %v3977_v54 = vpop.eup %3976  ;;  %v1335_v55 = vadd.f32 %v1331_v3, %v1324_v52  ;;  %1760 = vmatpush.msrb.mxu1 %v4309_v22 }
 0xa63   : > { %3706 = vmatmul.msk.f32.gmra.mxu1 %vm343_vm0, %v3977_v54 }
 0xa64   : > { %3978 = vtanh.f32 %v1335_v55 }
 0xa67   : > { %v1326_v56 = vpop.f32.mrf.mxu2 }
 0xa68   : > { %v1327_v57 = vadd.f32 %v1326_v56, %v4350_v44 }
 0xa6a   : > { %v3979_v58 = vpop.eup %3978  ;;  %v1336_v59 = vadd.f32 %v1331_v3, %v1327_v57 }
 0xa6b   : > { %3707 = vmatmul.msk.f32.gmra.mxu1 %vm343_vm0, %v3979_v58 }
 0xa6c   : > { %3980 = vtanh.f32 %v1336_v59 }
 0xa72   : > { %v3981_v60 = vpop.eup %3980 }
 0xa73   : > { %3708 = vmatmul.msk.f32.gmra.mxu1 %vm343_vm0, %v3981_v60 }
 0xad8   : > { %v1370_v61 = vpop.f32.mrf.mxu1 }
 0xad9   : > { %v1371_v62 = vadd.f32 %v1370_v61, %v4359_v53 }
 0xadb   : > { %v1382_v63 = vadd.f32 %v1371_v62, %v1284_v31 }
 0xadd   : > { %3709 = vmatmul.msk.f32.vlgmr.msra.gmra.mxu3 %vm403_vm1, %v1382_v63 }
 0xade   : > { %1804 = vmatpush.msra.mxu3 %v4577_v0 }
 0xae0   : > { %v1373_v1 = vpop.f32.mrf.mxu1  ;;  %1805 = vmatpush.msra.mxu3 %v4583_v4 }
 0xae1   : > { %v1374_v5 = vadd.f32 %v1373_v1, %v4359_v53 }
 0xae3   : > { %v1383_v6 = vadd.f32 %v1374_v5, %v1285_v35 }
 0xae5   : > { %3710 = vmatmul.msk.f32.gmra.mxu3 %vm403_vm1, %v1383_v6 }
 0xae8   : > { %v1376_v7 = vpop.f32.mrf.mxu1 }
 0xae9   : > { %v1377_v10 = vadd.f32 %v1376_v7, %v4359_v53 }
 0xaeb   : > { %v1384_v11 = vadd.f32 %v1377_v10, %v1286_v38 }
 0xaed   : > { %3711 = vmatmul.msk.f32.gmra.mxu3 %vm403_vm1, %v1384_v11 }
 0xaf0   : > { %v1379_v8 = vpop.f32.mrf.mxu1 }
 0xaf1   : > { %v1380_v12 = vadd.f32 %v1379_v8, %v4359_v53 }
 0xaf3   : > { %v1385_v9 = vadd.f32 %v1380_v12, %v1287_v42 }
 0xaf5   : > { %3712 = vmatmul.msk.f32.gmra.mxu3 %vm403_vm1, %v1385_v9 }
 0xb60   : > { %v1415_v15 = vpop.f32.mrf.mxu3 }
 0xb61   : > { %v1416_v17 = vadd.f32 %v1415_v15, %v4338_v30 }
 0xb63   : > { %v1431_v19 = vadd.f32 %v1429_v14, %v1416_v17 }
 0xb65   : > { %3982 = vtanh.f32 %v1431_v19 }
 0xb68   : > { %v1418_v20 = vpop.f32.mrf.mxu3 }
 0xb69   : > { %v1419_v23 = vadd.f32 %v1418_v20, %v4340_v32 }
 0xb6b   : > { %v3983_v24 = vpop.eup %3982  ;;  %v1432_v25 = vadd.f32 %v1429_v14, %v1419_v23 }
 0xb6c   : > { %3713 = vmatmul.msk.f32.vlgmr.msra.gmra.mxu0 %vm343_vm0, %v3983_v24 }
 0xb6d   : > { %3984 = vtanh.f32 %v1432_v25  ;;  %1855 = vmatpush.msra.mxu0 %v4290_v16  ;;  %v1623_v25 = vmul.f32 12.0, %v4332_v27 }
 0xb6f   : > { %1856 = vmatpush.msra.mxu0 %v4296_v18 }
 0xb70   : > { %v1421_v26 = vpop.f32.mrf.mxu3 }
 0xb71   : > { %v1422_v28 = vadd.f32 %v1421_v26, %v4344_v39  ;;  %1857 = vmatpush.msra.mxu0 %v4305_v21  ;;  %v1625_v26 = vperm.slane %v1623_v25, 0 }
 0xb73   : > { %v3985_v29 = vpop.eup %3984  ;;  %v1433_v31 = vadd.f32 %v1429_v14, %v1422_v28  ;;  %1858 = vmatpush.msra.mxu0 %v4309_v22 }
 0xb74   : > { %3714 = vmatmul.msk.f32.gmra.mxu0 %vm343_vm0, %v3985_v29 }
 0xb75   : > { %3986 = vtanh.f32 %v1433_v31 }
 0xb78   : > { %v1424_v33 = vpop.f32.mrf.mxu3 }
 0xb79   : > { %v1425_v34 = vadd.f32 %v1424_v33, %v4350_v44 }
 0xb7b   : > { %v3987_v35 = vpop.eup %3986  ;;  %v1434_v36 = vadd.f32 %v1429_v14, %v1425_v34 }
 0xb7c   : > { %3715 = vmatmul.msk.f32.gmra.mxu0 %vm343_vm0, %v3987_v35 }
 0xb7d   : > { %3988 = vtanh.f32 %v1434_v36 }
 0xb83   : > { %v3989_v37 = vpop.eup %3988 }
 0xb84   : > { %3716 = vmatmul.msk.f32.gmra.mxu0 %vm343_vm0, %v3989_v37 }
 0xbe9   : > { %v1468_v38 = vpop.f32.mrf.mxu0 }
 0xbea   : > { %v1469_v40 = vadd.f32 %v1468_v38, %v4359_v53 }
 0xbec   : > { %v1480_v41 = vadd.f32 %v1469_v40, %v1382_v63 }
 0xbee   : > { %3717 = vmatmul.msk.f32.vlgmr.msra.gmra.mxu2 %vm403_vm1, %v1480_v41 }
 0xbef   : > { %1902 = vmatpush.msra.mxu2 %v4577_v0 }
 0xbf1   : > { %v1471_v42 = vpop.f32.mrf.mxu0  ;;  %1903 = vmatpush.msra.mxu2 %v4583_v4 }
 0xbf2   : > { %v1472_v2 = vadd.f32 %v1471_v42, %v4359_v53 }
 0xbf4   : > { %v1481_v3 = vadd.f32 %v1472_v2, %v1383_v6 }
 0xbf6   : > { %3718 = vmatmul.msk.f32.gmra.mxu2 %vm403_vm1, %v1481_v3 }
 0xbf9   : > { %v1474_v43 = vpop.f32.mrf.mxu0 }
 0xbfa   : > { %v1475_v45 = vadd.f32 %v1474_v43, %v4359_v53 }
 0xbfc   : > { %v1482_v46 = vadd.f32 %v1475_v45, %v1384_v11 }
 0xbfe   : > { %3719 = vmatmul.msk.f32.gmra.mxu2 %vm403_vm1, %v1482_v46 }
 0xc01   : > { %v1477_v47 = vpop.f32.mrf.mxu0 }
 0xc02   : > { %v1478_v48 = vadd.f32 %v1477_v47, %v4359_v53 }
 0xc04   : > { %v1483_v49 = vadd.f32 %v1478_v48, %v1385_v9 }
 0xc06   : > { %3720 = vmatmul.msk.f32.gmra.mxu2 %vm403_vm1, %v1483_v49 }
 0xc71   : > { %v1513_v52 = vpop.f32.mrf.mxu2 }
 0xc72   : > { %v1514_v54 = vadd.f32 %v1513_v52, %v4338_v30 }
 0xc74   : > { %v1529_v55 = vadd.f32 %v1527_v51, %v1514_v54 }
 0xc76   : > { %3990 = vtanh.f32 %v1529_v55 }
 0xc79   : > { %v1516_v56 = vpop.f32.mrf.mxu2 }
 0xc7a   : > { %v1517_v57 = vadd.f32 %v1516_v56, %v4340_v32 }
 0xc7c   : > { %v3991_v58 = vpop.eup %3990  ;;  %v1530_v59 = vadd.f32 %v1527_v51, %v1517_v57 }
 0xc7d   : > { %3721 = vmatmul.msk.f32.vlgmr.msra.gmra.mxu1 %vm343_vm0, %v3991_v58 }
 0xc7e   : > { %3992 = vtanh.f32 %v1530_v59  ;;  %1953 = vmatpush.msra.mxu1 %v4290_v16  ;;  %v1721_v59 = vmul.f32 13.0, %v4332_v27 }
 0xc80   : > { %1954 = vmatpush.msra.mxu1 %v4296_v18 }
 0xc81   : > { %v1519_v60 = vpop.f32.mrf.mxu2 }
 0xc82   : > { %v1520_v61 = vadd.f32 %v1519_v60, %v4344_v39  ;;  %1955 = vmatpush.msra.mxu1 %v4305_v21  ;;  %v1723_v60 = vperm.slane %v1721_v59, 0 }
 0xc84   : > { %v3993_v62 = vpop.eup %3992  ;;  %v1531_v63 = vadd.f32 %v1527_v51, %v1520_v61  ;;  %1956 = vmatpush.msra.mxu1 %v4309_v22 }
 0xc85   : > { %3722 = vmatmul.msk.f32.gmra.mxu1 %vm343_vm0, %v3993_v62 }
 0xc86   : > { %3994 = vtanh.f32 %v1531_v63 }
 0xc89   : > { %v1522_v1 = vpop.f32.mrf.mxu2 }
 0xc8a   : > { %v1523_v5 = vadd.f32 %v1522_v1, %v4350_v44 }
 0xc8c   : > { %v3995_v6 = vpop.eup %3994  ;;  %v1532_v7 = vadd.f32 %v1527_v51, %v1523_v5 }
 0xc8d   : > { %3723 = vmatmul.msk.f32.gmra.mxu1 %vm343_vm0, %v3995_v6 }
 0xc8e   : > { %3996 = vtanh.f32 %v1532_v7 }
 0xc94   : > { %v3997_v10 = vpop.eup %3996 }
 0xc95   : > { %3724 = vmatmul.msk.f32.gmra.mxu1 %vm343_vm0, %v3997_v10 }
 0xcfa   : > { %v1566_v11 = vpop.f32.mrf.mxu1 }
 0xcfb   : > { %v1567_v8 = vadd.f32 %v1566_v11, %v4359_v53 }
 0xcfd   : > { %v1578_v12 = vadd.f32 %v1567_v8, %v1480_v41 }
 0xcff   : > { %3725 = vmatmul.msk.f32.vlgmr.msrb.gmra.mxu3 %vm403_vm1, %v1578_v12 }
 0xd00   : > { %2000 = vmatpush.msrb.mxu3 %v4577_v0 }
 0xd02   : > { %v1569_v9 = vpop.f32.mrf.mxu1  ;;  %2001 = vmatpush.msrb.mxu3 %v4583_v4 }
 0xd03   : > { %v1570_v13 = vadd.f32 %v1569_v9, %v4359_v53 }
 0xd05   : > { %v1579_v14 = vadd.f32 %v1570_v13, %v1481_v3 }
 0xd07   : > { %3726 = vmatmul.msk.f32.gmra.mxu3 %vm403_vm1, %v1579_v14 }
 0xd0a   : > { %v1572_v15 = vpop.f32.mrf.mxu1 }
 0xd0b   : > { %v1573_v17 = vadd.f32 %v1572_v15, %v4359_v53 }
 0xd0d   : > { %v1580_v19 = vadd.f32 %v1573_v17, %v1482_v46 }
 0xd0f   : > { %3727 = vmatmul.msk.f32.gmra.mxu3 %vm403_vm1, %v1580_v19 }
 0xd12   : > { %v1575_v20 = vpop.f32.mrf.mxu1 }
 0xd13   : > { %v1576_v23 = vadd.f32 %v1575_v20, %v4359_v53 }
 0xd15   : > { %v1581_v24 = vadd.f32 %v1576_v23, %v1483_v49 }
 0xd17   : > { %3728 = vmatmul.msk.f32.gmra.mxu3 %vm403_vm1, %v1581_v24 }
 0xd82   : > { %v1611_v28 = vpop.f32.mrf.mxu3 }
 0xd83   : > { %v1612_v29 = vadd.f32 %v1611_v28, %v4338_v30 }
 0xd85   : > { %v1627_v31 = vadd.f32 %v1625_v26, %v1612_v29 }
 0xd87   : > { %3998 = vtanh.f32 %v1627_v31 }
 0xd8a   : > { %v1614_v33 = vpop.f32.mrf.mxu3 }
 0xd8b   : > { %v1615_v34 = vadd.f32 %v1614_v33, %v4340_v32 }
 0xd8d   : > { %v3999_v35 = vpop.eup %3998  ;;  %v1628_v36 = vadd.f32 %v1625_v26, %v1615_v34 }
 0xd8e   : > { %3729 = vmatmul.msk.f32.vlgmr.msrb.gmra.mxu0 %vm343_vm0, %v3999_v35 }
 0xd8f   : > { %4000 = vtanh.f32 %v1628_v36  ;;  %2051 = vmatpush.msrb.mxu0 %v4290_v16  ;;  %v1819_v36 = vmul.f32 14.0, %v4332_v27 }
 0xd91   : > { %2052 = vmatpush.msrb.mxu0 %v4296_v18 }
 0xd92   : > { %v1617_v37 = vpop.f32.mrf.mxu3 }
 0xd93   : > { %v1618_v38 = vadd.f32 %v1617_v37, %v4344_v39  ;;  %2053 = vmatpush.msrb.mxu0 %v4305_v21  ;;  %v1821_v37 = vperm.slane %v1819_v36, 0 }
 0xd95   : > { %v4001_v40 = vpop.eup %4000  ;;  %v1629_v41 = vadd.f32 %v1625_v26, %v1618_v38  ;;  %2054 = vmatpush.msrb.mxu0 %v4309_v22 }
 0xd96   : > { %3730 = vmatmul.msk.f32.gmra.mxu0 %vm343_vm0, %v4001_v40 }
 0xd97   : > { %4002 = vtanh.f32 %v1629_v41 }
 0xd9a   : > { %v1620_v42 = vpop.f32.mrf.mxu3 }
 0xd9b   : > { %v1621_v2 = vadd.f32 %v1620_v42, %v4350_v44 }
 0xd9d   : > { %v4003_v3 = vpop.eup %4002  ;;  %v1630_v43 = vadd.f32 %v1625_v26, %v1621_v2 }
 0xd9e   : > { %3731 = vmatmul.msk.f32.gmra.mxu0 %vm343_vm0, %v4003_v3 }
 0xd9f   : > { %4004 = vtanh.f32 %v1630_v43 }
 0xda5   : > { %v4005_v45 = vpop.eup %4004 }
 0xda6   : > { %3732 = vmatmul.msk.f32.gmra.mxu0 %vm343_vm0, %v4005_v45 }
 0xe0b   : > { %v1664_v46 = vpop.f32.mrf.mxu0 }
 0xe0c   : > { %v1665_v47 = vadd.f32 %v1664_v46, %v4359_v53 }
 0xe0e   : > { %v1676_v48 = vadd.f32 %v1665_v47, %v1578_v12 }
 0xe10   : > { %3733 = vmatmul.msk.f32.vlgmr.msrb.gmra.mxu2 %vm403_vm1, %v1676_v48 }
 0xe11   : > { %2098 = vmatpush.msrb.mxu2 %v4577_v0 }
 0xe13   : > { %v1667_v49 = vpop.f32.mrf.mxu0  ;;  %2099 = vmatpush.msrb.mxu2 %v4583_v4 }
 0xe14   : > { %v1668_v50 = vadd.f32 %v1667_v49, %v4359_v53 }
 0xe16   : > { %v1677_v51 = vadd.f32 %v1668_v50, %v1579_v14 }
 0xe18   : > { %3734 = vmatmul.msk.f32.gmra.mxu2 %vm403_vm1, %v1677_v51 }
 0xe1b   : > { %v1670_v52 = vpop.f32.mrf.mxu0 }
 0xe1c   : > { %v1671_v54 = vadd.f32 %v1670_v52, %v4359_v53 }
 0xe1e   : > { %v1678_v55 = vadd.f32 %v1671_v54, %v1580_v19 }
 0xe20   : > { %3735 = vmatmul.msk.f32.gmra.mxu2 %vm403_vm1, %v1678_v55 }
 0xe23   : > { %v1673_v56 = vpop.f32.mrf.mxu0 }
 0xe24   : > { %v1674_v57 = vadd.f32 %v1673_v56, %v4359_v53 }
 0xe26   : > { %v1679_v58 = vadd.f32 %v1674_v57, %v1581_v24 }
 0xe28   : > { %3736 = vmatmul.msk.f32.gmra.mxu2 %vm403_vm1, %v1679_v58 }
 0xe93   : > { %v1709_v61 = vpop.f32.mrf.mxu2 }
 0xe94   : > { %v1710_v62 = vadd.f32 %v1709_v61, %v4338_v30 }
 0xe96   : > { %v1725_v63 = vadd.f32 %v1723_v60, %v1710_v62 }
 0xe98   : > { %4006 = vtanh.f32 %v1725_v63 }
 0xe9b   : > { %v1712_v1 = vpop.f32.mrf.mxu2 }
 0xe9c   : > { %v1713_v5 = vadd.f32 %v1712_v1, %v4340_v32 }
 0xe9e   : > { %v4007_v6 = vpop.eup %4006  ;;  %v1726_v7 = vadd.f32 %v1723_v60, %v1713_v5 }
 0xe9f   : > { %3737 = vmatmul.msk.f32.vlgmr.msrb.gmra.mxu1 %vm343_vm0, %v4007_v6 }
 0xea0   : > { %4008 = vtanh.f32 %v1726_v7  ;;  %2149 = vmatpush.msrb.mxu1 %v4290_v16  ;;  %v1917_v7 = vmul.f32 15.0, %v4332_v27 }
 0xea2   : > { %2150 = vmatpush.msrb.mxu1 %v4296_v18 }
 0xea3   : > { %v1715_v10 = vpop.f32.mrf.mxu2 }
 0xea4   : > { %v1716_v11 = vadd.f32 %v1715_v10, %v4344_v39  ;;  %2151 = vmatpush.msrb.mxu1 %v4305_v21  ;;  %v1919_v10 = vperm.slane %v1917_v7, 0 }
 0xea6   : > { %v4009_v8 = vpop.eup %4008  ;;  %v1727_v12 = vadd.f32 %v1723_v60, %v1716_v11  ;;  %2152 = vmatpush.msrb.mxu1 %v4309_v22 }
 0xea7   : > { %3738 = vmatmul.msk.f32.gmra.mxu1 %vm343_vm0, %v4009_v8 }
 0xea8   : > { %4010 = vtanh.f32 %v1727_v12 }
 0xeab   : > { %v1718_v9 = vpop.f32.mrf.mxu2 }
 0xeac   : > { %v1719_v13 = vadd.f32 %v1718_v9, %v4350_v44 }
 0xeae   : > { %v4011_v14 = vpop.eup %4010  ;;  %v1728_v15 = vadd.f32 %v1723_v60, %v1719_v13 }
 0xeaf   : > { %3739 = vmatmul.msk.f32.gmra.mxu1 %vm343_vm0, %v4011_v14 }
 0xeb0   : > { %4012 = vtanh.f32 %v1728_v15 }
 0xeb6   : > { %v4013_v17 = vpop.eup %4012 }
 0xeb7   : > { %3740 = vmatmul.msk.f32.gmra.mxu1 %vm343_vm0, %v4013_v17 }
 0xf1c   : > { %v1762_v19 = vpop.f32.mrf.mxu1 }
 0xf1d   : > { %v1763_v20 = vadd.f32 %v1762_v19, %v4359_v53 }
 0xf1f   : > { %v1774_v23 = vadd.f32 %v1763_v20, %v1676_v48 }
 0xf21   : > { %3741 = vmatmul.msk.f32.vlgmr.msra.gmra.mxu3 %vm403_vm1, %v1774_v23 }
 0xf22   : > { %2196 = vmatpush.msra.mxu3 %v4577_v0 }
 0xf24   : > { %v1765_v24 = vpop.f32.mrf.mxu1  ;;  %2197 = vmatpush.msra.mxu3 %v4583_v4 }
 0xf25   : > { %v1766_v25 = vadd.f32 %v1765_v24, %v4359_v53 }
 0xf27   : > { %v1775_v26 = vadd.f32 %v1766_v25, %v1677_v51 }
 0xf29   : > { %3742 = vmatmul.msk.f32.gmra.mxu3 %vm403_vm1, %v1775_v26 }
 0xf2c   : > { %v1768_v28 = vpop.f32.mrf.mxu1 }
 0xf2d   : > { %v1769_v29 = vadd.f32 %v1768_v28, %v4359_v53 }
 0xf2f   : > { %v1776_v31 = vadd.f32 %v1769_v29, %v1678_v55 }
 0xf31   : > { %3743 = vmatmul.msk.f32.gmra.mxu3 %vm403_vm1, %v1776_v31 }
 0xf34   : > { %v1771_v33 = vpop.f32.mrf.mxu1 }
 0xf35   : > { %v1772_v34 = vadd.f32 %v1771_v33, %v4359_v53 }
 0xf37   : > { %v1777_v35 = vadd.f32 %v1772_v34, %v1679_v58 }
 0xf39   : > { %3744 = vmatmul.msk.f32.gmra.mxu3 %vm403_vm1, %v1777_v35 }
 0xfa4   : > { %v1807_v38 = vpop.f32.mrf.mxu3 }
 0xfa5   : > { %v1808_v40 = vadd.f32 %v1807_v38, %v4338_v30 }
 0xfa7   : > { %v1823_v41 = vadd.f32 %v1821_v37, %v1808_v40 }
 0xfa9   : > { %4014 = vtanh.f32 %v1823_v41 }
 0xfac   : > { %v1810_v42 = vpop.f32.mrf.mxu3 }
 0xfad   : > { %v1811_v2 = vadd.f32 %v1810_v42, %v4340_v32 }
 0xfaf   : > { %v4015_v3 = vpop.eup %4014  ;;  %v1824_v43 = vadd.f32 %v1821_v37, %v1811_v2 }
 0xfb0   : > { %3745 = vmatmul.msk.f32.vlgmr.msra.gmra.mxu0 %vm343_vm0, %v4015_v3 }
 0xfb1   : > { %4016 = vtanh.f32 %v1824_v43  ;;  %2247 = vmatpush.msra.mxu0 %v4290_v16  ;;  %v2015_v43 = vmul.f32 16.0, %v4332_v27 }
 0xfb3   : > { %2248 = vmatpush.msra.mxu0 %v4296_v18 }
 0xfb4   : > { %v1813_v45 = vpop.f32.mrf.mxu3 }
 0xfb5   : > { %v1814_v46 = vadd.f32 %v1813_v45, %v4344_v39  ;;  %2249 = vmatpush.msra.mxu0 %v4305_v21  ;;  %v2017_v45 = vperm.slane %v2015_v43, 0 }
 0xfb7   : > { %v4017_v47 = vpop.eup %4016  ;;  %v1825_v48 = vadd.f32 %v1821_v37, %v1814_v46  ;;  %2250 = vmatpush.msra.mxu0 %v4309_v22 }
 0xfb8   : > { %3746 = vmatmul.msk.f32.gmra.mxu0 %vm343_vm0, %v4017_v47 }
 0xfb9   : > { %4018 = vtanh.f32 %v1825_v48 }
 0xfbc   : > { %v1816_v49 = vpop.f32.mrf.mxu3 }
 0xfbd   : > { %v1817_v50 = vadd.f32 %v1816_v49, %v4350_v44 }
 0xfbf   : > { %v4019_v51 = vpop.eup %4018  ;;  %v1826_v52 = vadd.f32 %v1821_v37, %v1817_v50 }
 0xfc0   : > { %3747 = vmatmul.msk.f32.gmra.mxu0 %vm343_vm0, %v4019_v51 }
 0xfc1   : > { %4020 = vtanh.f32 %v1826_v52 }
 0xfc7   : > { %v4021_v54 = vpop.eup %4020 }
 0xfc8   : > { %3748 = vmatmul.msk.f32.gmra.mxu0 %vm343_vm0, %v4021_v54 }
0x102d   : > { %v1860_v55 = vpop.f32.mrf.mxu0 }
0x102e   : > { %v1861_v56 = vadd.f32 %v1860_v55, %v4359_v53 }
0x1030   : > { %v1872_v57 = vadd.f32 %v1861_v56, %v1774_v23 }
0x1032   : > { %3749 = vmatmul.msk.f32.vlgmr.msra.gmra.mxu2 %vm403_vm1, %v1872_v57 }
0x1033   : > { %2294 = vmatpush.msra.mxu2 %v4577_v0 }
0x1035   : > { %v1863_v58 = vpop.f32.mrf.mxu0  ;;  %2295 = vmatpush.msra.mxu2 %v4583_v4 }
0x1036   : > { %v1864_v59 = vadd.f32 %v1863_v58, %v4359_v53 }
0x1038   : > { %v1873_v60 = vadd.f32 %v1864_v59, %v1775_v26 }
0x103a   : > { %3750 = vmatmul.msk.f32.gmra.mxu2 %vm403_vm1, %v1873_v60 }
0x103d   : > { %v1866_v61 = vpop.f32.mrf.mxu0 }
0x103e   : > { %v1867_v62 = vadd.f32 %v1866_v61, %v4359_v53 }
0x1040   : > { %v1874_v63 = vadd.f32 %v1867_v62, %v1776_v31 }
0x1042   : > { %3751 = vmatmul.msk.f32.gmra.mxu2 %vm403_vm1, %v1874_v63 }
0x1045   : > { %v1869_v1 = vpop.f32.mrf.mxu0 }
0x1046   : > { %v1870_v5 = vadd.f32 %v1869_v1, %v4359_v53 }
0x1048   : > { %v1875_v6 = vadd.f32 %v1870_v5, %v1777_v35 }
0x104a   : > { %3752 = vmatmul.msk.f32.gmra.mxu2 %vm403_vm1, %v1875_v6 }
0x10b5   : > { %v1905_v11 = vpop.f32.mrf.mxu2 }
0x10b6   : > { %v1906_v8 = vadd.f32 %v1905_v11, %v4338_v30 }
0x10b8   : > { %v1921_v12 = vadd.f32 %v1919_v10, %v1906_v8 }
0x10ba   : > { %4022 = vtanh.f32 %v1921_v12 }
0x10bd   : > { %v1908_v9 = vpop.f32.mrf.mxu2 }
0x10be   : > { %v1909_v13 = vadd.f32 %v1908_v9, %v4340_v32 }
0x10c0   : > { %v4023_v14 = vpop.eup %4022  ;;  %v1922_v15 = vadd.f32 %v1919_v10, %v1909_v13 }
0x10c1   : > { %3753 = vmatmul.msk.f32.vlgmr.msra.gmra.mxu1 %vm343_vm0, %v4023_v14 }
0x10c2   : > { %4024 = vtanh.f32 %v1922_v15  ;;  %2345 = vmatpush.msra.mxu1 %v4290_v16  ;;  %v2113_v15 = vmul.f32 17.0, %v4332_v27 }
0x10c4   : > { %2346 = vmatpush.msra.mxu1 %v4296_v18 }
0x10c5   : > { %v1911_v17 = vpop.f32.mrf.mxu2 }
0x10c6   : > { %v1912_v19 = vadd.f32 %v1911_v17, %v4344_v39  ;;  %2347 = vmatpush.msra.mxu1 %v4305_v21  ;;  %v2115_v17 = vperm.slane %v2113_v15, 0 }
0x10c8   : > { %v4025_v20 = vpop.eup %4024  ;;  %v1923_v23 = vadd.f32 %v1919_v10, %v1912_v19  ;;  %2348 = vmatpush.msra.mxu1 %v4309_v22 }
0x10c9   : > { %3754 = vmatmul.msk.f32.gmra.mxu1 %vm343_vm0, %v4025_v20 }
0x10ca   : > { %4026 = vtanh.f32 %v1923_v23 }
0x10cd   : > { %v1914_v24 = vpop.f32.mrf.mxu2 }
0x10ce   : > { %v1915_v25 = vadd.f32 %v1914_v24, %v4350_v44 }
0x10d0   : > { %v4027_v26 = vpop.eup %4026  ;;  %v1924_v28 = vadd.f32 %v1919_v10, %v1915_v25 }
0x10d1   : > { %3755 = vmatmul.msk.f32.gmra.mxu1 %vm343_vm0, %v4027_v26 }
0x10d2   : > { %4028 = vtanh.f32 %v1924_v28 }
0x10d8   : > { %v4029_v29 = vpop.eup %4028 }
0x10d9   : > { %3756 = vmatmul.msk.f32.gmra.mxu1 %vm343_vm0, %v4029_v29 }
0x113e   : > { %v1958_v31 = vpop.f32.mrf.mxu1 }
0x113f   : > { %v1959_v33 = vadd.f32 %v1958_v31, %v4359_v53 }
0x1141   : > { %v1970_v34 = vadd.f32 %v1959_v33, %v1872_v57 }
0x1143   : > { %3757 = vmatmul.msk.f32.vlgmr.msrb.gmra.mxu3 %vm403_vm1, %v1970_v34 }
0x1144   : > { %2392 = vmatpush.msrb.mxu3 %v4577_v0 }
0x1146   : > { %v1961_v35 = vpop.f32.mrf.mxu1  ;;  %2393 = vmatpush.msrb.mxu3 %v4583_v4 }
0x1147   : > { %v1962_v36 = vadd.f32 %v1961_v35, %v4359_v53 }
0x1149   : > { %v1971_v37 = vadd.f32 %v1962_v36, %v1873_v60 }
0x114b   : > { %3758 = vmatmul.msk.f32.gmra.mxu3 %vm403_vm1, %v1971_v37 }
0x114e   : > { %v1964_v38 = vpop.f32.mrf.mxu1 }
0x114f   : > { %v1965_v40 = vadd.f32 %v1964_v38, %v4359_v53 }
0x1151   : > { %v1972_v41 = vadd.f32 %v1965_v40, %v1874_v63 }
0x1153   : > { %3759 = vmatmul.msk.f32.gmra.mxu3 %vm403_vm1, %v1972_v41 }
0x1156   : > { %v1967_v42 = vpop.f32.mrf.mxu1 }
0x1157   : > { %v1968_v2 = vadd.f32 %v1967_v42, %v4359_v53 }
0x1159   : > { %v1973_v3 = vadd.f32 %v1968_v2, %v1875_v6 }
0x115b   : > { %3760 = vmatmul.msk.f32.gmra.mxu3 %vm403_vm1, %v1973_v3 }
0x11c6   : > { %v2003_v46 = vpop.f32.mrf.mxu3 }
0x11c7   : > { %v2004_v47 = vadd.f32 %v2003_v46, %v4338_v30 }
0x11c9   : > { %v2019_v48 = vadd.f32 %v2017_v45, %v2004_v47 }
0x11cb   : > { %4030 = vtanh.f32 %v2019_v48 }
0x11ce   : > { %v2006_v49 = vpop.f32.mrf.mxu3 }
0x11cf   : > { %v2007_v50 = vadd.f32 %v2006_v49, %v4340_v32 }
0x11d1   : > { %v4031_v51 = vpop.eup %4030  ;;  %v2020_v52 = vadd.f32 %v2017_v45, %v2007_v50 }
0x11d2   : > { %3761 = vmatmul.msk.f32.vlgmr.msrb.gmra.mxu0 %vm343_vm0, %v4031_v51 }
0x11d3   : > { %4032 = vtanh.f32 %v2020_v52  ;;  %2443 = vmatpush.msrb.mxu0 %v4290_v16  ;;  %v2211_v52 = vmul.f32 18.0, %v4332_v27 }
0x11d5   : > { %2444 = vmatpush.msrb.mxu0 %v4296_v18 }
0x11d6   : > { %v2009_v54 = vpop.f32.mrf.mxu3 }
0x11d7   : > { %v2010_v55 = vadd.f32 %v2009_v54, %v4344_v39  ;;  %2445 = vmatpush.msrb.mxu0 %v4305_v21  ;;  %v2213_v54 = vperm.slane %v2211_v52, 0 }
0x11d9   : > { %v4033_v56 = vpop.eup %4032  ;;  %v2021_v57 = vadd.f32 %v2017_v45, %v2010_v55  ;;  %2446 = vmatpush.msrb.mxu0 %v4309_v22 }
0x11da   : > { %3762 = vmatmul.msk.f32.gmra.mxu0 %vm343_vm0, %v4033_v56 }
0x11db   : > { %4034 = vtanh.f32 %v2021_v57 }
0x11de   : > { %v2012_v58 = vpop.f32.mrf.mxu3 }
0x11df   : > { %v2013_v59 = vadd.f32 %v2012_v58, %v4350_v44 }
0x11e1   : > { %v4035_v60 = vpop.eup %4034  ;;  %v2022_v61 = vadd.f32 %v2017_v45, %v2013_v59 }
0x11e2   : > { %3763 = vmatmul.msk.f32.gmra.mxu0 %vm343_vm0, %v4035_v60 }
0x11e3   : > { %4036 = vtanh.f32 %v2022_v61 }
0x11e9   : > { %v4037_v62 = vpop.eup %4036 }
0x11ea   : > { %3764 = vmatmul.msk.f32.gmra.mxu0 %vm343_vm0, %v4037_v62 }
0x124f   : > { %v2056_v63 = vpop.f32.mrf.mxu0 }
0x1250   : > { %v2057_v1 = vadd.f32 %v2056_v63, %v4359_v53 }
0x1252   : > { %v2068_v5 = vadd.f32 %v2057_v1, %v1970_v34 }
0x1254   : > { %3765 = vmatmul.msk.f32.vlgmr.msrb.gmra.mxu2 %vm403_vm1, %v2068_v5 }
0x1255   : > { %2490 = vmatpush.msrb.mxu2 %v4577_v0 }
0x1257   : > { %v2059_v6 = vpop.f32.mrf.mxu0  ;;  %2491 = vmatpush.msrb.mxu2 %v4583_v4 }
0x1258   : > { %v2060_v7 = vadd.f32 %v2059_v6, %v4359_v53 }
0x125a   : > { %v2069_v10 = vadd.f32 %v2060_v7, %v1971_v37 }
0x125c   : > { %3766 = vmatmul.msk.f32.gmra.mxu2 %vm403_vm1, %v2069_v10 }
0x125f   : > { %v2062_v11 = vpop.f32.mrf.mxu0 }
0x1260   : > { %v2063_v8 = vadd.f32 %v2062_v11, %v4359_v53 }
0x1262   : > { %v2070_v12 = vadd.f32 %v2063_v8, %v1972_v41 }
0x1264   : > { %3767 = vmatmul.msk.f32.gmra.mxu2 %vm403_vm1, %v2070_v12 }
0x1267   : > { %v2065_v9 = vpop.f32.mrf.mxu0 }
0x1268   : > { %v2066_v13 = vadd.f32 %v2065_v9, %v4359_v53 }
0x126a   : > { %v2071_v14 = vadd.f32 %v2066_v13, %v1973_v3 }
0x126c   : > { %3768 = vmatmul.msk.f32.gmra.mxu2 %vm403_vm1, %v2071_v14 }
0x12d7   : > { %v2101_v19 = vpop.f32.mrf.mxu2 }
0x12d8   : > { %v2102_v20 = vadd.f32 %v2101_v19, %v4338_v30 }
0x12da   : > { %v2117_v23 = vadd.f32 %v2115_v17, %v2102_v20 }
0x12dc   : > { %4038 = vtanh.f32 %v2117_v23 }
0x12df   : > { %v2104_v24 = vpop.f32.mrf.mxu2 }
0x12e0   : > { %v2105_v25 = vadd.f32 %v2104_v24, %v4340_v32 }
0x12e2   : > { %v4039_v26 = vpop.eup %4038  ;;  %v2118_v28 = vadd.f32 %v2115_v17, %v2105_v25 }
0x12e3   : > { %3769 = vmatmul.msk.f32.vlgmr.msrb.gmra.mxu1 %vm343_vm0, %v4039_v26 }
0x12e4   : > { %4040 = vtanh.f32 %v2118_v28  ;;  %2541 = vmatpush.msrb.mxu1 %v4290_v16  ;;  %v2309_v28 = vmul.f32 19.0, %v4332_v27 }
0x12e6   : > { %2542 = vmatpush.msrb.mxu1 %v4296_v18 }
0x12e7   : > { %v2107_v29 = vpop.f32.mrf.mxu2 }
0x12e8   : > { %v2108_v31 = vadd.f32 %v2107_v29, %v4344_v39  ;;  %2543 = vmatpush.msrb.mxu1 %v4305_v21  ;;  %v2311_v29 = vperm.slane %v2309_v28, 0 }
0x12ea   : > { %v4041_v33 = vpop.eup %4040  ;;  %v2119_v34 = vadd.f32 %v2115_v17, %v2108_v31  ;;  %2544 = vmatpush.msrb.mxu1 %v4309_v22 }
0x12eb   : > { %3770 = vmatmul.msk.f32.gmra.mxu1 %vm343_vm0, %v4041_v33 }
0x12ec   : > { %4042 = vtanh.f32 %v2119_v34 }
0x12ef   : > { %v2110_v35 = vpop.f32.mrf.mxu2 }
0x12f0   : > { %v2111_v36 = vadd.f32 %v2110_v35, %v4350_v44 }
0x12f2   : > { %v4043_v37 = vpop.eup %4042  ;;  %v2120_v38 = vadd.f32 %v2115_v17, %v2111_v36 }
0x12f3   : > { %3771 = vmatmul.msk.f32.gmra.mxu1 %vm343_vm0, %v4043_v37 }
0x12f4   : > { %4044 = vtanh.f32 %v2120_v38 }
0x12fa   : > { %v4045_v40 = vpop.eup %4044 }
0x12fb   : > { %3772 = vmatmul.msk.f32.gmra.mxu1 %vm343_vm0, %v4045_v40 }
0x1360   : > { %v2154_v41 = vpop.f32.mrf.mxu1 }
0x1361   : > { %v2155_v42 = vadd.f32 %v2154_v41, %v4359_v53 }
0x1363   : > { %v2166_v2 = vadd.f32 %v2155_v42, %v2068_v5 }
0x1365   : > { %3773 = vmatmul.msk.f32.vlgmr.msra.gmra.mxu3 %vm403_vm1, %v2166_v2 }
0x1366   : > { %2588 = vmatpush.msra.mxu3 %v4577_v0 }
0x1368   : > { %v2157_v3 = vpop.f32.mrf.mxu1  ;;  %2589 = vmatpush.msra.mxu3 %v4583_v4 }
0x1369   : > { %v2158_v43 = vadd.f32 %v2157_v3, %v4359_v53 }
0x136b   : > { %v2167_v45 = vadd.f32 %v2158_v43, %v2069_v10 }
0x136d   : > { %3774 = vmatmul.msk.f32.gmra.mxu3 %vm403_vm1, %v2167_v45 }
0x1370   : > { %v2160_v46 = vpop.f32.mrf.mxu1 }
0x1371   : > { %v2161_v47 = vadd.f32 %v2160_v46, %v4359_v53 }
0x1373   : > { %v2168_v48 = vadd.f32 %v2161_v47, %v2070_v12 }
0x1375   : > { %3775 = vmatmul.msk.f32.gmra.mxu3 %vm403_vm1, %v2168_v48 }
0x1378   : > { %v2163_v49 = vpop.f32.mrf.mxu1 }
0x1379   : > { %v2164_v50 = vadd.f32 %v2163_v49, %v4359_v53 }
0x137b   : > { %v2169_v51 = vadd.f32 %v2164_v50, %v2071_v14 }
0x137d   : > { %3776 = vmatmul.msk.f32.gmra.mxu3 %vm403_vm1, %v2169_v51 }
0x13e8   : > { %v2199_v55 = vpop.f32.mrf.mxu3 }
0x13e9   : > { %v2200_v56 = vadd.f32 %v2199_v55, %v4338_v30 }
0x13eb   : > { %v2215_v57 = vadd.f32 %v2213_v54, %v2200_v56 }
0x13ed   : > { %4046 = vtanh.f32 %v2215_v57 }
0x13f0   : > { %v2202_v58 = vpop.f32.mrf.mxu3 }
0x13f1   : > { %v2203_v59 = vadd.f32 %v2202_v58, %v4340_v32 }
0x13f3   : > { %v4047_v60 = vpop.eup %4046  ;;  %v2216_v61 = vadd.f32 %v2213_v54, %v2203_v59 }
0x13f4   : > { %3777 = vmatmul.msk.f32.vlgmr.msra.gmra.mxu0 %vm343_vm0, %v4047_v60 }
0x13f5   : > { %4048 = vtanh.f32 %v2216_v61  ;;  %2639 = vmatpush.msra.mxu0 %v4290_v16 }
0x13f7   : > { %2640 = vmatpush.msra.mxu0 %v4296_v18 }
0x13f8   : > { %v2205_v62 = vpop.f32.mrf.mxu3 }
0x13f9   : > { %v2206_v63 = vadd.f32 %v2205_v62, %v4344_v39  ;;  %2641 = vmatpush.msra.mxu0 %v4305_v21 }
0x13fb   : > { %v4049_v1 = vpop.eup %4048  ;;  %v2217_v5 = vadd.f32 %v2213_v54, %v2206_v63  ;;  %2642 = vmatpush.msra.mxu0 %v4309_v22 }
0x13fc   : > { %3778 = vmatmul.msk.f32.gmra.mxu0 %vm343_vm0, %v4049_v1 }
0x13fd   : > { %4050 = vtanh.f32 %v2217_v5 }
0x1400   : > { %v2208_v6 = vpop.f32.mrf.mxu3 }
0x1401   : > { %v2209_v7 = vadd.f32 %v2208_v6, %v4350_v44 }
0x1403   : > { %v4051_v10 = vpop.eup %4050  ;;  %v2218_v11 = vadd.f32 %v2213_v54, %v2209_v7 }
0x1404   : > { %3779 = vmatmul.msk.f32.gmra.mxu0 %vm343_vm0, %v4051_v10 }
0x1405   : > { %4052 = vtanh.f32 %v2218_v11 }
0x140b   : > { %v4053_v8 = vpop.eup %4052 }
0x140c   : > { %3780 = vmatmul.msk.f32.gmra.mxu0 %vm343_vm0, %v4053_v8 }
0x1471   : > { %v2252_v12 = vpop.f32.mrf.mxu0 }
0x1472   : > { %v2253_v9 = vadd.f32 %v2252_v12, %v4359_v53 }
0x1474   : > { %v2264_v13 = vadd.f32 %v2253_v9, %v2166_v2 }
0x1476   : > { %3781 = vmatmul.msk.f32.vlgmr.msra.gmra.mxu2 %vm403_vm1, %v2264_v13 }
0x1477   : > { %2686 = vmatpush.msra.mxu2 %v4577_v0 }
0x1479   : > { %v2255_v14 = vpop.f32.mrf.mxu0  ;;  %2687 = vmatpush.msra.mxu2 %v4583_v4 }
0x147a   : > { %v2256_v15 = vadd.f32 %v2255_v14, %v4359_v53 }
0x147c   : > { %v2265_v17 = vadd.f32 %v2256_v15, %v2167_v45 }
0x147e   : > { %3782 = vmatmul.msk.f32.gmra.mxu2 %vm403_vm1, %v2265_v17 }
0x1481   : > { %v2258_v19 = vpop.f32.mrf.mxu0 }
0x1482   : > { %v2259_v20 = vadd.f32 %v2258_v19, %v4359_v53 }
0x1484   : > { %v2266_v23 = vadd.f32 %v2259_v20, %v2168_v48 }
0x1486   : > { %3783 = vmatmul.msk.f32.gmra.mxu2 %vm403_vm1, %v2266_v23 }
0x1489   : > { %v2261_v24 = vpop.f32.mrf.mxu0 }
0x148a   : > { %v2262_v25 = vadd.f32 %v2261_v24, %v4359_v53  ;;  %v4840_v24 = vld [vmem:[%s5091_s2 + $0x8] sm:$0xff] }
0x148c   : > { %v2267_v26 = vadd.f32 %v2262_v25, %v2169_v51 }
0x148e   : > { %3784 = vmatmul.msk.f32.gmra.mxu2 %vm403_vm1, %v2267_v26 }
0x14f9   : > { %v2297_v31 = vpop.f32.mrf.mxu2 }
0x14fa   : > { %v2298_v33 = vadd.f32 %v2297_v31, %v4338_v30 }
0x14fc   : > { %v2313_v34 = vadd.f32 %v2311_v29, %v2298_v33 }
0x14fe   : > { %4054 = vtanh.f32 %v2313_v34 }
0x1501   : > { %v2300_v35 = vpop.f32.mrf.mxu2 }
0x1502   : > { %v2301_v36 = vadd.f32 %v2300_v35, %v4340_v32 }
0x1504   : > { %v4055_v37 = vpop.eup %4054  ;;  %v2314_v38 = vadd.f32 %v2311_v29, %v2301_v36 }
0x1505   : > { %3785 = vmatmul.msk.f32.vlgmr.msra.gmra.mxu1 %vm343_vm0, %v4055_v37 }
0x1506   : > { %4056 = vtanh.f32 %v2314_v38  ;;  %2737 = vmatpush.msra.mxu1 %v4290_v16  ;;  %v2505_v38 = vmul.f32 21.0, %v4332_v27 }
0x1508   : > { %2738 = vmatpush.msra.mxu1 %v4296_v18 }
0x1509   : > { %v2303_v40 = vpop.f32.mrf.mxu2 }
0x150a   : > { %v2304_v41 = vadd.f32 %v2303_v40, %v4344_v39  ;;  %2739 = vmatpush.msra.mxu1 %v4305_v21  ;;  %v2507_v40 = vperm.slane %v2505_v38, 0 }
0x150c   : > { %v4057_v42 = vpop.eup %4056  ;;  %v2315_v2 = vadd.f32 %v2311_v29, %v2304_v41  ;;  %2740 = vmatpush.msra.mxu1 %v4309_v22 }
0x150d   : > { %3786 = vmatmul.msk.f32.gmra.mxu1 %vm343_vm0, %v4057_v42 }
0x150e   : > { %4058 = vtanh.f32 %v2315_v2 }
0x1511   : > { %v2306_v3 = vpop.f32.mrf.mxu2 }
0x1512   : > { %v2307_v43 = vadd.f32 %v2306_v3, %v4350_v44 }
0x1514   : > { %v4059_v45 = vpop.eup %4058  ;;  %v2316_v46 = vadd.f32 %v2311_v29, %v2307_v43 }
0x1515   : > { %3787 = vmatmul.msk.f32.gmra.mxu1 %vm343_vm0, %v4059_v45 }
0x1516   : > { %4060 = vtanh.f32 %v2316_v46 }
0x151c   : > { %v4061_v47 = vpop.eup %4060 }
0x151d   : > { %3788 = vmatmul.msk.f32.gmra.mxu1 %vm343_vm0, %v4061_v47 }
0x1582   : > { %v2350_v48 = vpop.f32.mrf.mxu1 }
0x1583   : > { %v2351_v49 = vadd.f32 %v2350_v48, %v4359_v53 }
0x1585   : > { %v2362_v50 = vadd.f32 %v2351_v49, %v2264_v13 }
0x1587   : > { %3789 = vmatmul.msk.f32.vlgmr.msrb.gmra.mxu3 %vm403_vm1, %v2362_v50 }
0x1588   : > { %2784 = vmatpush.msrb.mxu3 %v4577_v0  ;;  %v2407_v0 = vmul.f32 20.0, %v4332_v27 }
0x158a   : > { %v2353_v51 = vpop.f32.mrf.mxu1  ;;  %2785 = vmatpush.msrb.mxu3 %v4583_v4  ;;  %v2409_v4 = vperm.slane %v2407_v0, 0 }
0x158b   : > { %v2354_v52 = vadd.f32 %v2353_v51, %v4359_v53 }
0x158d   : > { %v2363_v54 = vadd.f32 %v2354_v52, %v2265_v17 }
0x158f   : > { %3790 = vmatmul.msk.f32.gmra.mxu3 %vm403_vm1, %v2363_v54 }
0x1592   : > { %v2356_v55 = vpop.f32.mrf.mxu1 }
0x1593   : > { %v2357_v56 = vadd.f32 %v2356_v55, %v4359_v53 }
0x1595   : > { %v2364_v57 = vadd.f32 %v2357_v56, %v2266_v23 }
0x1597   : > { %3791 = vmatmul.msk.f32.gmra.mxu3 %vm403_vm1, %v2364_v57 }
0x159a   : > { %v2359_v58 = vpop.f32.mrf.mxu1 }
0x159b   : > { %v2360_v59 = vadd.f32 %v2359_v58, %v4359_v53 }
0x159d   : > { %v2365_v60 = vadd.f32 %v2360_v59, %v2267_v26  ;;  %v4846_v26 = vld [vmem:[%s5091_s2] sm:$0xff] }
0x159f   : > { %3792 = vmatmul.msk.f32.gmra.mxu3 %vm403_vm1, %v2365_v60 }
0x160a   : > { %v2395_v61 = vpop.f32.mrf.mxu3 }
0x160b   : > { %v2396_v62 = vadd.f32 %v2395_v61, %v4338_v30 }
0x160d   : > { %v2411_v63 = vadd.f32 %v2409_v4, %v2396_v62 }
0x160f   : > { %4062 = vtanh.f32 %v2411_v63 }
0x1612   : > { %v2398_v1 = vpop.f32.mrf.mxu3 }
0x1613   : > { %v2399_v5 = vadd.f32 %v2398_v1, %v4340_v32 }
0x1615   : > { %v4063_v6 = vpop.eup %4062  ;;  %v2412_v7 = vadd.f32 %v2409_v4, %v2399_v5 }
0x1616   : > { %3793 = vmatmul.msk.f32.vlgmr.msrb.gmra.mxu0 %vm343_vm0, %v4063_v6 }
0x1617   : > { %4064 = vtanh.f32 %v2412_v7  ;;  %2835 = vmatpush.msrb.mxu0 %v4290_v16  ;;  %v2603_v7 = vmul.f32 22.0, %v4332_v27 }
0x1619   : > { %2836 = vmatpush.msrb.mxu0 %v4296_v18 }
0x161a   : > { %v2401_v10 = vpop.f32.mrf.mxu3 }
0x161b   : > { %v2402_v11 = vadd.f32 %v2401_v10, %v4344_v39  ;;  %2837 = vmatpush.msrb.mxu0 %v4305_v21  ;;  %v2605_v10 = vperm.slane %v2603_v7, 0 }
0x161d   : > { %v4065_v8 = vpop.eup %4064  ;;  %v2413_v12 = vadd.f32 %v2409_v4, %v2402_v11  ;;  %2838 = vmatpush.msrb.mxu0 %v4309_v22 }
0x161e   : > { %3794 = vmatmul.msk.f32.gmra.mxu0 %vm343_vm0, %v4065_v8 }
0x161f   : > { %4066 = vtanh.f32 %v2413_v12 }
0x1622   : > { %v2404_v9 = vpop.f32.mrf.mxu3 }
0x1623   : > { %v2405_v13 = vadd.f32 %v2404_v9, %v4350_v44 }
0x1625   : > { %v4067_v14 = vpop.eup %4066  ;;  %v2414_v15 = vadd.f32 %v2409_v4, %v2405_v13 }
0x1626   : > { %3795 = vmatmul.msk.f32.gmra.mxu0 %vm343_vm0, %v4067_v14 }
0x1627   : > { %4068 = vtanh.f32 %v2414_v15 }
0x162d   : > { %v4069_v17 = vpop.eup %4068 }
0x162e   : > { %3796 = vmatmul.msk.f32.gmra.mxu0 %vm343_vm0, %v4069_v17 }
0x1693   : > { %v2448_v19 = vpop.f32.mrf.mxu0 }
0x1694   : > { %v2449_v20 = vadd.f32 %v2448_v19, %v4359_v53 }
0x1696   : > { %v2460_v23 = vadd.f32 %v2449_v20, %v2362_v50 }
0x1698   : > { %3797 = vmatmul.msk.f32.vlgmr.msrb.gmra.mxu2 %vm403_vm1, %v2460_v23 }
0x1699   : > { %2882 = vmatpush.msrb.mxu2 %v4840_v24 }
0x169b   : > { %v2451_v25 = vpop.f32.mrf.mxu0  ;;  %2883 = vmatpush.msrb.mxu2 %v4846_v26 }
0x169c   : > { %v2452_v28 = vadd.f32 %v2451_v25, %v4359_v53 }
0x169e   : > { %v2461_v29 = vadd.f32 %v2452_v28, %v2363_v54 }
0x16a0   : > { %3798 = vmatmul.msk.f32.gmra.mxu2 %vm403_vm1, %v2461_v29 }
0x16a3   : > { %v2454_v31 = vpop.f32.mrf.mxu0 }
0x16a4   : > { %v2455_v33 = vadd.f32 %v2454_v31, %v4359_v53 }
0x16a6   : > { %v2462_v34 = vadd.f32 %v2455_v33, %v2364_v57 }
0x16a8   : > { %3799 = vmatmul.msk.f32.gmra.mxu2 %vm403_vm1, %v2462_v34 }
0x16ab   : > { %v2457_v35 = vpop.f32.mrf.mxu0 }
0x16ac   : > { %v2458_v36 = vadd.f32 %v2457_v35, %v4359_v53 }
0x16ae   : > { %v2463_v37 = vadd.f32 %v2458_v36, %v2365_v60 }
0x16b0   : > { %3800 = vmatmul.msk.f32.gmra.mxu2 %vm403_vm1, %v2463_v37 }
0x171b   : > { %v2493_v41 = vpop.f32.mrf.mxu2 }
0x171c   : > { %v2494_v42 = vadd.f32 %v2493_v41, %v4338_v30 }
0x171e   : > { %v2509_v2 = vadd.f32 %v2507_v40, %v2494_v42 }
0x1720   : > { %4070 = vtanh.f32 %v2509_v2 }
0x1723   : > { %v2496_v3 = vpop.f32.mrf.mxu2 }
0x1724   : > { %v2497_v43 = vadd.f32 %v2496_v3, %v4340_v32 }
0x1726   : > { %v4071_v45 = vpop.eup %4070  ;;  %v2510_v46 = vadd.f32 %v2507_v40, %v2497_v43 }
0x1727   : > { %3801 = vmatmul.msk.f32.vlgmr.msrb.gmra.mxu1 %vm343_vm0, %v4071_v45 }
0x1728   : > { %4072 = vtanh.f32 %v2510_v46  ;;  %2933 = vmatpush.msrb.mxu1 %v4290_v16  ;;  %v2701_v46 = vmul.f32 23.0, %v4332_v27 }
0x172a   : > { %2934 = vmatpush.msrb.mxu1 %v4296_v18 }
0x172b   : > { %v2499_v47 = vpop.f32.mrf.mxu2 }
0x172c   : > { %v2500_v48 = vadd.f32 %v2499_v47, %v4344_v39  ;;  %2935 = vmatpush.msrb.mxu1 %v4305_v21  ;;  %v2703_v47 = vperm.slane %v2701_v46, 0 }
0x172e   : > { %v4073_v49 = vpop.eup %4072  ;;  %v2511_v50 = vadd.f32 %v2507_v40, %v2500_v48  ;;  %2936 = vmatpush.msrb.mxu1 %v4309_v22 }
0x172f   : > { %3802 = vmatmul.msk.f32.gmra.mxu1 %vm343_vm0, %v4073_v49 }
0x1730   : > { %4074 = vtanh.f32 %v2511_v50 }
0x1733   : > { %v2502_v51 = vpop.f32.mrf.mxu2 }
0x1734   : > { %v2503_v52 = vadd.f32 %v2502_v51, %v4350_v44 }
0x1736   : > { %v4075_v54 = vpop.eup %4074  ;;  %v2512_v55 = vadd.f32 %v2507_v40, %v2503_v52 }
0x1737   : > { %3803 = vmatmul.msk.f32.gmra.mxu1 %vm343_vm0, %v4075_v54 }
0x1738   : > { %4076 = vtanh.f32 %v2512_v55 }
0x173e   : > { %v4077_v56 = vpop.eup %4076 }
0x173f   : > { %3804 = vmatmul.msk.f32.gmra.mxu1 %vm343_vm0, %v4077_v56 }
0x17a4   : > { %v2546_v57 = vpop.f32.mrf.mxu1 }
0x17a5   : > { %v2547_v58 = vadd.f32 %v2546_v57, %v4359_v53 }
0x17a7   : > { %v2558_v59 = vadd.f32 %v2547_v58, %v2460_v23 }
0x17a9   : > { %3805 = vmatmul.msk.f32.vlgmr.msra.gmra.mxu3 %vm403_vm1, %v2558_v59 }
0x17aa   : > { %2980 = vmatpush.msra.mxu3 %v4840_v24 }
0x17ac   : > { %v2549_v60 = vpop.f32.mrf.mxu1  ;;  %2981 = vmatpush.msra.mxu3 %v4846_v26 }
0x17ad   : > { %v2550_v0 = vadd.f32 %v2549_v60, %v4359_v53 }
0x17af   : > { %v2559_v4 = vadd.f32 %v2550_v0, %v2461_v29 }
0x17b1   : > { %3806 = vmatmul.msk.f32.gmra.mxu3 %vm403_vm1, %v2559_v4 }
0x17b4   : > { %v2552_v61 = vpop.f32.mrf.mxu1 }
0x17b5   : > { %v2553_v62 = vadd.f32 %v2552_v61, %v4359_v53 }
0x17b7   : > { %v2560_v63 = vadd.f32 %v2553_v62, %v2462_v34 }
0x17b9   : > { %3807 = vmatmul.msk.f32.gmra.mxu3 %vm403_vm1, %v2560_v63 }
0x17bc   : > { %v2555_v1 = vpop.f32.mrf.mxu1 }
0x17bd   : > { %v2556_v5 = vadd.f32 %v2555_v1, %v4359_v53 }
0x17bf   : > { %v2561_v6 = vadd.f32 %v2556_v5, %v2463_v37 }
0x17c1   : > { %3808 = vmatmul.msk.f32.gmra.mxu3 %vm403_vm1, %v2561_v6 }
0x182c   : > { %v2591_v11 = vpop.f32.mrf.mxu3 }
0x182d   : > { %v2592_v8 = vadd.f32 %v2591_v11, %v4338_v30 }
0x182f   : > { %v2607_v12 = vadd.f32 %v2605_v10, %v2592_v8 }
0x1831   : > { %4078 = vtanh.f32 %v2607_v12 }
0x1834   : > { %v2594_v9 = vpop.f32.mrf.mxu3 }
0x1835   : > { %v2595_v13 = vadd.f32 %v2594_v9, %v4340_v32 }
0x1837   : > { %v4079_v14 = vpop.eup %4078  ;;  %v2608_v15 = vadd.f32 %v2605_v10, %v2595_v13 }
0x1838   : > { %3809 = vmatmul.msk.f32.vlgmr.msra.gmra.mxu0 %vm343_vm0, %v4079_v14 }
0x1839   : > { %4080 = vtanh.f32 %v2608_v15  ;;  %3031 = vmatpush.msra.mxu0 %v4290_v16  ;;  %v2799_v15 = vmul.f32 24.0, %v4332_v27 }
0x183b   : > { %3032 = vmatpush.msra.mxu0 %v4296_v18 }
0x183c   : > { %v2597_v17 = vpop.f32.mrf.mxu3 }
0x183d   : > { %v2598_v19 = vadd.f32 %v2597_v17, %v4344_v39  ;;  %3033 = vmatpush.msra.mxu0 %v4305_v21  ;;  %v2801_v17 = vperm.slane %v2799_v15, 0 }
0x183f   : > { %v4081_v20 = vpop.eup %4080  ;;  %v2609_v23 = vadd.f32 %v2605_v10, %v2598_v19  ;;  %3034 = vmatpush.msra.mxu0 %v4309_v22 }
0x1840   : > { %3810 = vmatmul.msk.f32.gmra.mxu0 %vm343_vm0, %v4081_v20 }
0x1841   : > { %4082 = vtanh.f32 %v2609_v23 }
0x1844   : > { %v2600_v25 = vpop.f32.mrf.mxu3 }
0x1845   : > { %v2601_v28 = vadd.f32 %v2600_v25, %v4350_v44 }
0x1847   : > { %v4083_v29 = vpop.eup %4082  ;;  %v2610_v31 = vadd.f32 %v2605_v10, %v2601_v28 }
0x1848   : > { %3811 = vmatmul.msk.f32.gmra.mxu0 %vm343_vm0, %v4083_v29 }
0x1849   : > { %4084 = vtanh.f32 %v2610_v31 }
0x184f   : > { %v4085_v33 = vpop.eup %4084 }
0x1850   : > { %3812 = vmatmul.msk.f32.gmra.mxu0 %vm343_vm0, %v4085_v33 }
0x18b5   : > { %v2644_v34 = vpop.f32.mrf.mxu0 }
0x18b6   : > { %v2645_v35 = vadd.f32 %v2644_v34, %v4359_v53 }
0x18b8   : > { %v2656_v36 = vadd.f32 %v2645_v35, %v2558_v59 }
0x18ba   : > { %3813 = vmatmul.msk.f32.vlgmr.msra.gmra.mxu2 %vm403_vm1, %v2656_v36 }
0x18bb   : > { %3078 = vmatpush.msra.mxu2 %v4840_v24 }
0x18bd   : > { %v2647_v37 = vpop.f32.mrf.mxu0  ;;  %3079 = vmatpush.msra.mxu2 %v4846_v26 }
0x18be   : > { %v2648_v38 = vadd.f32 %v2647_v37, %v4359_v53 }
0x18c0   : > { %v2657_v40 = vadd.f32 %v2648_v38, %v2559_v4 }
0x18c2   : > { %3814 = vmatmul.msk.f32.gmra.mxu2 %vm403_vm1, %v2657_v40 }
0x18c5   : > { %v2650_v41 = vpop.f32.mrf.mxu0 }
0x18c6   : > { %v2651_v42 = vadd.f32 %v2650_v41, %v4359_v53 }
0x18c8   : > { %v2658_v2 = vadd.f32 %v2651_v42, %v2560_v63 }
0x18ca   : > { %3815 = vmatmul.msk.f32.gmra.mxu2 %vm403_vm1, %v2658_v2 }
0x18cd   : > { %v2653_v3 = vpop.f32.mrf.mxu0 }
0x18ce   : > { %v2654_v43 = vadd.f32 %v2653_v3, %v4359_v53 }
0x18d0   : > { %v2659_v45 = vadd.f32 %v2654_v43, %v2561_v6 }
0x18d2   : > { %3816 = vmatmul.msk.f32.gmra.mxu2 %vm403_vm1, %v2659_v45 }
0x193d   : > { %v2689_v48 = vpop.f32.mrf.mxu2 }
0x193e   : > { %v2690_v49 = vadd.f32 %v2689_v48, %v4338_v30 }
0x1940   : > { %v2705_v50 = vadd.f32 %v2703_v47, %v2690_v49 }
0x1942   : > { %4086 = vtanh.f32 %v2705_v50 }
0x1945   : > { %v2692_v51 = vpop.f32.mrf.mxu2 }
0x1946   : > { %v2693_v52 = vadd.f32 %v2692_v51, %v4340_v32 }
0x1948   : > { %v4087_v54 = vpop.eup %4086  ;;  %v2706_v55 = vadd.f32 %v2703_v47, %v2693_v52 }
0x1949   : > { %3817 = vmatmul.msk.f32.vlgmr.msra.gmra.mxu1 %vm343_vm0, %v4087_v54 }
0x194a   : > { %4088 = vtanh.f32 %v2706_v55  ;;  %3129 = vmatpush.msra.mxu1 %v4290_v16  ;;  %v2897_v55 = vmul.f32 25.0, %v4332_v27 }
0x194c   : > { %3130 = vmatpush.msra.mxu1 %v4296_v18 }
0x194d   : > { %v2695_v56 = vpop.f32.mrf.mxu2 }
0x194e   : > { %v2696_v57 = vadd.f32 %v2695_v56, %v4344_v39  ;;  %3131 = vmatpush.msra.mxu1 %v4305_v21  ;;  %v2899_v56 = vperm.slane %v2897_v55, 0 }
0x1950   : > { %v4089_v58 = vpop.eup %4088  ;;  %v2707_v59 = vadd.f32 %v2703_v47, %v2696_v57  ;;  %3132 = vmatpush.msra.mxu1 %v4309_v22 }
0x1951   : > { %3818 = vmatmul.msk.f32.gmra.mxu1 %vm343_vm0, %v4089_v58 }
0x1952   : > { %4090 = vtanh.f32 %v2707_v59 }
0x1955   : > { %v2698_v60 = vpop.f32.mrf.mxu2 }
0x1956   : > { %v2699_v0 = vadd.f32 %v2698_v60, %v4350_v44 }
0x1958   : > { %v4091_v4 = vpop.eup %4090  ;;  %v2708_v61 = vadd.f32 %v2703_v47, %v2699_v0 }
0x1959   : > { %3819 = vmatmul.msk.f32.gmra.mxu1 %vm343_vm0, %v4091_v4 }
0x195a   : > { %4092 = vtanh.f32 %v2708_v61 }
0x1960   : > { %v4093_v62 = vpop.eup %4092 }
0x1961   : > { %3820 = vmatmul.msk.f32.gmra.mxu1 %vm343_vm0, %v4093_v62 }
0x19c6   : > { %v2742_v63 = vpop.f32.mrf.mxu1 }
0x19c7   : > { %v2743_v1 = vadd.f32 %v2742_v63, %v4359_v53 }
0x19c9   : > { %v2754_v5 = vadd.f32 %v2743_v1, %v2656_v36 }
0x19cb   : > { %3821 = vmatmul.msk.f32.vlgmr.msrb.gmra.mxu3 %vm403_vm1, %v2754_v5 }
0x19cc   : > { %3176 = vmatpush.msrb.mxu3 %v4840_v24 }
0x19ce   : > { %v2745_v6 = vpop.f32.mrf.mxu1  ;;  %3177 = vmatpush.msrb.mxu3 %v4846_v26 }
0x19cf   : > { %v2746_v7 = vadd.f32 %v2745_v6, %v4359_v53 }
0x19d1   : > { %v2755_v10 = vadd.f32 %v2746_v7, %v2657_v40 }
0x19d3   : > { %3822 = vmatmul.msk.f32.gmra.mxu3 %vm403_vm1, %v2755_v10 }
0x19d6   : > { %v2748_v11 = vpop.f32.mrf.mxu1 }
0x19d7   : > { %v2749_v8 = vadd.f32 %v2748_v11, %v4359_v53 }
0x19d9   : > { %v2756_v12 = vadd.f32 %v2749_v8, %v2658_v2 }
0x19db   : > { %3823 = vmatmul.msk.f32.gmra.mxu3 %vm403_vm1, %v2756_v12 }
0x19de   : > { %v2751_v9 = vpop.f32.mrf.mxu1 }
0x19df   : > { %v2752_v13 = vadd.f32 %v2751_v9, %v4359_v53 }
0x19e1   : > { %v2757_v14 = vadd.f32 %v2752_v13, %v2659_v45 }
0x19e3   : > { %3824 = vmatmul.msk.f32.gmra.mxu3 %vm403_vm1, %v2757_v14 }
0x1a4e   : > { %v2787_v19 = vpop.f32.mrf.mxu3 }
0x1a4f   : > { %v2788_v20 = vadd.f32 %v2787_v19, %v4338_v30 }
0x1a51   : > { %v2803_v23 = vadd.f32 %v2801_v17, %v2788_v20 }
0x1a53   : > { %4094 = vtanh.f32 %v2803_v23 }
0x1a56   : > { %v2790_v25 = vpop.f32.mrf.mxu3 }
0x1a57   : > { %v2791_v28 = vadd.f32 %v2790_v25, %v4340_v32 }
0x1a59   : > { %v4095_v29 = vpop.eup %4094  ;;  %v2804_v31 = vadd.f32 %v2801_v17, %v2791_v28 }
0x1a5a   : > { %3825 = vmatmul.msk.f32.vlgmr.msrb.gmra.mxu0 %vm343_vm0, %v4095_v29 }
0x1a5b   : > { %4096 = vtanh.f32 %v2804_v31  ;;  %3227 = vmatpush.msrb.mxu0 %v4290_v16  ;;  %v2995_v31 = vmul.f32 26.0, %v4332_v27 }
0x1a5d   : > { %3228 = vmatpush.msrb.mxu0 %v4296_v18 }
0x1a5e   : > { %v2793_v33 = vpop.f32.mrf.mxu3 }
0x1a5f   : > { %v2794_v34 = vadd.f32 %v2793_v33, %v4344_v39  ;;  %3229 = vmatpush.msrb.mxu0 %v4305_v21  ;;  %v2997_v33 = vperm.slane %v2995_v31, 0 }
0x1a61   : > { %v4097_v35 = vpop.eup %4096  ;;  %v2805_v36 = vadd.f32 %v2801_v17, %v2794_v34  ;;  %3230 = vmatpush.msrb.mxu0 %v4309_v22 }
0x1a62   : > { %3826 = vmatmul.msk.f32.gmra.mxu0 %vm343_vm0, %v4097_v35 }
0x1a63   : > { %4098 = vtanh.f32 %v2805_v36 }
0x1a66   : > { %v2796_v37 = vpop.f32.mrf.mxu3 }
0x1a67   : > { %v2797_v38 = vadd.f32 %v2796_v37, %v4350_v44 }
0x1a69   : > { %v4099_v40 = vpop.eup %4098  ;;  %v2806_v41 = vadd.f32 %v2801_v17, %v2797_v38 }
0x1a6a   : > { %3827 = vmatmul.msk.f32.gmra.mxu0 %vm343_vm0, %v4099_v40 }
0x1a6b   : > { %4100 = vtanh.f32 %v2806_v41 }
0x1a71   : > { %v4101_v42 = vpop.eup %4100 }
0x1a72   : > { %3828 = vmatmul.msk.f32.gmra.mxu0 %vm343_vm0, %v4101_v42 }
0x1ad7   : > { %v2840_v2 = vpop.f32.mrf.mxu0 }
0x1ad8   : > { %v2841_v3 = vadd.f32 %v2840_v2, %v4359_v53 }
0x1ada   : > { %v2852_v43 = vadd.f32 %v2841_v3, %v2754_v5 }
0x1adc   : > { %3829 = vmatmul.msk.f32.vlgmr.msrb.gmra.mxu2 %vm403_vm1, %v2852_v43 }
0x1add   : > { %3274 = vmatpush.msrb.mxu2 %v4840_v24 }
0x1adf   : > { %v2843_v45 = vpop.f32.mrf.mxu0  ;;  %3275 = vmatpush.msrb.mxu2 %v4846_v26 }
0x1ae0   : > { %v2844_v46 = vadd.f32 %v2843_v45, %v4359_v53 }
0x1ae2   : > { %v2853_v47 = vadd.f32 %v2844_v46, %v2755_v10 }
0x1ae4   : > { %3830 = vmatmul.msk.f32.gmra.mxu2 %vm403_vm1, %v2853_v47 }
0x1ae7   : > { %v2846_v48 = vpop.f32.mrf.mxu0 }
0x1ae8   : > { %v2847_v49 = vadd.f32 %v2846_v48, %v4359_v53 }
0x1aea   : > { %v2854_v50 = vadd.f32 %v2847_v49, %v2756_v12 }
0x1aec   : > { %3831 = vmatmul.msk.f32.gmra.mxu2 %vm403_vm1, %v2854_v50 }
0x1aef   : > { %v2849_v51 = vpop.f32.mrf.mxu0 }
0x1af0   : > { %v2850_v52 = vadd.f32 %v2849_v51, %v4359_v53 }
0x1af2   : > { %v2855_v54 = vadd.f32 %v2850_v52, %v2757_v14 }
0x1af4   : > { %3832 = vmatmul.msk.f32.gmra.mxu2 %vm403_vm1, %v2855_v54 }
0x1b5f   : > { %v2885_v57 = vpop.f32.mrf.mxu2 }
0x1b60   : > { %v2886_v58 = vadd.f32 %v2885_v57, %v4338_v30 }
0x1b62   : > { %v2901_v59 = vadd.f32 %v2899_v56, %v2886_v58 }
0x1b64   : > { %4102 = vtanh.f32 %v2901_v59 }
0x1b67   : > { %v2888_v60 = vpop.f32.mrf.mxu2 }
0x1b68   : > { %v2889_v0 = vadd.f32 %v2888_v60, %v4340_v32 }
0x1b6a   : > { %v4103_v4 = vpop.eup %4102  ;;  %v2902_v61 = vadd.f32 %v2899_v56, %v2889_v0 }
0x1b6b   : > { %3833 = vmatmul.msk.f32.vlgmr.msrb.gmra.mxu1 %vm343_vm0, %v4103_v4 }
0x1b6c   : > { %4104 = vtanh.f32 %v2902_v61  ;;  %3325 = vmatpush.msrb.mxu1 %v4290_v16 }
0x1b6e   : > { %3326 = vmatpush.msrb.mxu1 %v4296_v18 }
0x1b6f   : > { %v2891_v62 = vpop.f32.mrf.mxu2 }
0x1b70   : > { %v2892_v63 = vadd.f32 %v2891_v62, %v4344_v39  ;;  %3327 = vmatpush.msrb.mxu1 %v4305_v21 }
0x1b72   : > { %v4105_v1 = vpop.eup %4104  ;;  %v2903_v5 = vadd.f32 %v2899_v56, %v2892_v63  ;;  %3328 = vmatpush.msrb.mxu1 %v4309_v22 }
0x1b73   : > { %3834 = vmatmul.msk.f32.gmra.mxu1 %vm343_vm0, %v4105_v1 }
0x1b74   : > { %4106 = vtanh.f32 %v2903_v5 }
0x1b77   : > { %v2894_v6 = vpop.f32.mrf.mxu2 }
0x1b78   : > { %v2895_v7 = vadd.f32 %v2894_v6, %v4350_v44 }
0x1b7a   : > { %v4107_v10 = vpop.eup %4106  ;;  %v2904_v11 = vadd.f32 %v2899_v56, %v2895_v7 }
0x1b7b   : > { %3835 = vmatmul.msk.f32.gmra.mxu1 %vm343_vm0, %v4107_v10 }
0x1b7c   : > { %4108 = vtanh.f32 %v2904_v11 }
0x1b82   : > { %v4109_v8 = vpop.eup %4108 }
0x1b83   : > { %3836 = vmatmul.msk.f32.gmra.mxu1 %vm343_vm0, %v4109_v8 }
0x1be8   : > { %v2938_v12 = vpop.f32.mrf.mxu1 }
0x1be9   : > { %v2939_v9 = vadd.f32 %v2938_v12, %v4359_v53 }
0x1beb   : > { %v2950_v13 = vadd.f32 %v2939_v9, %v2852_v43 }
0x1bed   : > { %3837 = vmatmul.msk.f32.vlgmr.msra.gmra.mxu3 %vm403_vm1, %v2950_v13 }
0x1bee   : > { %3372 = vmatpush.msra.mxu3 %v4840_v24 }
0x1bf0   : > { %v2941_v14 = vpop.f32.mrf.mxu1  ;;  %3373 = vmatpush.msra.mxu3 %v4846_v26 }
0x1bf1   : > { %v2942_v15 = vadd.f32 %v2941_v14, %v4359_v53 }
0x1bf3   : > { %v2951_v17 = vadd.f32 %v2942_v15, %v2853_v47 }
0x1bf5   : > { %3838 = vmatmul.msk.f32.gmra.mxu3 %vm403_vm1, %v2951_v17 }
0x1bf8   : > { %v2944_v19 = vpop.f32.mrf.mxu1 }
0x1bf9   : > { %v2945_v20 = vadd.f32 %v2944_v19, %v4359_v53 }
0x1bfb   : > { %v2952_v23 = vadd.f32 %v2945_v20, %v2854_v50 }
0x1bfd   : > { %3839 = vmatmul.msk.f32.gmra.mxu3 %vm403_vm1, %v2952_v23 }
0x1c00   : > { %v2947_v25 = vpop.f32.mrf.mxu1 }
0x1c01   : > { %v2948_v28 = vadd.f32 %v2947_v25, %v4359_v53 }
0x1c03   : > { %v2953_v29 = vadd.f32 %v2948_v28, %v2855_v54 }
0x1c05   : > { %3840 = vmatmul.msk.f32.gmra.mxu3 %vm403_vm1, %v2953_v29 }
0x1c70   : > { %v2983_v34 = vpop.f32.mrf.mxu3 }
0x1c71   : > { %v2984_v35 = vadd.f32 %v2983_v34, %v4338_v30  ;;  %v3191_v34 = vmul.f32 28.0, %v4332_v27 }
0x1c73   : > { %v2999_v36 = vadd.f32 %v2997_v33, %v2984_v35  ;;  %v3193_v35 = vperm.slane %v3191_v34, 0 }
0x1c75   : > { %4110 = vtanh.f32 %v2999_v36 }
0x1c78   : > { %v2986_v37 = vpop.f32.mrf.mxu3 }
0x1c79   : > { %v2987_v38 = vadd.f32 %v2986_v37, %v4340_v32 }
0x1c7b   : > { %v4111_v40 = vpop.eup %4110  ;;  %v3000_v41 = vadd.f32 %v2997_v33, %v2987_v38 }
0x1c7c   : > { %3841 = vmatmul.msk.f32.vlgmr.msra.gmra.mxu0 %vm343_vm0, %v4111_v40 }
0x1c7d   : > { %4112 = vtanh.f32 %v3000_v41  ;;  %3423 = vmatpush.msra.mxu0 %v4290_v16 }
0x1c7f   : > { %3424 = vmatpush.msra.mxu0 %v4296_v18 }
0x1c80   : > { %v2989_v42 = vpop.f32.mrf.mxu3 }
0x1c81   : > { %v2990_v2 = vadd.f32 %v2989_v42, %v4344_v39  ;;  %3425 = vmatpush.msra.mxu0 %v4305_v21 }
0x1c83   : > { %v4113_v3 = vpop.eup %4112  ;;  %v3001_v43 = vadd.f32 %v2997_v33, %v2990_v2  ;;  %3426 = vmatpush.msra.mxu0 %v4309_v22 }
0x1c84   : > { %3842 = vmatmul.msk.f32.gmra.mxu0 %vm343_vm0, %v4113_v3 }
0x1c85   : > { %4114 = vtanh.f32 %v3001_v43 }
0x1c88   : > { %v2992_v45 = vpop.f32.mrf.mxu3 }
0x1c89   : > { %v2993_v46 = vadd.f32 %v2992_v45, %v4350_v44 }
0x1c8b   : > { %v4115_v47 = vpop.eup %4114  ;;  %v3002_v48 = vadd.f32 %v2997_v33, %v2993_v46 }
0x1c8c   : > { %3843 = vmatmul.msk.f32.gmra.mxu0 %vm343_vm0, %v4115_v47 }
0x1c8d   : > { %4116 = vtanh.f32 %v3002_v48 }
0x1c93   : > { %v4117_v49 = vpop.eup %4116 }
0x1c94   : > { %3844 = vmatmul.msk.f32.gmra.mxu0 %vm343_vm0, %v4117_v49 }
0x1cf9   : > { %v3036_v50 = vpop.f32.mrf.mxu0 }
0x1cfa   : > { %v3037_v51 = vadd.f32 %v3036_v50, %v4359_v53 }
0x1cfc   : > { %v3048_v52 = vadd.f32 %v3037_v51, %v2950_v13 }
0x1cfe   : > { %3845 = vmatmul.msk.f32.vlgmr.msra.gmra.mxu2 %vm403_vm1, %v3048_v52 }
0x1cff   : > { %3470 = vmatpush.msra.mxu2 %v4840_v24  ;;  %v3093_v24 = vmul.f32 27.0, %v4332_v27 }
0x1d01   : > { %v3039_v54 = vpop.f32.mrf.mxu0  ;;  %3471 = vmatpush.msra.mxu2 %v4846_v26  ;;  %v3095_v26 = vperm.slane %v3093_v24, 0 }
0x1d02   : > { %v3040_v55 = vadd.f32 %v3039_v54, %v4359_v53 }
0x1d04   : > { %v3049_v56 = vadd.f32 %v3040_v55, %v2951_v17 }
0x1d06   : > { %3846 = vmatmul.msk.f32.gmra.mxu2 %vm403_vm1, %v3049_v56 }
0x1d09   : > { %v3042_v57 = vpop.f32.mrf.mxu0 }
0x1d0a   : > { %v3043_v58 = vadd.f32 %v3042_v57, %v4359_v53 }
0x1d0c   : > { %v3050_v59 = vadd.f32 %v3043_v58, %v2952_v23 }
0x1d0e   : > { %3847 = vmatmul.msk.f32.gmra.mxu2 %vm403_vm1, %v3050_v59 }
0x1d11   : > { %v3045_v60 = vpop.f32.mrf.mxu0 }
0x1d12   : > { %v3046_v0 = vadd.f32 %v3045_v60, %v4359_v53 }
0x1d14   : > { %v3051_v4 = vadd.f32 %v3046_v0, %v2953_v29 }
0x1d16   : > { %3848 = vmatmul.msk.f32.gmra.mxu2 %vm403_vm1, %v3051_v4 }
0x1d81   : > { %v3081_v61 = vpop.f32.mrf.mxu2 }
0x1d82   : > { %v3082_v62 = vadd.f32 %v3081_v61, %v4338_v30  ;;  %v3289_v61 = vmul.f32 29.0, %v4332_v27 }
0x1d84   : > { %v3097_v63 = vadd.f32 %v3095_v26, %v3082_v62  ;;  %v3291_v62 = vperm.slane %v3289_v61, 0 }
0x1d86   : > { %4118 = vtanh.f32 %v3097_v63 }
0x1d89   : > { %v3084_v1 = vpop.f32.mrf.mxu2 }
0x1d8a   : > { %v3085_v5 = vadd.f32 %v3084_v1, %v4340_v32 }
0x1d8c   : > { %v4119_v6 = vpop.eup %4118  ;;  %v3098_v7 = vadd.f32 %v3095_v26, %v3085_v5 }
0x1d8d   : > { %3849 = vmatmul.msk.f32.vlgmr.msra.gmra.mxu1 %vm343_vm0, %v4119_v6 }
0x1d8e   : > { %4120 = vtanh.f32 %v3098_v7  ;;  %3521 = vmatpush.msra.mxu1 %v4290_v16 }
0x1d90   : > { %3522 = vmatpush.msra.mxu1 %v4296_v18 }
0x1d91   : > { %v3087_v10 = vpop.f32.mrf.mxu2 }
0x1d92   : > { %v3088_v11 = vadd.f32 %v3087_v10, %v4344_v39  ;;  %3523 = vmatpush.msra.mxu1 %v4305_v21 }
0x1d94   : > { %v4121_v8 = vpop.eup %4120  ;;  %v3099_v12 = vadd.f32 %v3095_v26, %v3088_v11  ;;  %3524 = vmatpush.msra.mxu1 %v4309_v22 }
0x1d95   : > { %3850 = vmatmul.msk.f32.gmra.mxu1 %vm343_vm0, %v4121_v8 }
0x1d96   : > { %4122 = vtanh.f32 %v3099_v12 }
0x1d99   : > { %v3090_v9 = vpop.f32.mrf.mxu2 }
0x1d9a   : > { %v3091_v13 = vadd.f32 %v3090_v9, %v4350_v44 }
0x1d9c   : > { %v4123_v14 = vpop.eup %4122  ;;  %v3100_v15 = vadd.f32 %v3095_v26, %v3091_v13 }
0x1d9d   : > { %3851 = vmatmul.msk.f32.gmra.mxu1 %vm343_vm0, %v4123_v14 }
0x1d9e   : > { %4124 = vtanh.f32 %v3100_v15 }
0x1da4   : > { %v4125_v16 = vpop.eup %4124 }
0x1da5   : > { %3852 = vmatmul.msk.f32.gmra.mxu1 %vm343_vm0, %v4125_v16 }
0x1e0a   : > { %v3134_v18 = vpop.f32.mrf.mxu1 }
0x1e0b   : > { %v3135_v21 = vadd.f32 %v3134_v18, %v4359_v53 }
0x1e0d   : > { %v3146_v17 = vadd.f32 %v3135_v21, %v3048_v52 }
0x1e0f   : > { %3853 = vmatmul.msk.f32.vlgmr.msrb.gmra.mxu3 %vm403_vm1, %v3146_v17 }
0x1e12   : > { %v3137_v22 = vpop.f32.mrf.mxu1 }
0x1e13   : > { %v3138_v19 = vadd.f32 %v3137_v22, %v4359_v53 }
0x1e15   : > { %v3147_v20 = vadd.f32 %v3138_v19, %v3049_v56 }
0x1e17   : > { %3854 = vmatmul.msk.f32.gmra.mxu3 %vm403_vm1, %v3147_v20 }
0x1e1a   : > { %v3140_v23 = vpop.f32.mrf.mxu1 }
0x1e1b   : > { %v3141_v25 = vadd.f32 %v3140_v23, %v4359_v53 }
0x1e1d   : > { %v3148_v28 = vadd.f32 %v3141_v25, %v3050_v59 }
0x1e1f   : > { %3855 = vmatmul.msk.f32.gmra.mxu3 %vm403_vm1, %v3148_v28 }
0x1e22   : > { %v3143_v29 = vpop.f32.mrf.mxu1 }
0x1e23   : > { %v3144_v31 = vadd.f32 %v3143_v29, %v4359_v53 }
0x1e25   : > { %v3149_v33 = vadd.f32 %v3144_v31, %v3051_v4 }
0x1e27   : > { %3856 = vmatmul.msk.f32.gmra.mxu3 %vm403_vm1, %v3149_v33 }
0x1e92   : > { %v3179_v36 = vpop.f32.mrf.mxu3 }
0x1e93   : > { %v3180_v37 = vadd.f32 %v3179_v36, %v4338_v30  ;;  %v3387_v36 = vmul.f32 30.0, %v4332_v27 }
0x1e95   : > { %v3195_v38 = vadd.f32 %v3193_v35, %v3180_v37  ;;  %v3389_v37 = vperm.slane %v3387_v36, 0 }
0x1e97   : > { %4126 = vtanh.f32 %v3195_v38 }
0x1e9a   : > { %v3182_v40 = vpop.f32.mrf.mxu3 }
0x1e9b   : > { %v3183_v41 = vadd.f32 %v3182_v40, %v4340_v32 }
0x1e9d   : > { %v4127_v42 = vpop.eup %4126  ;;  %v3196_v2 = vadd.f32 %v3193_v35, %v3183_v41 }
0x1e9e   : > { %3857 = vmatmul.msk.f32.vlgmr.msrb.gmra.mxu0 %vm343_vm0, %v4127_v42 }
0x1e9f   : > { %4128 = vtanh.f32 %v3196_v2 }
0x1ea2   : > { %v3185_v3 = vpop.f32.mrf.mxu3 }
0x1ea3   : > { %v3186_v43 = vadd.f32 %v3185_v3, %v4344_v39 }
0x1ea5   : > { %v4129_v45 = vpop.eup %4128  ;;  %v3197_v46 = vadd.f32 %v3193_v35, %v3186_v43 }
0x1ea6   : > { %3858 = vmatmul.msk.f32.gmra.mxu0 %vm343_vm0, %v4129_v45 }
0x1ea7   : > { %4130 = vtanh.f32 %v3197_v46 }
0x1eaa   : > { %v3188_v47 = vpop.f32.mrf.mxu3 }
0x1eab   : > { %v3189_v48 = vadd.f32 %v3188_v47, %v4350_v44 }
0x1ead   : > { %v4131_v49 = vpop.eup %4130  ;;  %v3198_v50 = vadd.f32 %v3193_v35, %v3189_v48 }
0x1eae   : > { %3859 = vmatmul.msk.f32.gmra.mxu0 %vm343_vm0, %v4131_v49 }
0x1eaf   : > { %4132 = vtanh.f32 %v3198_v50 }
0x1eb5   : > { %v4133_v51 = vpop.eup %4132 }
0x1eb6   : > { %3860 = vmatmul.msk.f32.gmra.mxu0 %vm343_vm0, %v4133_v51 }
0x1f1b   : > { %v3232_v52 = vpop.f32.mrf.mxu0 }
0x1f1c   : > { %v3233_v54 = vadd.f32 %v3232_v52, %v4359_v53 }
0x1f1e   : > { %v3244_v55 = vadd.f32 %v3233_v54, %v3146_v17 }
0x1f20   : > { %3861 = vmatmul.msk.f32.vlgmr.msrb.gmra.mxu2 %vm403_vm1, %v3244_v55 }
0x1f23   : > { %v3235_v56 = vpop.f32.mrf.mxu0 }
0x1f24   : > { %v3236_v57 = vadd.f32 %v3235_v56, %v4359_v53 }
0x1f26   : > { %v3245_v58 = vadd.f32 %v3236_v57, %v3147_v20 }
0x1f28   : > { %3862 = vmatmul.msk.f32.gmra.mxu2 %vm403_vm1, %v3245_v58 }
0x1f2b   : > { %v3238_v59 = vpop.f32.mrf.mxu0 }
0x1f2c   : > { %v3239_v60 = vadd.f32 %v3238_v59, %v4359_v53 }
0x1f2e   : > { %v3246_v0 = vadd.f32 %v3239_v60, %v3148_v28 }
0x1f30   : > { %3863 = vmatmul.msk.f32.gmra.mxu2 %vm403_vm1, %v3246_v0 }
0x1f33   : > { %v3241_v4 = vpop.f32.mrf.mxu0 }
0x1f34   : > { %v3242_v24 = vadd.f32 %v3241_v4, %v4359_v53 }
0x1f36   : > { %v3247_v26 = vadd.f32 %v3242_v24, %v3149_v33 }
0x1f38   : > { %3864 = vmatmul.msk.f32.gmra.mxu2 %vm403_vm1, %v3247_v26 }
0x1fa3   : > { %v3277_v63 = vpop.f32.mrf.mxu2 }
0x1fa4   : > { %v3278_v1 = vadd.f32 %v3277_v63, %v4338_v30  ;;  %v3485_v63 = vmul.f32 31.0, %v4332_v27 }
0x1fa6   : > { %v3293_v5 = vadd.f32 %v3291_v62, %v3278_v1  ;;  %v3487_v1 = vperm.slane %v3485_v63, 0 }
0x1fa8   : > { %4134 = vtanh.f32 %v3293_v5 }
0x1fab   : > { %v3280_v6 = vpop.f32.mrf.mxu2 }
0x1fac   : > { %v3281_v7 = vadd.f32 %v3280_v6, %v4340_v32 }
0x1fae   : > { %v4135_v10 = vpop.eup %4134  ;;  %v3294_v11 = vadd.f32 %v3291_v62, %v3281_v7 }
0x1faf   : > { %3865 = vmatmul.msk.f32.vlgmr.msrb.gmra.mxu1 %vm343_vm0, %v4135_v10 }
0x1fb0   : > { %4136 = vtanh.f32 %v3294_v11 }
0x1fb3   : > { %v3283_v8 = vpop.f32.mrf.mxu2 }
0x1fb4   : > { %v3284_v12 = vadd.f32 %v3283_v8, %v4344_v39 }
0x1fb6   : > { %v4137_v9 = vpop.eup %4136  ;;  %v3295_v13 = vadd.f32 %v3291_v62, %v3284_v12 }
0x1fb7   : > { %3866 = vmatmul.msk.f32.gmra.mxu1 %vm343_vm0, %v4137_v9 }
0x1fb8   : > { %4138 = vtanh.f32 %v3295_v13 }
0x1fbb   : > { %v3286_v14 = vpop.f32.mrf.mxu2 }
0x1fbc   : > { %v3287_v15 = vadd.f32 %v3286_v14, %v4350_v44 }
0x1fbe   : > { %v4139_v16 = vpop.eup %4138  ;;  %v3296_v18 = vadd.f32 %v3291_v62, %v3287_v15 }
0x1fbf   : > { %3867 = vmatmul.msk.f32.gmra.mxu1 %vm343_vm0, %v4139_v16 }
0x1fc0   : > { %4140 = vtanh.f32 %v3296_v18 }
0x1fc6   : > { %v4141_v21 = vpop.eup %4140 }
0x1fc7   : > { %3868 = vmatmul.msk.f32.gmra.mxu1 %vm343_vm0, %v4141_v21 }
0x202c   : > { %v3330_v17 = vpop.f32.mrf.mxu1 }
0x202d   : > { %v3331_v22 = vadd.f32 %v3330_v17, %v4359_v53 }
0x202f   : > { %v3342_v19 = vadd.f32 %v3331_v22, %v3244_v55 }
0x2031   : > { %3869 = vmatmul.msk.f32.vlgmr.msra.gmra.mxu3 %vm403_vm1, %v3342_v19 }
0x2034   : > { %v3333_v20 = vpop.f32.mrf.mxu1 }
0x2035   : > { %v3334_v23 = vadd.f32 %v3333_v20, %v4359_v53 }
0x2037   : > { %v3343_v25 = vadd.f32 %v3334_v23, %v3245_v58 }
0x2039   : > { %3870 = vmatmul.msk.f32.gmra.mxu3 %vm403_vm1, %v3343_v25 }
0x203c   : > { %v3336_v28 = vpop.f32.mrf.mxu1 }
0x203d   : > { %v3337_v29 = vadd.f32 %v3336_v28, %v4359_v53 }
0x203f   : > { %v3344_v31 = vadd.f32 %v3337_v29, %v3246_v0 }
0x2041   : > { %3871 = vmatmul.msk.f32.gmra.mxu3 %vm403_vm1, %v3344_v31 }
0x2044   : > { %v3339_v33 = vpop.f32.mrf.mxu1 }
0x2045   : > { %v3340_v34 = vadd.f32 %v3339_v33, %v4359_v53 }
0x2047   : > { %v3345_v35 = vadd.f32 %v3340_v34, %v3247_v26 }
0x2049   : > { %3872 = vmatmul.msk.f32.gmra.mxu3 %vm403_vm1, %v3345_v35 }
0x20b4   : > { %v3375_v38 = vpop.f32.mrf.mxu3 }
0x20b5   : > { %v3376_v40 = vadd.f32 %v3375_v38, %v4338_v30 }
0x20b7   : > { %v3391_v41 = vadd.f32 %v3389_v37, %v3376_v40 }
0x20b9   : > { %4142 = vtanh.f32 %v3391_v41 }
0x20bc   : > { %v3378_v42 = vpop.f32.mrf.mxu3 }
0x20bd   : > { %v3379_v2 = vadd.f32 %v3378_v42, %v4340_v32 }
0x20bf   : > { %v4143_v3 = vpop.eup %4142  ;;  %v3392_v43 = vadd.f32 %v3389_v37, %v3379_v2 }
0x20c0   : > { %3873 = vmatmul.msk.f32.vlgmr.msra.gmra.mxu0 %vm343_vm0, %v4143_v3 }
0x20c1   : > { %4144 = vtanh.f32 %v3392_v43 }
0x20c4   : > { %v3381_v45 = vpop.f32.mrf.mxu3 }
0x20c5   : > { %v3382_v46 = vadd.f32 %v3381_v45, %v4344_v39 }
0x20c7   : > { %v4145_v47 = vpop.eup %4144  ;;  %v3393_v48 = vadd.f32 %v3389_v37, %v3382_v46 }
0x20c8   : > { %3874 = vmatmul.msk.f32.gmra.mxu0 %vm343_vm0, %v4145_v47 }
0x20c9   : > { %4146 = vtanh.f32 %v3393_v48 }
0x20cc   : > { %v3384_v49 = vpop.f32.mrf.mxu3 }
0x20cd   : > { %v3385_v50 = vadd.f32 %v3384_v49, %v4350_v44 }
0x20cf   : > { %v4147_v51 = vpop.eup %4146  ;;  %v3394_v52 = vadd.f32 %v3389_v37, %v3385_v50 }
0x20d0   : > { %3875 = vmatmul.msk.f32.gmra.mxu0 %vm343_vm0, %v4147_v51 }
0x20d1   : > { %4148 = vtanh.f32 %v3394_v52 }
0x20d7   : > { %v4149_v54 = vpop.eup %4148 }
0x20d8   : > { %3876 = vmatmul.msk.f32.gmra.mxu0 %vm343_vm0, %v4149_v54 }
0x213d   : > { %v3428_v55 = vpop.f32.mrf.mxu0 }
0x213e   : > { %v3429_v56 = vadd.f32 %v3428_v55, %v4359_v53 }
0x2140   : > { %v3440_v57 = vadd.f32 %v3429_v56, %v3342_v19 }
0x2142   : > { %3877 = vmatmul.msk.f32.vlgmr.msra.gmra.mxu2 %vm403_vm1, %v3440_v57 }
0x2145   : > { %v3431_v58 = vpop.f32.mrf.mxu0 }
0x2146   : > { %v3432_v59 = vadd.f32 %v3431_v58, %v4359_v53 }
0x2148   : > { %v3441_v60 = vadd.f32 %v3432_v59, %v3343_v25 }
0x214a   : > { %3878 = vmatmul.msk.f32.gmra.mxu2 %vm403_vm1, %v3441_v60 }
0x214d   : > { %v3434_v0 = vpop.f32.mrf.mxu0 }
0x214e   : > { %v3435_v4 = vadd.f32 %v3434_v0, %v4359_v53 }
0x2150   : > { %v3442_v24 = vadd.f32 %v3435_v4, %v3344_v31 }
0x2152   : > { %3879 = vmatmul.msk.f32.gmra.mxu2 %vm403_vm1, %v3442_v24 }
0x2155   : > { %v3437_v26 = vpop.f32.mrf.mxu0 }
0x2156   : > { %v3438_v61 = vadd.f32 %v3437_v26, %v4359_v53 }
0x2158   : > { %v3443_v62 = vadd.f32 %v3438_v61, %v3345_v35 }
0x215a   : > { %3880 = vmatmul.msk.f32.gmra.mxu2 %vm403_vm1, %v3443_v62 }
0x21c5   : > { %v3473_v5 = vpop.f32.mrf.mxu2 }
0x21c6   : > { %v3474_v6 = vadd.f32 %v3473_v5, %v4338_v30 }
0x21c8   : > { %v3489_v7 = vadd.f32 %v3487_v1, %v3474_v6 }
0x21ca   : > { %4150 = vtanh.f32 %v3489_v7 }
0x21cd   : > { %v3476_v10 = vpop.f32.mrf.mxu2 }
0x21ce   : > { %v3477_v11 = vadd.f32 %v3476_v10, %v4340_v32 }
0x21d0   : > { %v4151_v8 = vpop.eup %4150  ;;  %v3490_v12 = vadd.f32 %v3487_v1, %v3477_v11 }
0x21d1   : > { %3881 = vmatmul.msk.f32.vlgmr.msra.gmra.mxu1 %vm343_vm0, %v4151_v8 }
0x21d2   : > { %4152 = vtanh.f32 %v3490_v12 }
0x21d5   : > { %v3479_v9 = vpop.f32.mrf.mxu2 }
0x21d6   : > { %v3480_v13 = vadd.f32 %v3479_v9, %v4344_v39 }
0x21d8   : > { %v4153_v14 = vpop.eup %4152  ;;  %v3491_v27 = vadd.f32 %v3487_v1, %v3480_v13 }
0x21d9   : > { %3882 = vmatmul.msk.f32.gmra.mxu1 %vm343_vm0, %v4153_v14 }
0x21da   : > { %4154 = vtanh.f32 %v3491_v27 }
0x21dd   : > { %v3482_v30 = vpop.f32.mrf.mxu2 }
0x21de   : > { %v3483_v15 = vadd.f32 %v3482_v30, %v4350_v44 }
0x21e0   : > { %v4155_v16 = vpop.eup %4154  ;;  %v3492_v18 = vadd.f32 %v3487_v1, %v3483_v15 }
0x21e1   : > { %3883 = vmatmul.msk.f32.gmra.mxu1 %vm343_vm0, %v4155_v16 }
0x21e2   : > { %4156 = vtanh.f32 %v3492_v18 }
0x21e8   : > { %v4157_v32 = vpop.eup %4156 }
0x21e9   : > { %3884 = vmatmul.msk.f32.gmra.mxu1 %vm343_vm0, %v4157_v32 }
0x224e   : > { %v3526_v21 = vpop.f32.mrf.mxu1 }
0x224f   : > { %v3527_v17 = vadd.f32 %v3526_v21, %v4359_v53 }
0x2251   : > { %v3538_v39 = vadd.f32 %v3527_v17, %v3440_v57 }
0x2253   : > { %3542 = vst.msk [vmem:[%s329_s10] sm:$0xff] %vm403_vm1, %v3538_v39 }
0x2256   : > { %v3529_v22 = vpop.f32.mrf.mxu1 }
0x2257   : > { %v3530_v44 = vadd.f32 %v3529_v22, %v4359_v53 }
0x2259   : > { %v3539_v19 = vadd.f32 %v3530_v44, %v3441_v60 }
0x225b   : > { %3543 = vst.msk [vmem:[%s329_s10 + $0x8] sm:$0xff] %vm403_vm1, %v3539_v19 }
0x225e   : > { %v3532_v20 = vpop.f32.mrf.mxu1 }
0x225f   : > { %v3533_v23 = vadd.f32 %v3532_v20, %v4359_v53 }
0x2261   : > { %v3540_v25 = vadd.f32 %v3533_v23, %v3442_v24 }
0x2263   : > { %3544 = vst.msk [vmem:[%s329_s10 + $0x10] sm:$0xff] %vm403_vm1, %v3540_v25 }
0x2266   : > { %v3535_v28 = vpop.f32.mrf.mxu1 }
0x2267   : > { %v3536_v29 = vadd.f32 %v3535_v28, %v4359_v53 }
0x2269   : > { %v3541_v31 = vadd.f32 %v3536_v29, %v3443_v62 }
0x226b   : > { %3545 = vst.msk [vmem:[%s329_s10 + $0x18] sm:$0xff] %vm403_vm1, %v3541_v31 }
0x226c PF: > { %s18_s27 = sadd.s32 1, %s4168_s27  }
0x226d   : > { %p15_p4 = scmp.ge.s32.totalorder %s18_s27, 4  }
0x226f   :  { %17 = sbr.rel (!%p15_p4) target bundleno = 1 (0x1), region = 85 }

</bundles_post_ra>
